<compile_context>
chip_gen: v7x
topology: tpu7x:2x2x1
jax: 0.10.0
libtpu: 0.0.40
codegen_flags: <defaults>
</compile_context>

<pallas_src>
import functools

import jax
import jax.numpy as jnp
from jax.experimental import pallas as pl
from jax.experimental.pallas import tpu as pltpu

EPS = 1e-5                        # nn.BatchNorm3d default
_ALIGN = 16                       # bf16 sublane tile -> keep row tiles / shifts 16-aligned
_FOLD27_MAX_ROWS = 1024           # use full 27-tap im2col when T*H*W <= this (or Cin == 3)
_KCHUNK_BYTES = 1024 * 1024       # max bf16 weight bytes loaded per matmul chunk


def _round_up(x, m):
    return ((x + m - 1) // m) * m


def _pick_tm(cout, rows):
    tm = 1024 if cout <= 128 else (512 if cout <= 256 else 256)
    return min(tm, _round_up(rows, _ALIGN))


@functools.lru_cache(maxsize=None)
def _vmem_limit_bytes():
    """~80% of physical VMEM: ~51 MiB on v7x (64 MiB), ~102 MiB on v5e/v6e (128 MiB)."""
    cap = None
    try:
        cap = getattr(pltpu.get_tpu_info(), "vmem_capacity_bytes", None)
    except Exception:
        cap = None
    if not cap:
        cap = 64 * 1024 * 1024
    return int(cap * 0.8)


@functools.lru_cache(maxsize=None)
def _buffered_supported():
    """Probe (compile + run + verify) whether pipeline_mode=pl.Buffered(1) works
    for top-level pallas_call input specs.  Falls back cleanly if not."""
    try:
        def k(a_ref, b_ref, o_ref):
            o_ref[...] = a_ref[...] + b_ref[...]

        a = jnp.full((16, 128), 2.0, jnp.float32)
        b = jnp.arange(32 * 128, dtype=jnp.float32).reshape(32, 128)
        f = pl.pallas_call(
            k,
            out_shape=jax.ShapeDtypeStruct((32, 128), jnp.float32),
            grid=(2,),
            in_specs=[pl.BlockSpec((16, 128), lambda i: (0, 0),
                                   pipeline_mode=pl.Buffered(1)),
                      pl.BlockSpec((16, 128), lambda i: (i, 0))],
            out_specs=pl.BlockSpec((16, 128), lambda i: (i, 0)),
        )
        r = jax.block_until_ready(jax.jit(f)(a, b))
        return bool(jnp.allclose(r, b + 2.0))
    except Exception:
        return False


def _invariant_spec(block_shape, index_map):
    """Spec for (nearly) grid-invariant blocks: single-buffer them when supported so
    big resident activations / weights are not allocated twice in VMEM."""
    if _buffered_supported():
        return pl.BlockSpec(block_shape, index_map, pipeline_mode=pl.Buffered(1))
    return pl.BlockSpec(block_shape, index_map)


# ---------------------------------------------------------------------------
# Kernel A: full-27-tap (im2col) conv -> one chunked matmul per row tile,
#           plus per-tile partial BatchNorm statistics (iota-masked).
# ---------------------------------------------------------------------------
@functools.lru_cache(maxsize=None)
def _build_conv27_call(N, Rc, K, Cout, TM, R):
    nt = Rc // TM
    KC = K
    for d in (1, 3, 9, 27):                       # K = 27*Cin, so all d divide K
        kc = K // d
        if kc * Cout * 2 <= _KCHUNK_BYTES or d == 27:
            KC = kc
            break
    n_kc = K // KC

    def kernel(p_ref, w_ref, y_ref, st_ref):
        i = pl.program_id(1)
        acc = jnp.dot(p_ref[0, :, 0:KC], w_ref[0:KC, :],
                      preferred_element_type=jnp.float32)
        for c in range(1, n_kc):
            acc = acc + jnp.dot(p_ref[0, :, c * KC:(c + 1) * KC],
                                w_ref[c * KC:(c + 1) * KC, :],
                                preferred_element_type=jnp.float32)
        y_ref[0] = acc.astype(y_ref.dtype)
        # valid-row mask generated in-kernel (no mask DMA): rows >= R are padding.
        row = jax.lax.broadcasted_iota(jnp.int32, (TM, 1), 0) + i * TM
        ym = jnp.where(row < R, acc, 0.0)
        st_ref[0, 0, 0:1, :] = jnp.sum(ym, axis=0, keepdims=True)
        st_ref[0, 0, 1:2, :] = jnp.sum(ym * ym, axis=0, keepdims=True)

    call = pl.pallas_call(
        kernel,
        out_shape=(jax.ShapeDtypeStruct((N, Rc, Cout), jnp.bfloat16),
                   jax.ShapeDtypeStruct((N, nt, 2, Cout), jnp.float32)),
        grid=(N, nt),
        in_specs=[pl.BlockSpec((1, TM, K), lambda n, i: (n, i, 0)),
                  _invariant_spec((K, Cout), lambda n, i: (0, 0))],
        out_specs=(pl.BlockSpec((1, TM, Cout), lambda n, i: (n, i, 0)),
                   pl.BlockSpec((1, 1, 2, Cout), lambda n, i: (n, i, 0, 0))),
        compiler_params=pltpu.CompilerParams(
            dimension_semantics=("parallel", "parallel"),
            vmem_limit_bytes=_vmem_limit_bytes()),
    )
    return jax.jit(call)


# ---------------------------------------------------------------------------
# Kernel B: 3x3x3 conv as 9 shifted (row-offset) matmuls over a per-sample
#           resident padded-flat activation, plus partial BN statistics.
# ---------------------------------------------------------------------------
@functools.lru_cache(maxsize=None)
def _build_conv9_call(N, Lg, Rc, K9, Cout, TM, Gp, offs):
    nt = Rc // TM
    n_taps = len(offs)

    def kernel(p_ref, w_ref, m_ref, y_ref, st_ref):
        i = pl.program_id(1)
        base = i * TM + Gp

        def tap(j):
            start = pl.multiple_of(base + offs[j], _ALIGN)
            return jnp.dot(p_ref[0, pl.ds(start, TM), :], w_ref[j],
                           preferred_element_type=jnp.float32)

        acc = tap(0)                              # local accumulator: no VMEM scratch
        for j in range(1, n_taps):
            acc = acc + tap(j)

        y_ref[0] = acc.astype(y_ref.dtype)
        ym = acc * m_ref[...]                     # (TM, 1) f32 interior mask
        st_ref[0, 0, 0:1, :] = jnp.sum(ym, axis=0, keepdims=True)
        st_ref[0, 0, 1:2, :] = jnp.sum(ym * ym, axis=0, keepdims=True)

    call = pl.pallas_call(
        kernel,
        out_shape=(jax.ShapeDtypeStruct((N, Rc, Cout), jnp.bfloat16),
                   jax.ShapeDtypeStruct((N, nt, 2, Cout), jnp.float32)),
        grid=(N, nt),
        in_specs=[_invariant_spec((1, Lg, K9), lambda n, i: (n, 0, 0)),   # per-sample resident
                  _invariant_spec((n_taps, K9, Cout), lambda n, i: (0, 0, 0)),
                  pl.BlockSpec((TM, 1), lambda n, i: (i, 0))],            # mask shared across N
        out_specs=(pl.BlockSpec((1, TM, Cout), lambda n, i: (n, i, 0)),
                   pl.BlockSpec((1, 1, 2, Cout), lambda n, i: (n, i, 0, 0))),
        compiler_params=pltpu.CompilerParams(
            # NOTE(megacore): on v7x either axis may be core-split; each core
            # then holds its own copy of the resident p block.
            dimension_semantics=("parallel", "parallel"),
            vmem_limit_bytes=_vmem_limit_bytes()),
    )
    return jax.jit(call)


# ---------------------------------------------------------------------------
# Kernel C: BatchNorm-apply + ReLU (padding rows are discarded afterwards in
#           JAX, so no mask is needed here).
# ---------------------------------------------------------------------------
@functools.lru_cache(maxsize=None)
def _build_bn_relu_call(N, Rc, C, TM):
    nt = Rc // TM

    def kernel(y_ref, sc_ref, sh_ref, o_ref):
        y = y_ref[...].astype(jnp.float32)
        o_ref[...] = jnp.maximum(y * sc_ref[...] + sh_ref[...], 0.0).astype(o_ref.dtype)

    call = pl.pallas_call(
        kernel,
        out_shape=jax.ShapeDtypeStruct((N, Rc, C), jnp.bfloat16),
        grid=(N, nt),
        in_specs=[pl.BlockSpec((1, TM, C), lambda n, i: (n, i, 0)),
                  pl.BlockSpec((1, 1, C), lambda n, i: (0, 0, 0)),
                  pl.BlockSpec((1, 1, C), lambda n, i: (0, 0, 0))],
        out_specs=pl.BlockSpec((1, TM, C), lambda n, i: (n, i, 0)),
        compiler_params=pltpu.CompilerParams(
            dimension_semantics=("parallel", "parallel"),
            vmem_limit_bytes=_vmem_limit_bytes()),
    )
    return jax.jit(call)


def _bn_scale_shift(stats, gamma, beta, count):
    s = stats.sum(axis=(0, 1))                    # (2, Cout) f32 partial sums
    mean = s[0] / count
    var = jnp.maximum(s[1] / count - mean * mean, 0.0)   # clamp against cancellation
    scale = gamma / jnp.sqrt(var + EPS)
    shift = beta - mean * scale
    return scale.astype(jnp.float32), shift.astype(jnp.float32)


# ---------------------------------------------------------------------------
# Layer: conv3x3x3(pad=1) -> BatchNorm3d(training stats) -> ReLU.
# ---------------------------------------------------------------------------
def _layer_fold27(x, w, gamma, beta):
    N, T, H, W, Cin = x.shape
    Cout = w.shape[0]
    K = 27 * Cin
    R = T * H * W
    TM = _pick_tm(Cout, R)
    Rc = _round_up(R, TM)

    # Full 27-tap im2col; channel order (dt, dh, dw, ci) matches w.transpose(2,3,4,1,0).
    xp = jnp.pad(x, ((0, 0), (1, 1), (1, 1), (1, 1), (0, 0)))
    p = jnp.concatenate(
        [xp[:, dt:dt + T, dh:dh + H, dw:dw + W, :]
         for dt in range(3) for dh in range(3) for dw in range(3)], axis=-1)
    p = p.reshape(N, R, K)
    p = jnp.pad(p, ((0, 0), (0, Rc - R), (0, 0))).astype(jnp.bfloat16)
    wt = jnp.transpose(w, (2, 3, 4, 1, 0)).reshape(K, Cout).astype(jnp.bfloat16)

    y, stats = _build_conv27_call(N, Rc, K, Cout, TM, R)(p, wt)
    scale, shift = _bn_scale_shift(stats, gamma, beta, float(N * R))
    a = _build_bn_relu_call(N, Rc, Cout, TM)(
        y, scale.reshape(1, 1, Cout), shift.reshape(1, 1, Cout))
    return a[:, :R, :].reshape(N, T, H, W, Cout)


def _layer_tap9(x, w, gamma, beta):
    N, T, H, W, Cin = x.shape
    Cout = w.shape[0]
    Tp, Hp, Wp = T + 2, H + 2, W + 2
    Wr = _round_up(Wp, _ALIGN)            # row-grid W extent (extra columns stay zero)
    S_w, S_h = Wr, Hp * Wr
    S_n = Tp * S_h
    G = S_h + S_w                         # max |row shift| across the 9 (kt, kh) taps
    Gp = _round_up(G, _ALIGN)             # zero guard rows on each side
    TM = _pick_tm(Cout, S_n)
    Rc = _round_up(S_n, TM)
    Lg = Gp + Rc + Gp
    K9 = 3 * Cin

    # W-axis-unrolled, padded, row-flattened input: [N, Lg, 3*Cin] bf16.  All
    # padding / guard / Wr-extension rows are zero-filled here every layer.
    xp = jnp.pad(x, ((0, 0), (1, 1), (1, 1), (2, 2), (0, 0)))
    p9 = jnp.concatenate([xp[:, :, :, kw:kw + Wp, :] for kw in range(3)], axis=-1)
    p9 = jnp.pad(p9, ((0, 0), (0, 0), (0, 0), (0, Wr - Wp), (0, 0)))
    p = p9.reshape(N, S_n, K9)
    p = jnp.pad(p, ((0, 0), (Gp, (Rc - S_n) + Gp), (0, 0))).astype(jnp.bfloat16)

    # weights -> [9, 3*Cin, Cout]: tap order (kt, kh), channel order (kw, ci)
    wt = jnp.transpose(w, (2, 3, 4, 1, 0)).reshape(9, K9, Cout).astype(jnp.bfloat16)

    # interior mask over the padded-flat rows, shared by all samples: [Rc, 1] f32
    it = (jnp.arange(Tp) >= 1) & (jnp.arange(Tp) <= T)
    ih = (jnp.arange(Hp) >= 1) & (jnp.arange(Hp) <= H)
    iw = (jnp.arange(Wr) >= 1) & (jnp.arange(Wr) <= W)
    m3 = it[:, None, None] & ih[None, :, None] & iw[None, None, :]
    mask = jnp.pad(m3.reshape(S_n).astype(jnp.float32), (0, Rc - S_n)).reshape(Rc, 1)

    offs = tuple((kt - 1) * S_h + (kh - 1) * S_w
                 for kt in range(3) for kh in range(3))
    y, stats = _build_conv9_call(N, Lg, Rc, K9, Cout, TM, Gp, offs)(p, wt, mask)
    scale, shift = _bn_scale_shift(stats, gamma, beta, float(N * T * H * W))
    a = _build_bn_relu_call(N, Rc, Cout, TM)(
        y, scale.reshape(1, 1, Cout), shift.reshape(1, 1, Cout))
    a = a[:, :S_n, :].reshape(N, Tp, Hp, Wr, Cout)
    return a[:, 1:T + 1, 1:H + 1, 1:W + 1, :]


def conv3x3x3_bn_relu(x, w, gamma, beta):
    """x: [N,T,H,W,Cin] bf16 NDHWC.  w: torch layout [Cout,Cin,3,3,3] f32."""
    N, T, H, W, Cin = x.shape
    if Cin == 3 or T * H * W <= _FOLD27_MAX_ROWS:
        return _layer_fold27(x, w, gamma, beta)
    return _layer_tap9(x, w, gamma, beta)


# ---------------------------------------------------------------------------
# JAX glue: MaxPool3d (kernel == stride) and the network driver.
# ---------------------------------------------------------------------------
def maxpool3d(x, kt, kh, kw):
    N, T, H, W, C = x.shape
    x = x.reshape(N, T // kt, kt, H // kh, kh, W // kw, kw, C)
    return x.max(axis=(2, 4, 6))


_LAYERS = [("1", 3, 64), ("2", 64, 128), ("3a", 128, 256), ("3b", 256, 256),
           ("4a", 256, 512), ("4b", 512, 512), ("5a", 512, 512), ("5b", 512, 512)]
_POOL_AFTER = {"1": (1, 2, 2), "2": (2, 2, 2), "3b": (2, 2, 2), "4b": (2, 2, 2)}


def c3d_forward(x_ncdhw, params):
    h = jnp.transpose(x_ncdhw, (0, 2, 3, 4, 1)).astype(jnp.bfloat16)   # NDHWC
    for name, _, _ in _LAYERS:
        h = conv3x3x3_bn_relu(h, params["w" + name],
                              params["g" + name], params["b" + name])
        if name in _POOL_AFTER:
            h = maxpool3d(h, *_POOL_AFTER[name])
    # pool5 = AdaptiveAvgPool3d(1), then view(-1, 512)
    return h.astype(jnp.float32).mean(axis=(1, 2, 3))


# ---------------------------------------------------------------------------
# Pure-JAX reference (XLA conv + training-mode BN), with the same bf16
# operand / intermediate rounding as the Pallas path, for verification.
# ---------------------------------------------------------------------------
def reference(x_ncdhw, params):
    h = jnp.transpose(x_ncdhw, (0, 2, 3, 4, 1)).astype(jnp.bfloat16)
    for name, _, _ in _LAYERS:
        w, g, b = params["w" + name], params["g" + name], params["b" + name]
        wt = jnp.transpose(w, (2, 3, 4, 1, 0)).astype(jnp.bfloat16)    # DHWIO
        y = jax.lax.conv_general_dilated(
            h, wt, window_strides=(1, 1, 1), padding=[(1, 1)] * 3,
            dimension_numbers=("NDHWC", "DHWIO", "NDHWC"),
            preferred_element_type=jnp.float32)
        mean = jnp.mean(y, axis=(0, 1, 2, 3))
        var = jnp.var(y, axis=(0, 1, 2, 3))
        scale = g / jnp.sqrt(var + EPS)
        shift = b - mean * scale
        yb = y.astype(jnp.bfloat16).astype(jnp.float32)   # conv output stored as bf16
        h = jnp.maximum(yb * scale + shift, 0.0).astype(jnp.bfloat16)
        if name in _POOL_AFTER:
            h = maxpool3d(h, *_POOL_AFTER[name])
    return h.astype(jnp.float32).mean(axis=(1, 2, 3))


def make_params(key):
    params = {}
    for name, cin, cout in _LAYERS:
        key, kw, kg, kb = jax.random.split(key, 4)
        params["w" + name] = (jax.random.normal(kw, (cout, cin, 3, 3, 3), jnp.float32)
                              * (1.0 / (27.0 * cin) ** 0.5))
        params["g" + name] = 1.0 + 0.1 * jax.random.normal(kg, (cout,), jnp.float32)
        params["b" + name] = 0.1 * jax.random.normal(kb, (cout,), jnp.float32)
    return params


if __name__ == "__main__":
    key = jax.random.PRNGKey(0)
    kx, kp = jax.random.split(key)

    # Small, pool-compatible shape: T 8->8->4->2->1, H/W 32->16->8->4->2.
    # Exercises BOTH conv layouts: conv1 and conv3a..5b use fold27, conv2 uses tap9.
    N, Cin, T, H, W = 2, 3, 8, 32, 32
    x = jax.random.normal(kx, (N, Cin, T, H, W), jnp.float32)
    params = make_params(kp)

    out = jax.block_until_ready(c3d_forward(x, params))
    ref = jax.block_until_ready(reference(x, params))

    assert out.shape == (N, 512), out.shape
    assert bool(jnp.all(jnp.isfinite(out)))
    max_err = float(jnp.max(jnp.abs(out - ref)))
    assert bool(jnp.allclose(out, ref, rtol=3e-2, atol=3e-2)), f"mismatch vs reference ({max_err})"

    print("KERNEL_OK")
</pallas_src>

<mosaic_0001>
module attributes {stable_mosaic.version = 11 : i64} {
  func.func @k(%arg0: i32, %arg1: memref<16x128xf32, #tpu.memory_space<vmem>>, %arg2: memref<16x128xf32, #tpu.memory_space<vmem>>, %arg3: memref<16x128xf32, #tpu.memory_space<vmem>>) attributes {dimension_semantics = [#tpu.dimension_semantics<arbitrary>], iteration_bounds = array<i64: 2>, scalar_prefetch = 0 : i64, scratch_operands = 0 : i64, tpu.core_type = #tpu.core_type<tc>, window_params = [{pipeline_mode = #tpu.pipeline_mode<synchronous>, transform_indices = @transform_0, window_bounds = array<i64: 16, 128>}, {transform_indices = @transform_1, window_bounds = array<i64: 16, 128>}, {transform_indices = @transform_2, window_bounds = array<i64: 16, 128>}]} {
    %c0 = arith.constant 0 : index
    %c0_0 = arith.constant 0 : index
    %0 = vector.load %arg1[%c0, %c0_0] : memref<16x128xf32, #tpu.memory_space<vmem>>, vector<16x128xf32>
    %c0_1 = arith.constant 0 : index
    %c0_2 = arith.constant 0 : index
    %1 = vector.load %arg2[%c0_1, %c0_2] : memref<16x128xf32, #tpu.memory_space<vmem>>, vector<16x128xf32>
    %2 = arith.addf %0, %1 : vector<16x128xf32>
    %c0_3 = arith.constant 0 : index
    %c0_4 = arith.constant 0 : index
    %3 = vector.load %arg3[%c0_3, %c0_4] : memref<16x128xf32, #tpu.memory_space<vmem>>, vector<16x128xf32>
    tpu.vector_store %arg3[%c0_3, %c0_4], %2 {strides = array<i32>} : memref<16x128xf32, #tpu.memory_space<vmem>>, vector<16x128xf32>,
    return
  }
  func.func @transform_0(%arg0: i32) -> (i32, i32) {
    %c0_i32 = arith.constant 0 : i32
    %c0_i32_0 = arith.constant 0 : i32
    %c0_i32_1 = arith.constant 0 : i32
    return %c0_i32, %c0_i32_0 : i32, i32
  }
  func.func @transform_1(%arg0: i32) -> (i32, i32) {
    %c0_i32 = arith.constant 0 : i32
    %c0_i32_0 = arith.constant 0 : i32
    return %arg0, %c0_i32 : i32, i32
  }
  func.func @transform_2(%arg0: i32) -> (i32, i32) {
    %c0_i32 = arith.constant 0 : i32
    %c0_i32_0 = arith.constant 0 : i32
    return %arg0, %c0_i32 : i32, i32
  }
}

module attributes {stable_mosaic.version = 11 : i64} {
  func.func @kernel(%arg0: i32, %arg1: i32, %arg2: memref<1x1024x81xbf16, #tpu.memory_space<vmem>>, %arg3: memref<81x64xbf16, #tpu.memory_space<vmem>>, %arg4: memref<1x1024x64xbf16, #tpu.memory_space<vmem>>, %arg5: memref<1x1x2x64xf32, #tpu.memory_space<vmem>>) attributes {dimension_semantics = [#tpu.dimension_semantics<parallel>, #tpu.dimension_semantics<parallel>], iteration_bounds = array<i64: 2, 8>, scalar_prefetch = 0 : i64, scratch_operands = 0 : i64, tpu.core_type = #tpu.core_type<tc>, window_params = [{transform_indices = @transform_0, window_bounds = array<i64: 1, 1024, 81>}, {pipeline_mode = #tpu.pipeline_mode<synchronous>, transform_indices = @transform_1, window_bounds = array<i64: 81, 64>}, {transform_indices = @transform_2, window_bounds = array<i64: 1, 1024, 64>}, {transform_indices = @transform_3, window_bounds = array<i64: 1, 1, 2, 64>}]} {
    %c0 = arith.constant 0 : index
    %c0_0 = arith.constant 0 : index
    %c0_1 = arith.constant 0 : index
    %0 = vector.load %arg2[%c0, %c0_0, %c0_1] : memref<1x1024x81xbf16, #tpu.memory_space<vmem>>, vector<1x1024x81xbf16>
    %1 = vector.shape_cast %0 : vector<1x1024x81xbf16> to vector<1024x81xbf16>
    %c0_2 = arith.constant 0 : index
    %c0_3 = arith.constant 0 : index
    %2 = vector.load %arg3[%c0_2, %c0_3] : memref<81x64xbf16, #tpu.memory_space<vmem>>, vector<81x64xbf16>
    %cst = arith.constant dense<0.000000e+00> : vector<1024x64xf32>
    %3 = tpu.matmul %1, %2, %cst {dimension_numbers = #tpu.dot_dimension_numbers<[1], [0], [0], [1], [0, 0, 1, 1], [], []>} : vector<1024x81xbf16>, vector<81x64xbf16>, vector<1024x64xf32> -> vector<1024x64xf32>
    %4 = arith.truncf %3 : vector<1024x64xf32> to vector<1024x64xbf16>
    %c0_4 = arith.constant 0 : index
    %c0_5 = arith.constant 0 : index
    %c0_6 = arith.constant 0 : index
    %5 = vector.load %arg4[%c0_4, %c0_5, %c0_6] : memref<1x1024x64xbf16, #tpu.memory_space<vmem>>, vector<1x1024x64xbf16>
    %6 = vector.shape_cast %5 : vector<1x1024x64xbf16> to vector<1024x64xbf16>
    %7 = vector.shape_cast %4 : vector<1024x64xbf16> to vector<1x1024x64xbf16>
    tpu.vector_store %arg4[%c0_4, %c0_5, %c0_6], %7 {strides = array<i32>} : memref<1x1024x64xbf16, #tpu.memory_space<vmem>>, vector<1x1024x64xbf16>,
    %8 = tpu.iota {dimensions = array<i32: 0>} : vector<1024x1xi32>
    %c1024_i32 = arith.constant 1024 : i32
    %9 = arith.muli %arg1, %c1024_i32 : i32
    %10 = vector.broadcast %9 : i32 to vector<1024x1xi32>
    %11 = arith.addi %8, %10 : vector<1024x1xi32>
    %c8192_i32 = arith.constant 8192 : i32
    %12 = vector.broadcast %c8192_i32 : i32 to vector<1024x1xi32>
    %13 = arith.cmpi slt, %11, %12 : vector<1024x1xi32>
    %cst_7 = arith.constant 0.000000e+00 : f32
    %14 = vector.shape_cast %13 : vector<1024x1xi1> to vector<1024x1xi1>
    %15 = vector.broadcast %14 : vector<1024x1xi1> to vector<1024x64xi1>
    %16 = vector.broadcast %cst_7 : f32 to vector<1024x64xf32>
    %17 = arith.select %15, %3, %16 : vector<1024x64xi1>, vector<1024x64xf32>
    %cst_8 = arith.constant dense<0.000000e+00> : vector<64xf32>
    %18 = vector.multi_reduction <add>, %17, %cst_8 [0] : vector<1024x64xf32> to vector<64xf32>
    %19 = vector.shape_cast %18 : vector<64xf32> to vector<1x64xf32>
    %c0_9 = arith.constant 0 : index
    %c0_10 = arith.constant 0 : index
    %c0_11 = arith.constant 0 : index
    %c0_12 = arith.constant 0 : index
    %20 = vector.load %arg5[%c0_9, %c0_10, %c0_11, %c0_12] : memref<1x1x2x64xf32, #tpu.memory_space<vmem>>, vector<1x1x1x64xf32>
    %21 = vector.shape_cast %20 : vector<1x1x1x64xf32> to vector<1x64xf32>
    %22 = vector.shape_cast %19 : vector<1x64xf32> to vector<1x1x1x64xf32>
    tpu.vector_store %arg5[%c0_9, %c0_10, %c0_11, %c0_12], %22 {strides = array<i32>} : memref<1x1x2x64xf32, #tpu.memory_space<vmem>>, vector<1x1x1x64xf32>,
    %23 = arith.mulf %17, %17 : vector<1024x64xf32>
    %cst_13 = arith.constant dense<0.000000e+00> : vector<64xf32>
    %24 = vector.multi_reduction <add>, %23, %cst_13 [0] : vector<1024x64xf32> to vector<64xf32>
    %25 = vector.shape_cast %24 : vector<64xf32> to vector<1x64xf32>
    %c0_14 = arith.constant 0 : index
    %c0_15 = arith.constant 0 : index
    %c1 = arith.constant 1 : index
    %c0_16 = arith.constant 0 : index
    %26 = vector.load %arg5[%c0_14, %c0_15, %c1, %c0_16] : memref<1x1x2x64xf32, #tpu.memory_space<vmem>>, vector<1x1x1x64xf32>
    %27 = vector.shape_cast %26 : vector<1x1x1x64xf32> to vector<1x64xf32>
    %28 = vector.shape_cast %25 : vector<1x64xf32> to vector<1x1x1x64xf32>
    tpu.vector_store %arg5[%c0_14, %c0_15, %c1, %c0_16], %28 {strides = array<i32>} : memref<1x1x2x64xf32, #tpu.memory_space<vmem>>, vector<1x1x1x64xf32>,
    return
  }
  func.func @transform_0(%arg0: i32, %arg1: i32) -> (i32, i32, i32) {
    %c0_i32 = arith.constant 0 : i32
    %c0_i32_0 = arith.constant 0 : i32
    return %arg0, %arg1, %c0_i32 : i32, i32, i32
  }
  func.func @transform_1(%arg0: i32, %arg1: i32) -> (i32, i32) {
    %c0_i32 = arith.constant 0 : i32
    %c0_i32_0 = arith.constant 0 : i32
    %c0_i32_1 = arith.constant 0 : i32
    return %c0_i32, %c0_i32_0 : i32, i32
  }
  func.func @transform_2(%arg0: i32, %arg1: i32) -> (i32, i32, i32) {
    %c0_i32 = arith.constant 0 : i32
    %c0_i32_0 = arith.constant 0 : i32
    return %arg0, %arg1, %c0_i32 : i32, i32, i32
  }
  func.func @transform_3(%arg0: i32, %arg1: i32) -> (i32, i32, i32, i32) {
    %c0_i32 = arith.constant 0 : i32
    %c0_i32_0 = arith.constant 0 : i32
    %c0_i32_1 = arith.constant 0 : i32
    return %arg0, %arg1, %c0_i32, %c0_i32_0 : i32, i32, i32, i32
  }
}

</mosaic_0001>

<bundles_post_ra>
// kernel: tpu_custom_call.1
= control target key start
LH: loop header
LB: loop body
LE: loop exit
PB: predicated region body
PF: predicated region fallthrough
CT: control target
= control target key end

     0   :  { %7 = vsyncpa [#allocation3], 0  ;;  %s724_s0 = inlined_call_operand.hbm [shape: f32[16,128], index: 0, kind: input, shape index: {}]   ;;  %s725_s1 = inlined_call_operand.hbm [shape: f32[32,128], index: 1, kind: input, shape index: {}]   ;;  %s726_s2 = inlined_call_operand.hbm [shape: f32[32,128], index: 2, kind: output, shape index: {}]  }
   0x1   :  { %8 = vsyncpa [#allocation6], 0 }
   0x2   :  { %10 = vsyncpa [#allocation6 + $0x1], 0 }
   0x3   :  { %11 = vsyncpa [#allocation4], 0 }
   0x4   :  { %13 = vsyncpa [#allocation4 + $0x1], 0  ;;  %s517_s9 = smov 0   ;;  %s519_s10 = smov 0  }
   0x5   :  { %s521_s11 = smov 0   ;;  %s523_s12 = smov 0  }
   0x6 LB: > { %s538_s13 = sadd.s32 4294967295, %s493_s12   ;;  %s286_s14 = sadd.s32 4294967294, %s493_s12   ;;  %s493_s12 = sphi %s523_s12, %s746_s12   ;;  %s489_s11 = sphi %s521_s11, %s745_s11   ;;  %s485_s10 = sphi %s519_s10, %s744_s10   ;;  %s481_s9 = sphi %s517_s9, %s743_s9  }
   0x7   : > { %p60_p0 = scmp.ne.s32.totalorder %s485_s10, %s481_s9  ;;  %p727_p1 = scmp.eq.s32.totalorder %s538_s13, 0 }
   0x8   : > { %p90_p3 = scmp.eq.s32.totalorder %s286_s14, 1  ;;  %p287_p5 = scmp.ge.s32.totalorder %s493_s12, 1 }
   0x9   : > { %p547_p4 = por %p727_p1, %p60_p0  ;;  %p97_p7 = scmp.lt.s32.totalorder %s493_s12, 3 }
   0xa   : > { %p552_p6 = por %p90_p3, %p60_p0  ;;  %s495_s18 = smov [#allocation2]  }
   0xb   : > { %s730_s15 = scalar_select %p547_p4, 1, 0 }
   0xc   : > { %s731_s16 = scalar_select %p552_p6, 1, 0 }
   0xd   : > { %p557_p8 = pnand %p287_p5, %p97_p7  ;;  %s109_s19 = sshll.u32 %s495_s18, 4  ;;  %s561_s19 = int_to_ptr.vmem [resolvable:$true] %s109_s19 }
   0xe   : > { %s573_s21 = sadd.s32 1, %s493_s12   ;;  %s47_s22 = sadd.s32 1, %s489_s11 }
   0xf   : > { %s732_s17 = scalar_select %p557_p8, 1, 0 }
  0x10   : > { %p312_p9 = pneg %p557_p8  ;;  %s44_s23 = ssub.s32 %s493_s12, %s573_s21 }
  0x11   : > { %s365_s26 = scalar_lea.hbm %s724_s0, 256 }
  0x12   : > { %p568_p11 = pnand %p312_p9, %p727_p1  ;;  %p366_p12 = scmp.ne.s32.totalorder %s724_s0, %s365_s26 }
  0x13   : > { %p372_p5 = scmp.lt.u32.totalorder %s365_s26, %s724_s0 }
  0x14   : > { %p367_p13 = pneg %p568_p11 }
  0x16   : > { %p368_p0 = pnand %p367_p13, %p366_p12 }
  0x18   : > { %p369_p3 = pneg %p368_p0 }
  0x1a   : > { %p374_p7 = pnand %p372_p5, %p369_p3 }
  0x1c   : > { %377 = shalt.err (!%p374_p7)
}
  0x1d   : > { %s378_s3 = scalar_lea.vmem %s561_s19, 256  ;;  %p386_p2 = scmp.lt.s32.totalorder %s561_s19, %s561_s19 }
  0x1e   : > { %p379_p9 = scmp.ne.s32.totalorder %s561_s19, %s378_s3  ;;  %p387_p6 = scmp.lt.s32.totalorder %s378_s3, %s378_s3 }
  0x20   : > { %p381_p10 = pnand %p379_p9, %p367_p13  ;;  %p388_p4 = por %p387_p6, %p386_p2 }
  0x22   : > { %p382_p1 = pneg %p381_p10 }
  0x24   : > { %p389_p8 = pnand %p388_p4, %p382_p1 }
  0x26   : > { %392 = shalt.err (!%p389_p8)
}
  0x27   : > { %s496_s4 = smov 128   ;;  %s497_s5 = smov 8  }
  0x28   : > { %315 = dma.hbm_to_vmem [thread:$0]  (!%p568_p11), %s724_s0, 256, %s561_s19, [#allocation3], %s496_s4, %s496_s4, %s497_s5  }
  0x29   : > { %p45_p1 = scmp.eq.s32.totalorder %s44_s23, 0  ;;  %p54_p2 = scmp.ne.s32.totalorder %s489_s11, %s485_s10 }
  0x2a   : > { %p55_p4 = scmp.eq.s32.totalorder %s493_s12, 0  ;;  %p325_p6 = scmp.lt.s32.totalorder %s493_s12, 2 }
  0x2b   : > { %s607_s8 = scalar_select %p45_p1, %s489_s11, %s47_s22  }
  0x2c   : > { %p56_p8 = por %p55_p4, %p54_p2  ;;  %p734_p10 = scmp.eq.s32.totalorder %s538_s13, 1 }
  0x2d   : > { %s123_s18 = sand.u32 1, %s489_s11   ;;  %s302_s20 = sshll.u32 %s493_s12, 8 }
  0x2e   : > { %p611_p12 = por %p734_p10, %p54_p2  ;;  %s290_s24 = sshll.u32 %s123_s18, 4 }
  0x2f   : > { %s620_s27 = scalar_lea.hbm %s725_s1, %s302_s20  ;;  %s127_s19 = scalar_lea.vmem [#allocation5], %s290_s24 }
  0x30   : > { %s134_s22 = sshll.u32 %s127_s19, 4  ;;  %p622_p11 = pnand %p325_p6, %p56_p8  ;;  %s626_s22 = int_to_ptr.vmem [resolvable:$true] %s134_s22 }
  0x31   : > { %s628_s28 = scalar_lea.sflag [#allocation6], %s123_s18  ;;  %s393_s29 = scalar_lea.hbm %s620_s27, 256 }
  0x32   : > { %p394_p13 = scmp.ne.s32.totalorder %s620_s27, %s393_s29  ;;  %p395_p0 = pneg %p622_p11 }
  0x33   : > { %s398_s6 = scalar_lea.hbm %s725_s1, 512  ;;  %p399_p7 = scmp.lt.u32.totalorder %s620_s27, %s725_s1 }
  0x34   : > { %p396_p3 = pnand %p395_p0, %p394_p13  ;;  %p400_p9 = scmp.lt.u32.totalorder %s398_s6, %s393_s29 }
  0x35   : > { %p402_p2 = scmp.lt.u32.totalorder %s393_s29, %s620_s27 }
  0x36   : > { %p397_p5 = pneg %p396_p3  ;;  %p401_p1 = por %p400_p9, %p399_p7 }
  0x38   : > { %p403_p4 = por %p402_p2, %p401_p1 }
  0x3a   : > { %p404_p6 = pnand %p403_p4, %p397_p5 }
  0x3c   : > { %407 = shalt.err (!%p404_p6)
}
  0x3d   : > { %s408_s18 = scalar_lea.vmem %s626_s22, 256  ;;  %s498_s24 = smov [#allocation5]  }
  0x3e   : > { %p409_p8 = scmp.ne.s32.totalorder %s626_s22, %s408_s18  ;;  %s413_s25 = sshll.u32 %s498_s24, 4  ;;  %s414_s25 = int_to_ptr.vmem [resolvable:$false] %s413_s25 }
  0x3f   : > { %s415_s26 = scalar_lea.vmem %s414_s25, 512  ;;  %p416_p3 = scmp.lt.s32.totalorder %s626_s22, %s414_s25 }
  0x40   : > { %p411_p10 = pnand %p409_p8, %p395_p0  ;;  %p417_p7 = scmp.lt.s32.totalorder %s415_s26, %s408_s18 }
  0x42   : > { %p412_p13 = pneg %p411_p10  ;;  %p418_p9 = por %p417_p7, %p416_p3 }
  0x44   : > { %p419_p1 = pnand %p418_p9, %p412_p13 }
  0x46   : > { %422 = shalt.err (!%p419_p1)
}
  0x47   : > { %319 = dma.hbm_to_vmem [thread:$0]  (!%p622_p11), %s620_s27, 256, %s626_s22, %s628_s28, %s496_s4, %s496_s4, %s497_s5  }
  0x48   : > { %p737_p0 = scmp.ne.s32.totalorder %s732_s17, 0 }
  0x49   : > { %p738_p5 = scmp.eq.s32.totalorder (!%p737_p0), %s538_s13, 0 }
  0x4a   : > { %146 = sbr.rel (%p737_p0) target bundleno = 112 (0x70), region = 28 }
  0x51   : > { %468 = dma.done.wait (%p738_p5), [#allocation3], 256   ;;  %p739_p2 = pmov %p738_p5 }
  0x52   : > { %s666_s19 = sand.u32 1, %s485_s10   ;;  %p740_p4 = scmp.ne.s32.totalorder %s730_s15, 0 }
  0x53   : > { %470 = vsyncadd (%p739_p2), [#allocation3], 4294967040  ;;  %s295_s23 = sshll.u32 %s666_s19, 4  ;;  %s153_s29 = scalar_lea.sflag [#allocation6], %s666_s19 }
  0x54   : > { %s156_s30 = scalar_lea.vmem [#allocation5], %s295_s23 }
  0x55   : > { %472 = dma.done.wait (%p740_p4), %s153_s29, 256  }
  0x56   : > { %474 = vsyncadd (%p740_p4), %s153_s29, 4294967040  ;;  %s176_s17 = scalar_lea.vmem [#allocation7], %s295_s23  ;;  %s303_s5 = sshll.u32 %s538_s13, 8  ;;  %v179_v0 = vld [vmem:[#allocation2] sm:$0xff]  ;;  %v180_v2 = vld [vmem:[#allocation2 + $0x8] sm:$0xff] }
  0x57   : > { %s201_s4 = sshll.u32 %s176_s17, 4  ;;  %v181_v1 = vld [vmem:[%s156_s30] sm:$0xff]  ;;  %v182_v4 = vld [vmem:[%s156_s30 + $0x8] sm:$0xff]  ;;  %s680_s15 = scalar_lea.hbm %s726_s2, %s303_s5  ;;  %s675_s4 = int_to_ptr.vmem [resolvable:$true] %s201_s4 }
  0x58   : > { %v183_v3 = vadd.f32 %v181_v1, %v179_v0  ;;  %v184_v5 = vadd.f32 %v182_v4, %v180_v2  ;;  %s188_s28 = scalar_lea.sflag [#allocation4], %s666_s19  ;;  %s423_s13 = scalar_lea.vmem %s675_s4, 256 }
  0x59   : > { %p424_p11 = scmp.ne.s32.totalorder %s675_s4, %s423_s13  ;;  %s499_s3 = smov [#allocation7]  }
  0x5a   : > { %185 = vst [vmem:[%s176_s17] sm:$0xff] %v183_v3  ;;  %186 = vst [vmem:[%s176_s17 + $0x8] sm:$0xff] %v184_v5  ;;  %s427_s6 = sshll.u32 %s499_s3, 4  ;;  %s428_s6 = int_to_ptr.vmem [resolvable:$false] %s427_s6 }
  0x5b   : > { %p425_p6 = pnand %p424_p11, %p611_p12  ;;  %s429_s7 = scalar_lea.vmem %s428_s6, 512 }
  0x5c   : > { %p430_p10 = scmp.lt.s32.totalorder %s675_s4, %s428_s6  ;;  %p431_p13 = scmp.lt.s32.totalorder %s429_s7, %s423_s13 }
  0x5d   : > { %p426_p8 = pneg %p425_p6 }
  0x5e   : > { %p432_p3 = por %p431_p13, %p430_p10 }
  0x60   : > { %p433_p7 = pnand %p432_p3, %p426_p8 }
  0x62   : > { %436 = shalt.err (!%p433_p7)
}
  0x63   : > { %s437_s20 = scalar_lea.hbm %s680_s15, 256  ;;  %s441_s25 = scalar_lea.hbm %s726_s2, 512 }
  0x64   : > { %p438_p9 = scmp.ne.s32.totalorder %s680_s15, %s437_s20  ;;  %p442_p5 = scmp.lt.u32.totalorder %s680_s15, %s726_s2 }
  0x65   : > { %p443_p2 = scmp.lt.u32.totalorder %s441_s25, %s437_s20  ;;  %p445_p11 = scmp.lt.u32.totalorder %s437_s20, %s680_s15 }
  0x66   : > { %p439_p1 = pnand %p438_p9, %p611_p12 }
  0x67   : > { %p444_p4 = por %p443_p2, %p442_p5 }
  0x68   : > { %p440_p0 = pneg %p439_p1 }
  0x69   : > { %p446_p6 = por %p445_p11, %p444_p4 }
  0x6b   : > { %p447_p8 = pnand %p446_p6, %p440_p0 }
  0x6d   : > { %450 = shalt.err (!%p447_p8)
}
  0x6e   : > { %s500_s29 = smov 128   ;;  %s501_s30 = smov 8  }
  0x6f   : > { %310 = dma.vmem_to_hbm [thread:$0]  (%p611_p12), %s675_s4, 256, %s680_s15, %s188_s28, %s500_s29, %s500_s29, %s501_s30  }
  0x70 PF: > { %s216_s17 = sand.u32 1, %s481_s9   ;;  %p741_p10 = scmp.ne.s32.totalorder %s731_s16, 0 }
  0x71   : > { %p742_p13 = scmp.ge.s32.totalorder %s493_s12, 2  ;;  %s217_s5 = scalar_lea.sflag [#allocation4], %s216_s17 }
  0x73   : > { %p321_p3 = pnand %p742_p13, %p741_p10 }
  0x75   : > { %476 = dma.done.wait (!%p321_p3), %s217_s5, 256  }
  0x76   : > { %478 = vsyncadd (!%p321_p3), %s217_s5, 4294967040  ;;  %p16_p7 = scmp.ge.s32.totalorder %s573_s21, 4   ;;  %s743_s9 = smov %s485_s10 }
  0x77   : > { %s744_s10 = smov %s489_s11  ;;  %s745_s11 = smov %s607_s8 }
  0x78   : > { %s746_s12 = smov %s573_s21  ;;  %18 = sbr.rel (!%p16_p7) target bundleno = 6 (0x6), region = 78 }
  0x7f   :  { %222 = vsyncpa [#allocation3], 1 }
  0x80   :  { %224 = vsyncpa [#allocation3 + $0x1], 1 }
  0x81   :  { %225 = vsyncpa [#allocation6], 1 }
  0x82   :  { %227 = vsyncpa [#allocation6 + $0x1], 1 }
  0x83   :  { %228 = vsyncpa [#allocation4], 1 }
  0x84   :  { %230 = vsyncpa [#allocation4 + $0x1], 1 }

// kernel: tpu_custom_call.1
= control target key start
LH: loop header
LB: loop body
LE: loop exit
PB: predicated region body
PF: predicated region fallthrough
CT: control target
= control target key end

     0   :  { %9 = vsyncpa [#allocation3], 0  ;;  %s6400_s0 = inlined_call_operand.vmem [shape: bf16[2,8192,81], index: 0, kind: input, shape index: {}]   ;;  %s6401_s1 = inlined_call_operand.vmem [shape: bf16[81,64], index: 1, kind: input, shape index: {}]   ;;  %s6402_s2 = inlined_call_operand.vmem [shape: bf16[2,8192,64], index: 2, kind: output, shape index: {0}]   ;;  %s6403_s3 = inlined_call_operand.hbm [shape: f32[2,8,2,64], index: 3, kind: output, shape index: {1}]  }
   0x1   :  { %11 = vsyncpa [#allocation3 + $0x1], 0  ;;  %s4560_s12 = smov 0   ;;  %s4562_s13 = smov 0  }
   0x2   :  { %s4564_s14 = smov 0   ;;  %s4566_s15 = smov 0  }
   0x3   :  { %s4568_s16 = smov 0   ;;  %s4570_s17 = smov 0  }
   0x4   :  { %s4572_s18 = smov 0   ;;  %s4574_s19 = smov 0  }
   0x5 LB: > { %s3670_s20 = sadd.s32 4294967295, %s4536_s19   ;;  %s3671_s21 = sadd.s32 4294967294, %s4536_s19   ;;  %s4536_s19 = sphi %s4574_s19, %s17_s19   ;;  %s4532_s18 = sphi %s4572_s18, %s6547_s18   ;;  %s4528_s17 = sphi %s4570_s17, %s6546_s17   ;;  %s4524_s16 = sphi %s4568_s16, %s6545_s16   ;;  %s4520_s15 = sphi %s4566_s15, %s6544_s15   ;;  %s4516_s14 = sphi %s4564_s14, %s6543_s14   ;;  %s4512_s13 = sphi %s4562_s13, %s6542_s13   ;;  %s4508_s12 = sphi %s4560_s12, %s6541_s12  }
   0x6   : > { %s26_s22 = sadd.s32 1, %s4528_s17  ;;  %s29_s23 = sadd.s32 1, %s4532_s18 }
   0x7   : > { %p27_p0 = scmp.ge.s32.totalorder %s26_s22, 8  ;;  %p125_p1 = scmp.ne.s32.totalorder %s4516_s14, %s4512_s13 }
   0x8   : > { %p126_p2 = scmp.eq.s32.totalorder %s3670_s20, 15  ;;  %p131_p5 = scmp.ne.s32.totalorder %s4512_s13, %s4508_s12 }
   0x9   : > { %s6549_s22 = smov (%p27_p0, %s26_s22), 0  ;;  %s6551_s23 = smov (!%p27_p0, %s29_s23), %s4532_s18 }
   0xa   : > { %s111_s24 = ssub.s32 %s4528_s17, %s6549_s22  ;;  %p4611_p3 = por %p126_p2, %p125_p1 }
   0xb   : > { %p31_p4 = scmp.ge.s32.totalorder %s6551_s23, 2  ;;  %p132_p6 = scmp.eq.s32.totalorder %s3671_s21, 15 }
   0xc   : > { %p3674_p7 = scmp.ge.s32.totalorder %s4536_s19, 1  ;;  %p166_p9 = scmp.lt.s32.totalorder %s4536_s19, 17 }
   0xd   : > { %s6553_s23 = smov (%p31_p4, %s6551_s23), 0  ;;  %p4620_p8 = por %p132_p6, %p131_p5 }
   0xe   : > { %s110_s27 = ssub.s32 %s4532_s18, %s6553_s23  ;;  %s115_s28 = sadd.s32 1, %s4516_s14 }
   0xf   : > { %s112_s29 = sor.u32 %s111_s24, %s110_s27  ;;  %p167_p10 = pnand %p3674_p7, %p166_p9 }
  0x10   : > { %p113_p11 = scmp.eq.s32.totalorder %s112_s29, 0 }
  0x11   : > { %170 = sbr.rel (%p167_p10) target bundleno = 577 (0x241), region = 28 }
  0x12   : > { %s4629_s30 = scalar_select %p113_p11, %s4516_s14, %s115_s28  }
  0x18   : > { %v4372_v0 = vld [vmem:[%s6401_s1] sm:$0xff]   ;;  %v4373_v1 = vld [vmem:[%s6401_s1 + $0x8] sm:$0xff]   ;;  %s3676_s8 = sshll.u32 %s4520_s15, 7  ;;  %v4374_v2 = vld [vmem:[%s6401_s1 + $0x10] sm:$0xff]   ;;  %p204_p12 = scmp.lt.s32.totalorder %s4524_s16, 1  ;;  %vm909_vm0 = vcmask 1040384  }
  0x19   : > { %4148 = vmatprep.subr.bf16.mxu0 %v4372_v0  ;;  %4288 = vmatprep.subr.bf16.mxu1 %v4372_v0  ;;  %p206_p13 = scmp.lt.s32.totalorder %s3676_s8, 1023  ;;  %v4375_v3 = vld [vmem:[%s6401_s1 + $0x18] sm:$0xff]   ;;  %v4376_v4 = vld [vmem:[%s6401_s1 + $0x20] sm:$0xff]   ;;  %v4377_v5 = vld [vmem:[%s6401_s1 + $0x28] ss:$0 sps:$4 sm:$0x11]  }
  0x1a   : > { %4149 = vmatpush3.bf16.msra.mxu0 %v4372_v0  ;;  %4294 = vmatpush3.bf16.msra.mxu1 %v4372_v0  ;;  %s205_s11 = scalar_select %p204_p12, %s4524_s16, 1  ;;  %vm716_vm1 = vcmask 662528   ;;  %v4538_v7 = vmov 0   ;;  %vm1972_vm4 = vcmask 519168   ;;  %vm2872_vm7 = vcmask 523264  }
  0x1b   : > { %4150 = vmatprep.subr.bf16.mxu0 %v4373_v1  ;;  %4289 = vmatprep.subr.bf16.mxu1 %v4373_v1  ;;  %s6555_s8 = smov (!%p206_p13, %s3676_s8), 1023  ;;  %v911_v8 = vsel %vm909_vm0, 65535, %v4538_v7 }
  0x1c   : > { %s3677_s24 = sshll.u32 %s205_s11, 10  ;;  %v913_v9 = vand.u32 %v4377_v5, %v911_v8 }
  0x1d   : > { %s4646_s27 = sadd.s32 %s3677_s24, %s6555_s8  ;;  %s3944_s8 = sshll.u32 %s4520_s15, 10 }
  0x1e   : > { %4151 = vmatpush3.bf16.msra.mxu0 %v4373_v1  ;;  %4295 = vmatpush3.bf16.msra.mxu1 %v4373_v1  ;;  %s3678_s28 = sshll.u32 %s4646_s27, 2  ;;  %s200_s24 = sand.u32 1, %s4512_s13  }
  0x1f   : > { %4152 = vmatprep.subr.bf16.mxu0 %v4374_v2  ;;  %4290 = vmatprep.subr.bf16.mxu1 %v4374_v2  ;;  %s4660_s10 = scalar_lea.vmem %s6400_s0, %s3678_s28  ;;  %s5042_s21 = scalar_lea.vmem %s6402_s2, %s3678_s28 }
  0x20   : > { %v4378_v6 = vld [vmem:[%s4660_s10] sm:$0xff]   ;;  %v4379_v10 = vld [vmem:[%s4660_s10 + $0x8] sm:$0xff]   ;;  %v4380_v11 = vld [vmem:[%s4660_s10 + $0x10] sm:$0xff]   ;;  %s3675_s27 = sshll.u32 %s200_s24, 1  ;;  %s3946_s28 = sshll.u32 %s4524_s16, 3 }
  0x21   : > { %4160 = vmatprep.mubr.msk.bf16.mxu0 %vm716_vm1, %v4378_v6  ;;  %v4381_v12 = vld [vmem:[%s4660_s10 + $0x18] sm:$0xff]   ;;  %v4382_v13 = vld [vmem:[%s4660_s10 + $0x20] sm:$0xff]   ;;  %v4383_v14 = vld [vmem:[%s4660_s10 + $0x28] sm:$0xff]   ;;  %s3551_s29 = sadd.s32 %s4520_s15, %s3946_s28  ;;  %s202_s5 = scalar_lea.vmem [#allocation2], %s3675_s27 }
  0x22   : > { %4153 = vmatpush3.bf16.msra.mxu0 %v4374_v2  ;;  %4296 = vmatpush3.bf16.msra.mxu1 %v4374_v2  ;;  %v4384_v15 = vld [vmem:[%s4660_s10 + $0x30] sm:$0xff]   ;;  %v4385_v16 = vld [vmem:[%s4660_s10 + $0x38] sm:$0xff]   ;;  %v4410_v17 = vld [vmem:[%s4660_s10 + $0x100] sm:$0xff]   ;;  %s3947_s4 = sshll.u32 %s3551_s29, 5  ;;  %s3555_s6 = sshll.u32 %s202_s5, 4  ;;  %s6349_s6 = int_to_ptr.vmem [resolvable:$true] %s3555_s6 }
  0x23   : > { %4154 = vmatprep.subr.bf16.mxu0 %v4375_v3  ;;  %4291 = vmatprep.subr.bf16.mxu1 %v4375_v3  ;;  %v4411_v18 = vld [vmem:[%s4660_s10 + $0x108] sm:$0xff]   ;;  %v4412_v19 = vld [vmem:[%s4660_s10 + $0x110] sm:$0xff]   ;;  %v4386_v20 = vld [vmem:[%s4660_s10 + $0x40] sm:$0xff]   ;;  %s6347_s16 = scalar_lea.hbm %s6403_s3, %s3947_s4  ;;  %s3536_s15 = scalar_lea.sflag [#allocation3], %s200_s24 }
  0x24   : > { %4224 = vmatprep.mubr.msk.bf16.mxu1 %vm716_vm1, %v4410_v17  ;;  %v4413_v21 = vld [vmem:[%s4660_s10 + $0x118] sm:$0xff]   ;;  %v4414_v22 = vld [vmem:[%s4660_s10 + $0x120] sm:$0xff]   ;;  %v4387_v23 = vld [vmem:[%s4660_s10 + $0x48] sm:$0xff]  }
  0x25   : > { %v4388_v24 = vld [vmem:[%s4660_s10 + $0x50] sm:$0xff]   ;;  %v4415_v25 = vld [vmem:[%s4660_s10 + $0x128] sm:$0xff]   ;;  %v4389_v27 = vld [vmem:[%s4660_s10 + $0x58] sm:$0xff]  }
  0x26   : > { %4155 = vmatpush3.bf16.msra.mxu0 %v4375_v3  ;;  %4297 = vmatpush3.bf16.msra.mxu1 %v4375_v3  ;;  %v4416_v26 = vld [vmem:[%s4660_s10 + $0x130] sm:$0xff]   ;;  %v4390_v28 = vld [vmem:[%s4660_s10 + $0x60] sm:$0xff]   ;;  %v4417_v29 = vld [vmem:[%s4660_s10 + $0x138] sm:$0xff]  }
  0x27   : > { %4156 = vmatprep.subr.bf16.mxu0 %v4376_v4  ;;  %4292 = vmatprep.subr.bf16.mxu1 %v4376_v4  ;;  %v4418_v30 = vld [vmem:[%s4660_s10 + $0x140] sm:$0xff]   ;;  %v4391_v31 = vld [vmem:[%s4660_s10 + $0x68] sm:$0xff]   ;;  %v4392_v32 = vld [vmem:[%s4660_s10 + $0x70] sm:$0xff]  }
  0x28   : > { %v4419_v33 = vld [vmem:[%s4660_s10 + $0x148] sm:$0xff]   ;;  %v4420_v34 = vld [vmem:[%s4660_s10 + $0x150] sm:$0xff]   ;;  %v4393_v35 = vld [vmem:[%s4660_s10 + $0x78] sm:$0xff]  }
  0x29   : > { %v4394_v36 = vld [vmem:[%s4660_s10 + $0x80] sm:$0xff]   ;;  %v4421_v37 = vld [vmem:[%s4660_s10 + $0x158] sm:$0xff]   ;;  %v4395_v39 = vld [vmem:[%s4660_s10 + $0x88] sm:$0xff]  }
  0x2a   : > { %4157 = vmatpush3.bf16.msra.mxu0 %v4376_v4  ;;  %4298 = vmatpush3.bf16.msra.mxu1 %v4376_v4  ;;  %v4422_v38 = vld [vmem:[%s4660_s10 + $0x160] sm:$0xff]   ;;  %v4396_v40 = vld [vmem:[%s4660_s10 + $0x90] sm:$0xff]   ;;  %v4423_v41 = vld [vmem:[%s4660_s10 + $0x168] sm:$0xff]  }
  0x2b   : > { %4158 = vmatprep.subr.bf16.mxu0 %v913_v9  ;;  %4293 = vmatprep.subr.bf16.mxu1 %v913_v9  ;;  %v4424_v42 = vld [vmem:[%s4660_s10 + $0x170] sm:$0xff]   ;;  %v4397_v43 = vld [vmem:[%s4660_s10 + $0x98] sm:$0xff]   ;;  %v4398_v44 = vld [vmem:[%s4660_s10 + $0xa0] sm:$0xff]  }
  0x2c   : > { %v4425_v45 = vld [vmem:[%s4660_s10 + $0x178] sm:$0xff]   ;;  %v4426_v46 = vld [vmem:[%s4660_s10 + $0x180] sm:$0xff]   ;;  %v4399_v47 = vld [vmem:[%s4660_s10 + $0xa8] sm:$0xff]  }
  0x2d   : > { %v4400_v48 = vld [vmem:[%s4660_s10 + $0xb0] sm:$0xff]   ;;  %v4427_v49 = vld [vmem:[%s4660_s10 + $0x188] sm:$0xff]   ;;  %v4401_v51 = vld [vmem:[%s4660_s10 + $0xb8] sm:$0xff]  }
  0x2e   : > { %4159 = vmatpush3.bf16.msra.mxu0 %v913_v9  ;;  %4299 = vmatpush3.bf16.msra.mxu1 %v913_v9  ;;  %v4428_v50 = vld [vmem:[%s4660_s10 + $0x190] sm:$0xff]   ;;  %v4402_v52 = vld [vmem:[%s4660_s10 + $0xc0] sm:$0xff]   ;;  %v4429_v53 = vld [vmem:[%s4660_s10 + $0x198] sm:$0xff]   ;;  %v2101_v9 = vlaneseq }
  0x2f   : > { %v4430_v54 = vld [vmem:[%s4660_s10 + $0x1a0] sm:$0xff]   ;;  %v4403_v55 = vld [vmem:[%s4660_s10 + $0xc8] sm:$0xff]   ;;  %v4404_v56 = vld [vmem:[%s4660_s10 + $0xd0] sm:$0xff]  }
  0x30   : > { %v4431_v57 = vld [vmem:[%s4660_s10 + $0x1a8] sm:$0xff]   ;;  %v4432_v58 = vld [vmem:[%s4660_s10 + $0x1b0] sm:$0xff]   ;;  %v4405_v59 = vld [vmem:[%s4660_s10 + $0xd8] sm:$0xff]  }
  0x31   : > { %4161 = vmatmul.mubr.msk.bf16.vlgmr.msra.gmra.mrb[0].mxu0 %vm716_vm1, %v4379_v10  ;;  %4225 = vmatmul.mubr.msk.bf16.vlgmr.msra.gmra.mrb[0].mxu1 %vm716_vm1, %v4411_v18  ;;  %v4406_v60 = vld [vmem:[%s4660_s10 + $0xe0] sm:$0xff]   ;;  %v4433_v61 = vld [vmem:[%s4660_s10 + $0x1b8] sm:$0xff]   ;;  %v4407_v63 = vld [vmem:[%s4660_s10 + $0xe8] sm:$0xff]   ;;  %v4790_v10 = vshrl.u32 %v2101_v9, 7 }
  0x32   : > { %4164 = vmatprep.mubr.msk.bf16.mxu0 %vm716_vm1, %v4380_v11  ;;  %4228 = vmatprep.mubr.msk.bf16.mxu1 %vm716_vm1, %v4412_v19  ;;  %v4434_v62 = vld [vmem:[%s4660_s10 + $0x1c0] sm:$0xff]   ;;  %v4408_v0 = vld [vmem:[%s4660_s10 + $0xf0] sm:$0xff]   ;;  %v4435_v1 = vld [vmem:[%s4660_s10 + $0x1c8] sm:$0xff]  }
  0x33   : > { %v4436_v2 = vld [vmem:[%s4660_s10 + $0x1d0] sm:$0xff]   ;;  %v4409_v3 = vld [vmem:[%s4660_s10 + $0xf8] sm:$0xff]   ;;  %v4438_v5 = vld [vmem:[%s4660_s10 + $0x1e0] sm:$0xff]   ;;  %v2104_v11 = vadd.s32 16, %v4790_v10  ;;  %v2109_v17 = vadd.s32 56, %v4790_v10  ;;  %v2107_v18 = vadd.s32 40, %v4790_v10 }
  0x34   : > { %v4437_v4 = vld [vmem:[%s4660_s10 + $0x1d8] sm:$0xff]   ;;  %v4439_v6 = vld [vmem:[%s4660_s10 + $0x1e8] sm:$0xff]   ;;  %v4440_v7 = vld [vmem:[%s4660_s10 + $0x1f0] sm:$0xff]   ;;  %v2112_v19 = vadd.s32 80, %v4790_v10  ;;  %v2137_v9 = vadd.s32 280, %v4790_v10 }
  0x35   : > { %v4441_v8 = vld [vmem:[%s4660_s10 + $0x1f8] sm:$0xff]   ;;  %s4442_s10 = scalar_lea.vmem %s6349_s6, 32 }
  0x36   : > { %p4443_p0 = scmp.ne.s32.totalorder %s6349_s6, %s4442_s10 }
  0x38   : > { %p4444_p1 = pnand %p4443_p0, %p4611_p3 }
  0x39   : > { %4165 = vmatmul.mubr.msk.bf16.gmra.mrb[4].mxu0 %vm716_vm1, %v4381_v12  ;;  %4229 = vmatmul.mubr.msk.bf16.gmra.mrb[4].mxu1 %vm716_vm1, %v4413_v21  ;;  %v2105_v12 = vadd.s32 24, %v4790_v10  ;;  %v2113_v21 = vadd.s32 88, %v4790_v10 }
  0x3a   : > { %4168 = vmatprep.mubr.msk.bf16.mxu0 %vm716_vm1, %v4382_v13  ;;  %4232 = vmatprep.mubr.msk.bf16.mxu1 %vm716_vm1, %v4414_v22  ;;  %v2103_v13 = vadd.s32 8, %v4790_v10  ;;  %v2111_v22 = vadd.s32 72, %v4790_v10  ;;  %p4445_p2 = pneg %p4444_p1 }
  0x41   : > { %4169 = vmatmul.mubr.msk.bf16.gmra.mrb[8].mxu0 %vm716_vm1, %v4383_v14  ;;  %4233 = vmatmul.mubr.msk.bf16.gmra.mrb[8].mxu1 %vm716_vm1, %v4415_v25  ;;  %v4796_v14 = vstv %s3944_s8  ;;  %s4539_s8 = smov [#allocation2]  }
  0x42   : > { %4172 = vmatprep.mubr.msk.bf16.mxu0 %vm716_vm1, %v4384_v15  ;;  %4236 = vmatprep.mubr.msk.bf16.mxu1 %vm716_vm1, %v4416_v26  ;;  %v2108_v15 = vadd.s32 48, %v4790_v10  ;;  %v4814_v25 = vadd.s32 %v4796_v14, %v2105_v12  ;;  %v4817_v26 = vadd.s32 %v4796_v14, %v2103_v13  ;;  %s4446_s11 = sshll.u32 %s4539_s8, 4  ;;  %s4447_s11 = int_to_ptr.vmem [resolvable:$false] %s4446_s11 }
  0x43   : > { %s4448_s20 = scalar_lea.vmem %s4447_s11, 64  ;;  %p4449_p4 = scmp.lt.s32.totalorder %s6349_s6, %s4447_s11 }
  0x44   : > { %vm2363_vm5 = vcmp.lt.s32.totalorder %v4814_v25, 8192  ;;  %vm2361_vm6 = vcmp.lt.s32.totalorder %v4817_v26, 8192  ;;  %p4450_p5 = scmp.lt.s32.totalorder %s4448_s20, %s4442_s10 }
  0x46   : > { %p4451_p6 = por %p4450_p5, %p4449_p4 }
  0x48   : > { %p4452_p7 = pnand %p4451_p6, %p4445_p2 }
  0x49   : > { %4173 = vmatmul.mubr.msk.bf16.gmra.mrb[12].mxu0 %vm716_vm1, %v4385_v16  ;;  %4237 = vmatmul.mubr.msk.bf16.gmra.mrb[12].mxu1 %vm716_vm1, %v4417_v29  ;;  %v2106_v16 = vadd.s32 32, %v4790_v10  ;;  %v2116_v29 = vadd.s32 112, %v4790_v10 }
  0x4a   : > { %4176 = vmatprep.mubr.msk.bf16.mxu0 %vm716_vm1, %v4386_v20  ;;  %4240 = vmatprep.mubr.msk.bf16.mxu1 %vm716_vm1, %v4418_v30  ;;  %v2110_v20 = vadd.s32 64, %v4790_v10  ;;  %v2114_v30 = vadd.s32 96, %v4790_v10 }
  0x51   : > { %4177 = vmatmul.mubr.msk.bf16.gmra.mrb[16].mxu0 %vm716_vm1, %v4387_v23  ;;  %4241 = vmatmul.mubr.msk.bf16.gmra.mrb[16].mxu1 %vm716_vm1, %v4419_v33  ;;  %v4807_v23 = vadd.s32 %v4796_v14, %v2104_v11  ;;  %v4834_v33 = vadd.s32 %v4796_v14, %v2112_v19  ;;  %v2135_v11 = vadd.s32 264, %v4790_v10  ;;  %v2144_v19 = vadd.s32 336, %v4790_v10 }
  0x52   : > { %4180 = vmatprep.mubr.msk.bf16.mxu0 %vm716_vm1, %v4388_v24  ;;  %4244 = vmatprep.mubr.msk.bf16.mxu1 %vm716_vm1, %v4420_v34  ;;  %v4811_v24 = vadd.s32 %v4796_v14, %v4790_v10  ;;  %v4837_v34 = vadd.s32 %v4796_v14, %v2110_v20  ;;  %v2142_v20 = vadd.s32 320, %v4790_v10 }
  0x53   : > { %vm2362_vm2 = vcmp.lt.s32.totalorder %v4807_v23, 8192  ;;  %vm2370_vm12 = vcmp.lt.s32.totalorder %v4834_v33, 8192 }
  0x54   : > { %vm2360_vm3 = vcmp.lt.s32.totalorder %v4811_v24, 8192  ;;  %v2169_v24 = vadd.s32 536, %v4790_v10  ;;  %vm2368_vm13 = vcmp.lt.s32.totalorder %v4837_v34, 8192 }
  0x59   : > { %4181 = vmatmul.mubr.msk.bf16.gmra.mrb[20].mxu0 %vm716_vm1, %v4389_v27  ;;  %4245 = vmatmul.mubr.msk.bf16.gmra.mrb[20].mxu1 %vm716_vm1, %v4421_v37  ;;  %v4820_v27 = vadd.s32 %v4796_v14, %v2108_v15  ;;  %v2117_v37 = vadd.s32 120, %v4790_v10  ;;  %v2140_v15 = vadd.s32 304, %v4790_v10 }
  0x5a   : > { %4184 = vmatprep.mubr.msk.bf16.mxu0 %vm716_vm1, %v4390_v28  ;;  %4248 = vmatprep.mubr.msk.bf16.mxu1 %vm716_vm1, %v4422_v38  ;;  %v4823_v28 = vadd.s32 %v4796_v14, %v2106_v16  ;;  %v2115_v38 = vadd.s32 104, %v4790_v10  ;;  %v2138_v16 = vadd.s32 288, %v4790_v10 }
  0x5b   : > { %vm2366_vm8 = vcmp.lt.s32.totalorder %v4820_v27, 8192 }
  0x5c   : > { %vm2364_vm9 = vcmp.lt.s32.totalorder %v4823_v28, 8192  ;;  %v2172_v28 = vadd.s32 560, %v4790_v10 }
  0x61   : > { %4185 = vmatmul.mubr.msk.bf16.gmra.mrb[24].mxu0 %vm716_vm1, %v4391_v31  ;;  %4249 = vmatmul.mubr.msk.bf16.gmra.mrb[24].mxu1 %vm716_vm1, %v4423_v41  ;;  %v4828_v31 = vadd.s32 %v4796_v14, %v2109_v17  ;;  %v2121_v41 = vadd.s32 152, %v4790_v10  ;;  %v2141_v17 = vadd.s32 312, %v4790_v10 }
  0x62   : > { %4188 = vmatprep.mubr.msk.bf16.mxu0 %vm716_vm1, %v4392_v32  ;;  %4252 = vmatprep.mubr.msk.bf16.mxu1 %vm716_vm1, %v4424_v42  ;;  %v4831_v32 = vadd.s32 %v4796_v14, %v2107_v18  ;;  %v2119_v42 = vadd.s32 136, %v4790_v10  ;;  %v2139_v18 = vadd.s32 296, %v4790_v10 }
  0x63   : > { %vm2367_vm10 = vcmp.lt.s32.totalorder %v4828_v31, 8192 }
  0x64   : > { %vm2365_vm11 = vcmp.lt.s32.totalorder %v4831_v32, 8192 }
  0x69   : > { %4189 = vmatmul.mubr.msk.bf16.gmra.mrb[28].mxu0 %vm716_vm1, %v4393_v35  ;;  %4253 = vmatmul.mubr.msk.bf16.gmra.mrb[28].mxu1 %vm716_vm1, %v4425_v45  ;;  %v4840_v35 = vadd.s32 %v4796_v14, %v2113_v21  ;;  %v2124_v45 = vadd.s32 176, %v4790_v10 }
  0x6a   : > { %4192 = vmatprep.mubr.msk.bf16.mxu0 %vm716_vm1, %v4394_v36  ;;  %4256 = vmatprep.mubr.msk.bf16.mxu1 %vm716_vm1, %v4426_v46  ;;  %v4843_v36 = vadd.s32 %v4796_v14, %v2111_v22  ;;  %v2122_v46 = vadd.s32 160, %v4790_v10 }
  0x6b   : > { %vm2371_vm14 = vcmp.lt.s32.totalorder %v4840_v35, 8192 }
  0x6c   : > { %vm2369_vm15 = vcmp.lt.s32.totalorder %v4843_v36, 8192 }
  0x71   : > { %4193 = vmatmul.mubr.msk.bf16.gmra.mrb[32].mxu0 %vm716_vm1, %v4395_v39  ;;  %4257 = vmatmul.mubr.msk.bf16.gmra.mrb[32].mxu1 %vm716_vm1, %v4427_v49  ;;  %v2120_v39 = vadd.s32 144, %v4790_v10  ;;  %v2128_v49 = vadd.s32 208, %v4790_v10 }
  0x72   : > { %4196 = vmatprep.mubr.msk.bf16.mxu0 %vm716_vm1, %v4396_v40  ;;  %4260 = vmatprep.mubr.msk.bf16.mxu1 %vm716_vm1, %v4428_v50  ;;  %v2118_v40 = vadd.s32 128, %v4790_v10  ;;  %v2126_v50 = vadd.s32 192, %v4790_v10 }
  0x79   : > { %4197 = vmatmul.mubr.msk.bf16.gmra.mrb[36].mxu0 %vm716_vm1, %v4397_v43  ;;  %4261 = vmatmul.mubr.msk.bf16.gmra.mrb[36].mxu1 %vm716_vm1, %v4429_v53  ;;  %v4852_v43 = vadd.s32 %v4796_v14, %v2116_v29  ;;  %v2129_v53 = vadd.s32 216, %v4790_v10  ;;  %v2145_v29 = vadd.s32 344, %v4790_v10 }
  0x7a   : > { %4200 = vmatprep.mubr.msk.bf16.mxu0 %vm716_vm1, %v4398_v44  ;;  %4264 = vmatprep.mubr.msk.bf16.mxu1 %vm716_vm1, %v4430_v54  ;;  %v4855_v44 = vadd.s32 %v4796_v14, %v2114_v30  ;;  %v2127_v54 = vadd.s32 200, %v4790_v10  ;;  %v2143_v30 = vadd.s32 328, %v4790_v10 }
  0x7b   : > { %vm2374_vm0 = vcmp.lt.s32.totalorder %v4852_v43, 8192 }
  0x81   : > { %4201 = vmatmul.mubr.msk.bf16.gmra.mrb[40].mxu0 %vm716_vm1, %v4399_v47  ;;  %4265 = vmatmul.mubr.msk.bf16.gmra.mrb[40].mxu1 %vm716_vm1, %v4431_v57  ;;  %v2125_v47 = vadd.s32 184, %v4790_v10  ;;  %v4878_v57 = vadd.s32 %v4796_v14, %v2121_v41  ;;  %v4949_v41 = vadd.s32 %v4796_v14, %v2140_v15  ;;  %v2156_v15 = vadd.s32 432, %v4790_v10 }
  0x82   : > { %4204 = vmatprep.mubr.msk.bf16.mxu0 %vm716_vm1, %v4400_v48  ;;  %4268 = vmatprep.mubr.msk.bf16.mxu1 %vm716_vm1, %v4432_v58  ;;  %v2123_v48 = vadd.s32 168, %v4790_v10  ;;  %v4881_v58 = vadd.s32 %v4796_v14, %v2119_v42  ;;  %v4952_v42 = vadd.s32 %v4796_v14, %v2138_v16  ;;  %v2154_v16 = vadd.s32 416, %v4790_v10 }
  0x89   : > { %4205 = vmatmul.mubr.msk.bf16.gmra.mrb[44].mxu0 %vm716_vm1, %v4401_v51  ;;  %4269 = vmatmul.mubr.msk.bf16.gmra.mrb[44].mxu1 %vm716_vm1, %v4433_v61  ;;  %v4864_v51 = vadd.s32 %v4796_v14, %v2117_v37  ;;  %v2132_v61 = vadd.s32 240, %v4790_v10 }
  0x8a   : > { %4208 = vmatprep.mubr.msk.bf16.mxu0 %vm716_vm1, %v4402_v52  ;;  %4272 = vmatprep.mubr.msk.bf16.mxu1 %vm716_vm1, %v4434_v62  ;;  %v4867_v52 = vadd.s32 %v4796_v14, %v2115_v38  ;;  %v2130_v62 = vadd.s32 224, %v4790_v10 }
  0x8b   : > { %v4916_v12 = vadd.s32 %v4796_v14, %v2132_v61  ;;  %v2149_v61 = vadd.s32 376, %v4790_v10 }
  0x8c   : > { %v4919_v13 = vadd.s32 %v4796_v14, %v2130_v62  ;;  %v2147_v62 = vadd.s32 360, %v4790_v10 }
  0x91   : > { %4209 = vmatmul.mubr.msk.bf16.gmra.mrb[48].mxu0 %vm716_vm1, %v4403_v55  ;;  %4273 = vmatmul.mubr.msk.bf16.gmra.mrb[48].mxu1 %vm716_vm1, %v4435_v1  ;;  %v4872_v55 = vadd.s32 %v4796_v14, %v2120_v39  ;;  %v4898_v1 = vadd.s32 %v4796_v14, %v2128_v49  ;;  %v4942_v39 = vadd.s32 %v4796_v14, %v2137_v9 }
  0x92   : > { %4212 = vmatprep.mubr.msk.bf16.mxu0 %vm716_vm1, %v4404_v56  ;;  %4276 = vmatprep.mubr.msk.bf16.mxu1 %vm716_vm1, %v4436_v2  ;;  %v4875_v56 = vadd.s32 %v4796_v14, %v2118_v40  ;;  %v4901_v2 = vadd.s32 %v4796_v14, %v2126_v50  ;;  %v4945_v40 = vadd.s32 %v4796_v14, %v2135_v11 }
  0x93   : > { %v4964_v49 = vadd.s32 %v4796_v14, %v2144_v19  ;;  %v4967_v50 = vadd.s32 %v4796_v14, %v2142_v20  ;;  %v2160_v19 = vadd.s32 464, %v4790_v10  ;;  %v2158_v20 = vadd.s32 448, %v4790_v10 }
  0x99   : > { %4213 = vmatmul.mubr.msk.bf16.gmra.mrb[52].mxu0 %vm716_vm1, %v4405_v59  ;;  %4277 = vmatmul.mubr.msk.bf16.gmra.mrb[52].mxu1 %vm716_vm1, %v4437_v4  ;;  %v4884_v59 = vadd.s32 %v4796_v14, %v2124_v45  ;;  %v4907_v4 = vadd.s32 %v4796_v14, %v2127_v54  ;;  %v2148_v45 = vadd.s32 368, %v4790_v10  ;;  %v4974_v54 = vadd.s32 %v4796_v14, %v2143_v30 }
  0x9a   : > { %4216 = vmatprep.mubr.msk.bf16.mxu0 %vm716_vm1, %v4406_v60  ;;  %4280 = vmatprep.mubr.msk.bf16.mxu1 %vm716_vm1, %v4438_v5  ;;  %v4887_v60 = vadd.s32 %v4796_v14, %v2122_v46  ;;  %v2133_v5 = vadd.s32 248, %v4790_v10  ;;  %v2146_v46 = vadd.s32 352, %v4790_v10  ;;  %v4999_v30 = vadd.s32 %v4796_v14, %v2147_v62 }
  0x9b   : > { %6452 = vst [vmem:[#allocation6_spill] sm:$0xff] %v4974_v54  ;;  %v4984_v9 = vadd.s32 %v4796_v14, %v2148_v45  ;;  %v2161_v45 = vadd.s32 472, %v4790_v10  ;;  %v5017_v62 = vadd.s32 %v4796_v14, %v2156_v15  ;;  %v5035_v15 = vadd.s32 %v4796_v14, %v2158_v20 }
  0x9c   : > { %v4928_v21 = vadd.s32 %v4796_v14, %v2133_v5  ;;  %v2152_v5 = vadd.s32 400, %v4790_v10  ;;  %v4987_v11 = vadd.s32 %v4796_v14, %v2146_v46  ;;  %6456 = vst [vmem:[#allocation10_spill] sm:$0xff] %v4999_v30  ;;  %v2159_v46 = vadd.s32 456, %v4790_v10 }
  0x9d   : > { %6453 = vst [vmem:[#allocation7_spill] sm:$0xff] %v4984_v9  ;;  %6461 = vst [vmem:[#allocation15_spill] sm:$0xff] %v5017_v62  ;;  %v5020_v30 = vadd.s32 %v4796_v14, %v2154_v16 }
  0x9e   : > { %6454 = vst [vmem:[#allocation8_spill] sm:$0xff] %v4987_v11  ;;  %v5004_v11 = vadd.s32 %v4796_v14, %v2152_v5  ;;  %v2164_v5 = vadd.s32 496, %v4790_v10  ;;  %6466 = vst [vmem:[#allocation20_spill] sm:$0xff] %v5035_v15 }
  0x9f   : > { %6462 = vst [vmem:[#allocation16_spill] sm:$0xff] %v5020_v30  ;;  %v2166_v30 = vadd.s32 512, %v4790_v10 }
  0xa0   : > { %6457 = vst [vmem:[#allocation11_spill] sm:$0xff] %v5004_v11  ;;  %v2162_v11 = vadd.s32 480, %v4790_v10 }
  0xa1   : > { %4217 = vmatmul.mubr.msk.bf16.gmra.mrb[56].mxu0 %vm716_vm1, %v4407_v63  ;;  %4281 = vmatmul.mubr.msk.bf16.gmra.mrb[56].mxu1 %vm716_vm1, %v4439_v6  ;;  %v4892_v63 = vadd.s32 %v4796_v14, %v2125_v47  ;;  %v2131_v6 = vadd.s32 232, %v4790_v10  ;;  %v4958_v47 = vadd.s32 %v4796_v14, %v2141_v17  ;;  %v2157_v17 = vadd.s32 440, %v4790_v10 }
  0xa2   : > { %4220 = vmatprep.mubr.msk.bf16.mxu0 %vm716_vm1, %v4408_v0  ;;  %4284 = vmatprep.mubr.msk.bf16.mxu1 %vm716_vm1, %v4440_v7  ;;  %v4895_v0 = vadd.s32 %v4796_v14, %v2123_v48  ;;  %v2136_v7 = vadd.s32 272, %v4790_v10  ;;  %v4961_v48 = vadd.s32 %v4796_v14, %v2139_v18  ;;  %v2155_v18 = vadd.s32 424, %v4790_v10 }
  0xa3   : > { %v4931_v22 = vadd.s32 %v4796_v14, %v2131_v6  ;;  %v2150_v6 = vadd.s32 384, %v4790_v10  ;;  %v5063_v23 = vadd.s32 %v4796_v14, %v2162_v11 }
  0xa4   : > { %v4936_v37 = vadd.s32 %v4796_v14, %v2136_v7  ;;  %v2153_v7 = vadd.s32 408, %v4790_v10 }
  0xa5   : > { %v5007_v9 = vadd.s32 %v4796_v14, %v2150_v6  ;;  %v5026_v6 = vadd.s32 %v4796_v14, %v2157_v17  ;;  %v5045_v17 = vadd.s32 %v4796_v14, %v2161_v45  ;;  %6470 = vst [vmem:[#allocation24_spill] sm:$0xff] %v5063_v23 }
  0xa6   : > { %v5010_v54 = vadd.s32 %v4796_v14, %v2153_v7  ;;  %v5029_v7 = vadd.s32 %v4796_v14, %v2155_v18  ;;  %v5048_v18 = vadd.s32 %v4796_v14, %v2159_v46 }
  0xa7   : > { %6458 = vst [vmem:[#allocation12_spill] sm:$0xff] %v5007_v9  ;;  %6463 = vst [vmem:[#allocation17_spill] sm:$0xff] %v5026_v6  ;;  %v2168_v6 = vadd.s32 528, %v4790_v10 }
  0xa8   : > { %6459 = vst [vmem:[#allocation13_spill] sm:$0xff] %v5010_v54  ;;  %6464 = vst [vmem:[#allocation18_spill] sm:$0xff] %v5029_v7 }
  0xa9   : > { %4221 = vmatmul.mubr.msk.bf16.gmra.mrb[60].mxu0 %vm716_vm1, %v4409_v3  ;;  %4285 = vmatmul.mubr.msk.bf16.gmra.mrb[60].mxu1 %vm716_vm1, %v4441_v8  ;;  %v4904_v3 = vadd.s32 %v4796_v14, %v2129_v53  ;;  %v2134_v8 = vadd.s32 256, %v4790_v10  ;;  %v4971_v53 = vadd.s32 %v4796_v14, %v2145_v29  ;;  %v4996_v29 = vadd.s32 %v4796_v14, %v2149_v61 }
  0xaa   : > { %6467 = vst [vmem:[#allocation21_spill] sm:$0xff] %v5045_v17  ;;  %6468 = vst [vmem:[#allocation22_spill] sm:$0xff] %v5048_v18  ;;  %v5060_v18 = vadd.s32 %v4796_v14, %v2164_v5 }
  0xab   : > { %v4939_v38 = vadd.s32 %v4796_v14, %v2134_v8  ;;  %6451 = vst [vmem:[#allocation5_spill] sm:$0xff] %v4971_v53  ;;  %v2151_v8 = vadd.s32 392, %v4790_v10  ;;  %6455 = vst [vmem:[#allocation9_spill] sm:$0xff] %v4996_v29 }
  0xac   : > { %6469 = vst [vmem:[#allocation23_spill] sm:$0xff] %v5060_v18  ;;  %v5088_v18 = vadd.s32 %v4796_v14, %v2166_v30 }
  0xad   : > { %v5013_v61 = vadd.s32 %v4796_v14, %v2151_v8  ;;  %v5032_v8 = vadd.s32 %v4796_v14, %v2160_v19  ;;  %v2165_v19 = vadd.s32 504, %v4790_v10 }
  0xaf   : > { %6460 = vst [vmem:[#allocation14_spill] sm:$0xff] %v5013_v61  ;;  %6465 = vst [vmem:[#allocation19_spill] sm:$0xff] %v5032_v8  ;;  %v2163_v8 = vadd.s32 488, %v4790_v10  ;;  %v5075_v23 = vadd.s32 %v4796_v14, %v2165_v19 }
  0xb1   : > { %6471 = vst [vmem:[#allocation25_spill] sm:$0xff] %v5075_v23 }
 0x104   : > { %v4162_v16 = vpop.f32.mrb[0].mxu0 }
 0x105   : > { %v3952_v20 = vpack.c.bf16 %v4162_v16, %v4162_v16  ;;  %v2746_v15 = vsel %vm2362_vm2, %v4162_v16, 0.0  ;;  %v949_v7 = vpop.f32.mrb[1].mxu0  ;;  %vm2372_vm2 = vcmp.lt.s32.totalorder %v4855_v44, 8192 }
 0x106   : > { %v3950_v62 = vpack.c.bf16 %v949_v7, %v949_v7  ;;  %v2744_v45 = vsel %vm2360_vm3, %v949_v7, 0.0  ;;  %v4163_v46 = vpop.f32.mrb[2].mxu0  ;;  %v2167_v7 = vadd.s32 520, %v4790_v10  ;;  %v3138_v54 = vmul.f32 %v2746_v15, %v2746_v15 }
 0x107   : > { %1975 = vst.msk [vmem:[%s5042_s21 + $0x8] sm:$0xf] %vm1972_vm4, %v3952_v20  ;;  %v3953_v16 = vpack.c.bf16 %v4163_v46, %v4163_v46  ;;  %v2747_v17 = vsel %vm2363_vm5, %v4163_v46, 0.0  ;;  %v952_v61 = vpop.f32.mrb[3].mxu0  ;;  %v3136_v5 = vmul.f32 %v2744_v45, %v2744_v45  ;;  %v5082_v20 = vadd.s32 %v4796_v14, %v2163_v8 }
 0x108   : > { %1973 = vst.msk [vmem:[%s5042_s21] sm:$0xf] %vm1972_vm4, %v3950_v62  ;;  %v3951_v11 = vpack.c.bf16 %v952_v61, %v952_v61  ;;  %v2745_v25 = vsel %vm2361_vm6, %v952_v61, 0.0  ;;  %v5085_v46 = vadd.s32 %v4796_v14, %v2168_v6  ;;  %v2873_v62 = vsel %vm2872_vm7, %v2744_v45, 0.0 }
 0x109   : > { %1976 = vst.msk [vmem:[%s5042_s21 + $0xc] sm:$0xf] %vm1972_vm4, %v3953_v16  ;;  %6472 = vst [vmem:[#allocation26_spill] sm:$0xff] %v5082_v20  ;;  %v3139_v9 = vmul.f32 %v2747_v17, %v2747_v17  ;;  %v2874_v19 = vsel %vm2872_vm7, %v2745_v25, 0.0  ;;  %v3137_v16 = vmul.f32 %v2745_v25, %v2745_v25  ;;  %v2876_v26 = vsel %vm2872_vm7, %v2746_v15, 0.0 }
 0x10a   : > { %1974 = vst.msk [vmem:[%s5042_s21 + $0x4] sm:$0xf] %vm1972_vm4, %v3951_v11  ;;  %v2875_v61 = vadd.f32 %v2874_v19, %v2873_v62  ;;  %v5097_v8 = vadd.s32 %v4796_v14, %v2169_v24  ;;  %v5100_v6 = vadd.s32 %v4796_v14, %v2167_v7  ;;  %v3267_v30 = vsel %vm2872_vm7, %v3138_v54, 0.0 }
 0x10b   : > { %v3264_v45 = vsel %vm2872_vm7, %v3136_v5, 0.0  ;;  %v2878_v11 = vsel %vm2872_vm7, %v2747_v17, 0.0  ;;  %v3265_v20 = vsel %vm2872_vm7, %v3137_v16, 0.0  ;;  %v3269_v5 = vsel %vm2872_vm7, %v3139_v9, 0.0 }
 0x10c   : > { %v4166_v25 = vpop.f32.mrb[4].mxu0  ;;  %v2877_v15 = vadd.f32 %v2876_v26, %v2875_v61  ;;  %v3266_v24 = vadd.f32 %v3265_v20, %v3264_v45  ;;  %v2170_v45 = vadd.s32 544, %v4790_v10  ;;  %vm2426_vm1 = vcmp.lt.s32.totalorder %v5085_v46, 8192 }
 0x10d   : > { %v3956_v62 = vpack.c.bf16 %v4166_v25, %v4166_v25  ;;  %v2750_v7 = vsel %vm2366_vm8, %v4166_v25, 0.0  ;;  %v965_v54 = vpop.f32.mrb[5].mxu0  ;;  %vm2375_vm3 = vcmp.lt.s32.totalorder %v4864_v51, 8192  ;;  %vm2373_vm5 = vcmp.lt.s32.totalorder %v4867_v52, 8192 }
 0x10e   : > { %v3142_v19 = vmul.f32 %v2750_v7, %v2750_v7  ;;  %v3954_v17 = vpack.c.bf16 %v965_v54, %v965_v54  ;;  %v2748_v16 = vsel %vm2364_vm9, %v965_v54, 0.0  ;;  %v4167_v23 = vpop.f32.mrb[6].mxu0  ;;  %v2879_v29 = vadd.f32 %v2878_v11, %v2877_v15 }
 0x10f   : > { %v3268_v53 = vadd.f32 %v3267_v30, %v3266_v24  ;;  %1979 = vst.msk [vmem:[%s5042_s21 + $0x18] sm:$0xf] %vm1972_vm4, %v3956_v62  ;;  %v2880_v20 = vsel %vm2872_vm7, %v2748_v16, 0.0  ;;  %v3140_v26 = vmul.f32 %v2748_v16, %v2748_v16  ;;  %v968_v27 = vpop.f32.mrb[7].mxu0  ;;  %v3957_v9 = vpack.c.bf16 %v4167_v23, %v4167_v23 }
 0x110   : > { %1977 = vst.msk [vmem:[%s5042_s21 + $0x10] sm:$0xf] %vm1972_vm4, %v3954_v17  ;;  %v3955_v61 = vpack.c.bf16 %v968_v27, %v968_v27  ;;  %v2881_v30 = vadd.f32 %v2880_v20, %v2879_v29  ;;  %v2751_v15 = vsel %vm2367_vm10, %v4167_v23, 0.0  ;;  %v2884_v24 = vsel %vm2872_vm7, %v2750_v7, 0.0 }
 0x111   : > { %v3270_v11 = vadd.f32 %v3269_v5, %v3268_v53  ;;  %v3271_v25 = vsel %vm2872_vm7, %v3140_v26, 0.0  ;;  %1980 = vst.msk [vmem:[%s5042_s21 + $0x1c] sm:$0xf] %vm1972_vm4, %v3957_v9  ;;  %v2749_v62 = vsel %vm2365_vm11, %v968_v27, 0.0  ;;  %v2173_v53 = vadd.s32 568, %v4790_v10 }
 0x112   : > { %1978 = vst.msk [vmem:[%s5042_s21 + $0x14] sm:$0xf] %vm1972_vm4, %v3955_v61  ;;  %v5135_v29 = vadd.s32 552, %v4790_v10  ;;  %v3275_v31 = vsel %vm2872_vm7, %v3142_v19, 0.0  ;;  %v2882_v7 = vsel %vm2872_vm7, %v2749_v62, 0.0  ;;  %v3141_v54 = vmul.f32 %v2749_v62, %v2749_v62 }
 0x113   : > { %v3272_v23 = vadd.f32 %v3271_v25, %v3270_v11  ;;  %v2886_v5 = vsel %vm2872_vm7, %v2751_v15, 0.0  ;;  %v3143_v17 = vmul.f32 %v2751_v15, %v2751_v15  ;;  %v2883_v32 = vadd.f32 %v2882_v7, %v2881_v30 }
 0x114   : > { %v4170_v16 = vpop.f32.mrb[8].mxu0  ;;  %v5143_v20 = vadd.s32 %v4796_v14, %v2172_v28  ;;  %v3273_v26 = vsel %vm2872_vm7, %v3141_v54, 0.0  ;;  %v5149_v61 = vadd.s32 %v4796_v14, %v2170_v45  ;;  %v5152_v62 = vadd.s32 %v4796_v14, %v2173_v53 }
 0x115   : > { %v3960_v19 = vpack.c.bf16 %v4170_v16, %v4170_v16  ;;  %v2754_v27 = vsel %vm2370_vm12, %v4170_v16, 0.0  ;;  %v981_v9 = vpop.f32.mrb[9].mxu0  ;;  %v2885_v11 = vadd.f32 %v2884_v24, %v2883_v32  ;;  %v3274_v30 = vadd.f32 %v3273_v26, %v3272_v23 }
 0x116   : > { %v3146_v25 = vmul.f32 %v2754_v27, %v2754_v27  ;;  %v4171_v15 = vpop.f32.mrb[10].mxu0  ;;  %v3958_v28 = vpack.c.bf16 %v981_v9, %v981_v9  ;;  %v2752_v33 = vsel %vm2368_vm13, %v981_v9, 0.0  ;;  %v3277_v24 = vsel %vm2872_vm7, %v3143_v17, 0.0 }
 0x117   : > { %1983 = vst.msk [vmem:[%s5042_s21 + $0x28] sm:$0xf] %vm1972_vm4, %v3960_v19  ;;  %v3961_v7 = vpack.c.bf16 %v4171_v15, %v4171_v15  ;;  %v2755_v45 = vsel %vm2371_vm14, %v4171_v15, 0.0  ;;  %v984_v54 = vpop.f32.mrb[11].mxu0  ;;  %v3276_v23 = vadd.f32 %v3275_v31, %v3274_v30  ;;  %v2887_v32 = vadd.f32 %v2886_v5, %v2885_v11  ;;  %v4226_v19 = vpop.f32.mrb[0].mxu1 }
 0x118   : > { %v2888_v53 = vsel %vm2872_vm7, %v2752_v33, 0.0  ;;  %v2892_v16 = vsel %vm2872_vm7, %v2754_v27, 0.0  ;;  %1981 = vst.msk [vmem:[%s5042_s21 + $0x20] sm:$0xf] %vm1972_vm4, %v3958_v28  ;;  %v3144_v34 = vmul.f32 %v2752_v33, %v2752_v33  ;;  %v3147_v26 = vmul.f32 %v2755_v45, %v2755_v45  ;;  %v5171_v5 = vpop.f32.mrb[1].mxu1 }
 0x119   : > { %1984 = vst.msk [vmem:[%s5042_s21 + $0x2c] sm:$0xf] %vm1972_vm4, %v3961_v7  ;;  %v3959_v35 = vpack.c.bf16 %v984_v54, %v984_v54  ;;  %v2889_v9 = vadd.f32 %v2888_v53, %v2887_v32  ;;  %v3278_v15 = vadd.f32 %v3277_v24, %v3276_v23  ;;  %v2753_v17 = vsel %vm2369_vm15, %v984_v54, 0.0  ;;  %v5179_v33 = vpop.f32.mrb[2].mxu1 }
 0x11a   : > { %vm2378_vm6 = vcmp.lt.s32.totalorder %v4872_v55, 8192  ;;  %v4016_v31 = vpack.c.bf16 %v4226_v19, %v4226_v19  ;;  %vm2424_vm8 = vcmp.lt.s32.totalorder %v5088_v18, 8192  ;;  %v3283_v27 = vsel %vm2872_vm7, %v3146_v25, 0.0  ;;  %v5188_v23 = vpop.f32.mrb[3].mxu1 }
 0x11b   : > { %v3279_v11 = vsel %vm2872_vm7, %v3144_v34, 0.0  ;;  %1982 = vst.msk [vmem:[%s5042_s21 + $0x24] sm:$0xf] %vm1972_vm4, %v3959_v35  ;;  %v2890_v30 = vsel %vm2872_vm7, %v2753_v17, 0.0  ;;  %v3145_v28 = vmul.f32 %v2753_v17, %v2753_v17  ;;  %v2894_v7 = vsel %vm2872_vm7, %v2755_v45, 0.0 }
 0x11c   : > { %v3280_v36 = vadd.f32 %v3279_v11, %v3278_v15  ;;  %v2891_v54 = vadd.f32 %v2890_v30, %v2889_v9  ;;  %v4174_v24 = vpop.f32.mrb[12].mxu0  ;;  %vm2376_vm9 = vcmp.lt.s32.totalorder %v4875_v56, 8192  ;;  %vm2379_vm10 = vcmp.lt.s32.totalorder %v4878_v57, 8192  ;;  %2039 = vst.msk [vmem:[%s5042_s21 + $0x108] sm:$0xf] %vm1972_vm4, %v4016_v31 }
 0x11d   : > { %v4014_v25 = vpack.c.bf16 %v5171_v5, %v5171_v5  ;;  %v3281_v32 = vsel %vm2872_vm7, %v3145_v28, 0.0  ;;  %v3964_v53 = vpack.c.bf16 %v4174_v24, %v4174_v24  ;;  %v2758_v45 = vsel %vm2374_vm0, %v4174_v24, 0.0  ;;  %v997_v34 = vpop.f32.mrb[13].mxu0 }
 0x11e   : > { %v2810_v35 = vsel %vm2426_vm1, %v4226_v19, 0.0  ;;  %v3285_v9 = vsel %vm2872_vm7, %v3147_v26, 0.0  ;;  %v2893_v15 = vadd.f32 %v2892_v16, %v2891_v54  ;;  %v3282_v17 = vadd.f32 %v3281_v32, %v3280_v36  ;;  %v4175_v11 = vpop.f32.mrb[14].mxu0  ;;  %v5214_v32 = vpop.f32.mrb[4].mxu1 }
 0x11f   : > { %v3150_v31 = vmul.f32 %v2758_v45, %v2758_v45  ;;  %2037 = vst.msk [vmem:[%s5042_s21 + $0x100] sm:$0xf] %vm1972_vm4, %v4014_v25  ;;  %1987 = vst.msk [vmem:[%s5042_s21 + $0x38] sm:$0xf] %vm1972_vm4, %v3964_v53  ;;  %v3962_v30 = vpack.c.bf16 %v997_v34, %v997_v34  ;;  %v2756_v43 = vsel %vm2372_vm2, %v997_v34, 0.0  ;;  %v3965_v28 = vpack.c.bf16 %v4175_v11, %v4175_v11  ;;  %v1000_v19 = vpop.f32.mrb[15].mxu0 }
 0x120   : > { %v2759_v46 = vsel %vm2375_vm3, %v4175_v11, 0.0  ;;  %vm2377_vm11 = vcmp.lt.s32.totalorder %v4881_v58, 8192  ;;  %v3284_v16 = vadd.f32 %v3283_v27, %v3282_v17  ;;  %v2895_v26 = vadd.f32 %v2894_v7, %v2893_v15  ;;  %v5219_v15 = vpop.f32.mrb[5].mxu1 }
 0x121   : > { %v2896_v36 = vsel %vm2872_vm7, %v2756_v43, 0.0  ;;  %v5207_v54 = vsel %vm2872_vm7, %v2810_v35, 0.0  ;;  %v2900_v24 = vsel %vm2872_vm7, %v2758_v45, 0.0  ;;  %1985 = vst.msk [vmem:[%s5042_s21 + $0x30] sm:$0xf] %vm1972_vm4, %v3962_v30  ;;  %v3148_v44 = vmul.f32 %v2756_v43, %v2756_v43  ;;  %v5226_v43 = vpop.f32.mrb[6].mxu1 }
 0x122   : > { %1988 = vst.msk [vmem:[%s5042_s21 + $0x3c] sm:$0xf] %vm1972_vm4, %v3965_v28  ;;  %v3151_v51 = vmul.f32 %v2759_v46, %v2759_v46  ;;  %v3963_v25 = vpack.c.bf16 %v1000_v19, %v1000_v19  ;;  %v2897_v53 = vadd.f32 %v2896_v36, %v2895_v26  ;;  %v3286_v27 = vadd.f32 %v3285_v9, %v3284_v16 }
 0x123   : > { %v2757_v7 = vsel %vm2373_vm5, %v1000_v19, 0.0  ;;  %vm2382_vm12 = vcmp.lt.s32.totalorder %v4884_v59, 8192  ;;  %v3202_v34 = vmul.f32 %v2810_v35, %v2810_v35  ;;  %v3291_v45 = vsel %vm2872_vm7, %v3150_v31, 0.0  ;;  %v5232_v31 = vpop.f32.mrb[7].mxu1 }
 0x124   : > { %v3287_v17 = vsel %vm2872_vm7, %v3148_v44, 0.0  ;;  %1986 = vst.msk [vmem:[%s5042_s21 + $0x34] sm:$0xf] %vm1972_vm4, %v3963_v25  ;;  %v2898_v11 = vsel %vm2872_vm7, %v2757_v7, 0.0  ;;  %v3149_v30 = vmul.f32 %v2757_v7, %v2757_v7  ;;  %v2902_v52 = vsel %vm2872_vm7, %v2759_v46, 0.0  ;;  %v4178_v35 = vpop.f32.mrb[16].mxu0 }
 0x125   : > { %v3288_v9 = vadd.f32 %v3287_v17, %v3286_v27  ;;  %v3293_v28 = vsel %vm2872_vm7, %v3151_v51, 0.0  ;;  %v2899_v19 = vadd.f32 %v2898_v11, %v2897_v53  ;;  %vm2380_vm13 = vcmp.lt.s32.totalorder %v4887_v60, 8192  ;;  %v1013_v44 = vpop.f32.mrb[17].mxu0 }
 0x126   : > { %vm2383_vm14 = vcmp.lt.s32.totalorder %v4892_v63, 8192  ;;  %v3289_v16 = vsel %vm2872_vm7, %v3149_v30, 0.0  ;;  %v3968_v26 = vpack.c.bf16 %v4178_v35, %v4178_v35  ;;  %v2762_v36 = vsel %vm2378_vm6, %v4178_v35, 0.0  ;;  %v4179_v27 = vpop.f32.mrb[18].mxu0 }
 0x127   : > { %v2808_v46 = vsel %vm2424_vm8, %v5171_v5, 0.0  ;;  %vm2427_vm15 = vcmp.lt.s32.totalorder %v5097_v8, 8192  ;;  %v2901_v51 = vadd.f32 %v2900_v24, %v2899_v19  ;;  %v3290_v25 = vadd.f32 %v3289_v16, %v3288_v9  ;;  %v1016_v5 = vpop.f32.mrb[19].mxu0  ;;  %v5260_v16 = vpop.f32.mrb[8].mxu1 }
 0x128   : > { %v3154_v53 = vmul.f32 %v2762_v36, %v2762_v36  ;;  %v5242_v7 = vsel %vm2872_vm7, %v3202_v34, 0.0  ;;  %1991 = vst.msk [vmem:[%s5042_s21 + $0x48] sm:$0xf] %vm1972_vm4, %v3968_v26  ;;  %v3966_v55 = vpack.c.bf16 %v1013_v44, %v1013_v44  ;;  %v2760_v17 = vsel %vm2376_vm9, %v1013_v44, 0.0 }
 0x129   : > { %v3969_v11 = vpack.c.bf16 %v4179_v27, %v4179_v27  ;;  %v2763_v18 = vsel %vm2379_vm10, %v4179_v27, 0.0  ;;  %vm2381_vm0 = vcmp.lt.s32.totalorder %v4895_v0, 8192  ;;  %v3292_v24 = vadd.f32 %v3291_v45, %v3290_v25 }
 0x12a   : > { %v2903_v30 = vadd.f32 %v2902_v52, %v2901_v51  ;;  %v2904_v9 = vsel %vm2872_vm7, %v2760_v17, 0.0  ;;  %v5253_v34 = vsel %vm2872_vm7, %v2808_v46, 0.0  ;;  %v2908_v19 = vsel %vm2872_vm7, %v2762_v36, 0.0  ;;  %1989 = vst.msk [vmem:[%s5042_s21 + $0x40] sm:$0xf] %vm1972_vm4, %v3966_v55  ;;  %v5265_v51 = vpop.f32.mrb[9].mxu1 }
 0x12b   : > { %v3152_v56 = vmul.f32 %v2760_v17, %v2760_v17  ;;  %1992 = vst.msk [vmem:[%s5042_s21 + $0x4c] sm:$0xf] %vm1972_vm4, %v3969_v11  ;;  %v3155_v57 = vmul.f32 %v2763_v18, %v2763_v18  ;;  %v3967_v35 = vpack.c.bf16 %v1016_v5, %v1016_v5  ;;  %v3294_v45 = vadd.f32 %v3293_v28, %v3292_v24  ;;  %v5272_v17 = vpop.f32.mrb[10].mxu1 }
 0x12c   : > { %v2905_v26 = vadd.f32 %v2904_v9, %v2903_v30  ;;  %v2761_v52 = vsel %vm2377_vm11, %v1016_v5, 0.0  ;;  %vm2386_vm1 = vcmp.lt.s32.totalorder %v4898_v1, 8192  ;;  %v3200_v44 = vmul.f32 %v2808_v46, %v2808_v46  ;;  %v4182_v5 = vpop.f32.mrb[20].mxu0 }
 0x12d   : > { %v3299_v36 = vsel %vm2872_vm7, %v3154_v53, 0.0  ;;  %v3295_v25 = vsel %vm2872_vm7, %v3152_v56, 0.0  ;;  %1990 = vst.msk [vmem:[%s5042_s21 + $0x44] sm:$0xf] %vm1972_vm4, %v3967_v35  ;;  %v2906_v27 = vsel %vm2872_vm7, %v2761_v52, 0.0  ;;  %v3153_v55 = vmul.f32 %v2761_v52, %v2761_v52  ;;  %v5279_v53 = vpop.f32.mrb[11].mxu1 }
 0x12e   : > { %v3296_v28 = vadd.f32 %v3295_v25, %v3294_v45  ;;  %v2910_v58 = vsel %vm2872_vm7, %v2763_v18, 0.0  ;;  %v2907_v11 = vadd.f32 %v2906_v27, %v2905_v26  ;;  %vm2384_vm2 = vcmp.lt.s32.totalorder %v4901_v2, 8192  ;;  %v1029_v56 = vpop.f32.mrb[21].mxu0 }
 0x12f   : > { %vm2387_vm3 = vcmp.lt.s32.totalorder %v4904_v3, 8192  ;;  %v4017_v46 = vpack.c.bf16 %v5179_v33, %v5179_v33  ;;  %v3301_v24 = vsel %vm2872_vm7, %v3155_v57, 0.0  ;;  %v3297_v30 = vsel %vm2872_vm7, %v3153_v55, 0.0  ;;  %v4183_v52 = vpop.f32.mrb[22].mxu0 }
 0x130   : > { %v3972_v9 = vpack.c.bf16 %v4182_v5, %v4182_v5  ;;  %v2766_v18 = vsel %vm2382_vm12, %v4182_v5, 0.0  ;;  %vm2425_vm5 = vcmp.lt.s32.totalorder %v5100_v6, 8192  ;;  %v2909_v35 = vadd.f32 %v2908_v19, %v2907_v11  ;;  %v1032_v55 = vpop.f32.mrb[23].mxu0 }
 0x131   : > { %v3298_v26 = vadd.f32 %v3297_v30, %v3296_v28  ;;  %v3158_v45 = vmul.f32 %v2766_v18, %v2766_v18  ;;  %v5287_v25 = vsel %vm2872_vm7, %v3200_v44, 0.0  ;;  %2040 = vst.msk [vmem:[%s5042_s21 + $0x10c] sm:$0xf] %vm1972_vm4, %v4017_v46  ;;  %v3970_v57 = vpack.c.bf16 %v1029_v56, %v1029_v56 }
 0x132   : > { %1995 = vst.msk [vmem:[%s5042_s21 + $0x58] sm:$0xf] %vm1972_vm4, %v3972_v9  ;;  %v2764_v59 = vsel %vm2380_vm13, %v1029_v56, 0.0  ;;  %v3973_v27 = vpack.c.bf16 %v4183_v52, %v4183_v52  ;;  %v2767_v19 = vsel %vm2383_vm14, %v4183_v52, 0.0  ;;  %vm2385_vm6 = vcmp.lt.s32.totalorder %v4907_v4, 8192  ;;  %v5307_v9 = vpop.f32.mrb[12].mxu1 }
 0x133   : > { %v3300_v28 = vadd.f32 %v3299_v36, %v3298_v26  ;;  %v2911_v11 = vadd.f32 %v2910_v58, %v2909_v35  ;;  %v2912_v44 = vsel %vm2872_vm7, %v2764_v59, 0.0  ;;  %v2811_v5 = vsel %vm2427_vm15, %v5179_v33, 0.0  ;;  %1993 = vst.msk [vmem:[%s5042_s21 + $0x50] sm:$0xf] %vm1972_vm4, %v3970_v57  ;;  %v5313_v33 = vpop.f32.mrb[13].mxu1 }
 0x134   : > { %v2916_v46 = vsel %vm2872_vm7, %v2766_v18, 0.0  ;;  %v3156_v60 = vmul.f32 %v2764_v59, %v2764_v59  ;;  %1996 = vst.msk [vmem:[%s5042_s21 + $0x5c] sm:$0xf] %vm1972_vm4, %v3973_v27  ;;  %v3159_v63 = vmul.f32 %v2767_v19, %v2767_v19  ;;  %v3971_v30 = vpack.c.bf16 %v1032_v55, %v1032_v55  ;;  %v5320_v57 = vpop.f32.mrb[14].mxu1  ;;  %v4186_v59 = vpop.f32.mrb[24].mxu0 }
 0x135   : > { %v3307_v36 = vsel %vm2872_vm7, %v3158_v45, 0.0  ;;  %v2913_v58 = vadd.f32 %v2912_v44, %v2911_v11  ;;  %v3302_v56 = vadd.f32 %v3301_v24, %v3300_v28  ;;  %v2765_v8 = vsel %vm2381_vm0, %v1032_v55, 0.0 }
 0x136   : > { %vm2390_vm8 = vcmp.lt.s32.totalorder %v4916_v12, 8192  ;;  %v3303_v18 = vsel %vm2872_vm7, %v3156_v60, 0.0  ;;  %v2918_v35 = vsel %vm2872_vm7, %v2767_v19, 0.0  ;;  %1994 = vst.msk [vmem:[%s5042_s21 + $0x54] sm:$0xf] %vm1972_vm4, %v3971_v30  ;;  %v2914_v26 = vsel %vm2872_vm7, %v2765_v8, 0.0 }
 0x137   : > { %v3157_v52 = vmul.f32 %v2765_v8, %v2765_v8  ;;  %v3304_v45 = vadd.f32 %v3303_v18, %v3302_v56  ;;  %v2915_v24 = vadd.f32 %v2914_v26, %v2913_v58  ;;  %vm2388_vm9 = vcmp.lt.s32.totalorder %v4919_v13, 8192  ;;  %v5329_v19 = vpop.f32.mrb[15].mxu1  ;;  %v1045_v60 = vpop.f32.mrb[25].mxu0 }
 0x138   : > { %vm2391_vm10 = vcmp.lt.s32.totalorder %v4928_v21, 8192  ;;  %v5325_v0 = vsel %vm2872_vm7, %v2811_v5, 0.0  ;;  %v4015_v27 = vpack.c.bf16 %v5188_v23, %v5188_v23  ;;  %v3309_v55 = vsel %vm2872_vm7, %v3159_v63, 0.0  ;;  %v4187_v8 = vpop.f32.mrb[26].mxu0 }
 0x139   : > { %v3305_v28 = vsel %vm2872_vm7, %v3157_v52, 0.0  ;;  %v3976_v11 = vpack.c.bf16 %v4186_v59, %v4186_v59  ;;  %v2770_v44 = vsel %vm2386_vm1, %v4186_v59, 0.0  ;;  %v2917_v30 = vadd.f32 %v2916_v46, %v2915_v24  ;;  %v1048_v59 = vpop.f32.mrb[27].mxu0 }
 0x13a   : > { %v3306_v58 = vadd.f32 %v3305_v28, %v3304_v45  ;;  %v3162_v56 = vmul.f32 %v2770_v44, %v2770_v44  ;;  %v3203_v18 = vmul.f32 %v2811_v5, %v2811_v5  ;;  %2038 = vst.msk [vmem:[%s5042_s21 + $0x104] sm:$0xf] %vm1972_vm4, %v4015_v27  ;;  %v3974_v26 = vpack.c.bf16 %v1045_v60, %v1045_v60 }
 0x13b   : > { %1999 = vst.msk [vmem:[%s5042_s21 + $0x68] sm:$0xf] %vm1972_vm4, %v3976_v11  ;;  %v2768_v63 = vsel %vm2384_vm2, %v1045_v60, 0.0  ;;  %v3977_v52 = vpack.c.bf16 %v4187_v8, %v4187_v8  ;;  %v2771_v1 = vsel %vm2387_vm3, %v4187_v8, 0.0  ;;  %vm2389_vm11 = vcmp.lt.s32.totalorder %v4931_v22, 8192  ;;  %v5353_v11 = vpop.f32.mrb[16].mxu1 }
 0x13c   : > { %v3308_v46 = vadd.f32 %v3307_v36, %v3306_v58  ;;  %v2919_v45 = vadd.f32 %v2918_v35, %v2917_v30  ;;  %v2920_v5 = vsel %vm2872_vm7, %v2768_v63, 0.0  ;;  %v2809_v24 = vsel %vm2425_vm5, %v5188_v23, 0.0  ;;  %1997 = vst.msk [vmem:[%s5042_s21 + $0x60] sm:$0xf] %vm1972_vm4, %v3974_v26  ;;  %v5360_v23 = vpop.f32.mrb[17].mxu1 }
 0x13d   : > { %v2924_v27 = vsel %vm2872_vm7, %v2770_v44, 0.0  ;;  %v3160_v2 = vmul.f32 %v2768_v63, %v2768_v63  ;;  %2000 = vst.msk [vmem:[%s5042_s21 + $0x6c] sm:$0xf] %vm1972_vm4, %v3977_v52  ;;  %v3163_v3 = vmul.f32 %v2771_v1, %v2771_v1  ;;  %v3975_v28 = vpack.c.bf16 %v1048_v59, %v1048_v59  ;;  %v5367_v8 = vpop.f32.mrb[18].mxu1  ;;  %v4190_v63 = vpop.f32.mrb[28].mxu0 }
 0x13e   : > { %v3315_v36 = vsel %vm2872_vm7, %v3162_v56, 0.0  ;;  %v2921_v35 = vadd.f32 %v2920_v5, %v2919_v45  ;;  %v3310_v60 = vadd.f32 %v3309_v55, %v3308_v46  ;;  %v2769_v6 = vsel %vm2385_vm6, %v1048_v59, 0.0  ;;  %v1061_v5 = vpop.f32.mrb[29].mxu0 }
 0x13f   : > { %vm2394_vm12 = vcmp.lt.s32.totalorder %v4936_v37, 8192  ;;  %vm2430_vm13 = vcmp.lt.s32.totalorder %v5143_v20, 8192  ;;  %v3311_v44 = vsel %vm2872_vm7, %v3160_v2, 0.0  ;;  %v2926_v30 = vsel %vm2872_vm7, %v2771_v1, 0.0  ;;  %1998 = vst.msk [vmem:[%s5042_s21 + $0x64] sm:$0xf] %vm1972_vm4, %v3975_v28 }
 0x140   : > { %v2922_v58 = vsel %vm2872_vm7, %v2769_v6, 0.0  ;;  %v3161_v56 = vmul.f32 %v2769_v6, %v2769_v6  ;;  %v3312_v55 = vadd.f32 %v3311_v44, %v3310_v60  ;;  %v3317_v4 = vsel %vm2872_vm7, %v3163_v3, 0.0  ;;  %v5375_v1 = vpop.f32.mrb[19].mxu1  ;;  %v4191_v60 = vpop.f32.mrb[30].mxu0 }
 0x141   : > { %v2923_v26 = vadd.f32 %v2922_v58, %v2921_v35  ;;  %vm2392_vm14 = vcmp.lt.s32.totalorder %v4939_v38, 8192  ;;  %vm2395_vm15 = vcmp.lt.s32.totalorder %v4942_v39, 8192  ;;  %v5373_v52 = vsel %vm2872_vm7, %v3203_v18, 0.0 }
 0x142   : > { %v3313_v59 = vsel %vm2872_vm7, %v3161_v56, 0.0  ;;  %v3980_v46 = vpack.c.bf16 %v4190_v63, %v4190_v63  ;;  %v2774_v45 = vsel %vm2390_vm8, %v4190_v63, 0.0  ;;  %v4020_v2 = vpack.c.bf16 %v5214_v32, %v5214_v32  ;;  %v1064_v56 = vpop.f32.mrb[31].mxu0 }
 0x143   : > { %v2925_v3 = vadd.f32 %v2924_v27, %v2923_v26  ;;  %v3314_v28 = vadd.f32 %v3313_v59, %v3312_v55  ;;  %v3166_v35 = vmul.f32 %v2774_v45, %v2774_v45  ;;  %v5383_v18 = vsel %vm2872_vm7, %v2809_v24, 0.0 }
 0x144   : > { %2003 = vst.msk [vmem:[%s5042_s21 + $0x78] sm:$0xf] %vm1972_vm4, %v3980_v46  ;;  %v3978_v6 = vpack.c.bf16 %v1061_v5, %v1061_v5  ;;  %v2772_v12 = vsel %vm2388_vm9, %v1061_v5, 0.0  ;;  %v3981_v44 = vpack.c.bf16 %v4191_v60, %v4191_v60  ;;  %v2775_v58 = vsel %vm2391_vm10, %v4191_v60, 0.0  ;;  %2043 = vst.msk [vmem:[%s5042_s21 + $0x118] sm:$0xf] %vm1972_vm4, %v4020_v2 }
 0x145   : > { %vm2393_vm0 = vcmp.lt.s32.totalorder %v4945_v40, 8192  ;;  %v3316_v27 = vadd.f32 %v3315_v36, %v3314_v28  ;;  %v2927_v55 = vadd.f32 %v2926_v30, %v2925_v3  ;;  %v2928_v26 = vsel %vm2872_vm7, %v2772_v12, 0.0  ;;  %v5401_v5 = vpop.f32.mrb[20].mxu1 }
 0x146   : > { %v3201_v63 = vmul.f32 %v2809_v24, %v2809_v24  ;;  %v2932_v59 = vsel %vm2872_vm7, %v2774_v45, 0.0  ;;  %v3323_v13 = vsel %vm2872_vm7, %v3166_v35, 0.0  ;;  %2001 = vst.msk [vmem:[%s5042_s21 + $0x70] sm:$0xf] %vm1972_vm4, %v3978_v6  ;;  %v3164_v46 = vmul.f32 %v2772_v12, %v2772_v12  ;;  %2004 = vst.msk [vmem:[%s5042_s21 + $0x7c] sm:$0xf] %vm1972_vm4, %v3981_v44 }
 0x147   : > { %v3979_v21 = vpack.c.bf16 %v1064_v56, %v1064_v56  ;;  %v2929_v60 = vadd.f32 %v2928_v26, %v2927_v55  ;;  %v3318_v2 = vadd.f32 %v3317_v4, %v3316_v27  ;;  %v3167_v36 = vmul.f32 %v2775_v58, %v2775_v58  ;;  %v5407_v24 = vpop.f32.mrb[21].mxu1  ;;  %v4194_v12 = vpop.f32.mrb[32].mxu0 }
 0x148   : > { %v2773_v30 = vsel %vm2389_vm11, %v1064_v56, 0.0  ;;  %vm2398_vm1 = vcmp.lt.s32.totalorder %v4949_v41, 8192  ;;  %vm2428_vm2 = vcmp.lt.s32.totalorder %v5149_v61, 8192  ;;  %v3319_v45 = vsel %vm2872_vm7, %v3164_v46, 0.0  ;;  %v5414_v4 = vpop.f32.mrb[22].mxu1  ;;  %v1077_v46 = vpop.f32.mrb[33].mxu0 }
 0x149   : > { %v2934_v3 = vsel %vm2872_vm7, %v2775_v58, 0.0  ;;  %2002 = vst.msk [vmem:[%s5042_s21 + $0x74] sm:$0xf] %vm1972_vm4, %v3979_v21  ;;  %v2930_v28 = vsel %vm2872_vm7, %v2773_v30, 0.0  ;;  %v3165_v35 = vmul.f32 %v2773_v30, %v2773_v30  ;;  %v3320_v6 = vadd.f32 %v3319_v45, %v3318_v2  ;;  %v5423_v56 = vpop.f32.mrb[23].mxu1  ;;  %v4195_v45 = vpop.f32.mrb[34].mxu0 }
 0x14a   : > { %v2931_v22 = vadd.f32 %v2930_v28, %v2929_v60  ;;  %vm2396_vm3 = vcmp.lt.s32.totalorder %v4952_v42, 8192  ;;  %vm2399_vm5 = vcmp.lt.s32.totalorder %v4958_v47, 8192  ;;  %v5419_v44 = vsel %vm2872_vm7, %v3201_v63, 0.0 }
 0x14b   : > { %v4018_v58 = vpack.c.bf16 %v5219_v15, %v5219_v15  ;;  %v3321_v27 = vsel %vm2872_vm7, %v3165_v35, 0.0  ;;  %v3984_v55 = vpack.c.bf16 %v4194_v12, %v4194_v12  ;;  %v2778_v26 = vsel %vm2394_vm12, %v4194_v12, 0.0 }
 0x14c   : > { %v2814_v21 = vsel %vm2430_vm13, %v5214_v32, 0.0  ;;  %v3325_v60 = vsel %vm2872_vm7, %v3167_v36, 0.0  ;;  %v2933_v63 = vadd.f32 %v2932_v59, %v2931_v22  ;;  %v3322_v2 = vadd.f32 %v3321_v27, %v3320_v6  ;;  %v1080_v32 = vpop.f32.mrb[35].mxu0  ;;  %v5450_v27 = vpop.f32.mrb[24].mxu1 }
 0x14d   : > { %v3170_v30 = vmul.f32 %v2778_v26, %v2778_v26  ;;  %2041 = vst.msk [vmem:[%s5042_s21 + $0x110] sm:$0xf] %vm1972_vm4, %v4018_v58  ;;  %2007 = vst.msk [vmem:[%s5042_s21 + $0x88] sm:$0xf] %vm1972_vm4, %v3984_v55  ;;  %v3982_v28 = vpack.c.bf16 %v1077_v46, %v1077_v46  ;;  %v2776_v37 = vsel %vm2392_vm14, %v1077_v46, 0.0  ;;  %v3985_v35 = vpack.c.bf16 %v4195_v45, %v4195_v45 }
 0x14e   : > { %v2779_v20 = vsel %vm2395_vm15, %v4195_v45, 0.0  ;;  %vm2397_vm6 = vcmp.lt.s32.totalorder %v4961_v48, 8192  ;;  %v3324_v59 = vadd.f32 %v3323_v13, %v3322_v2  ;;  %v2935_v36 = vadd.f32 %v2934_v3, %v2933_v63  ;;  %v5455_v63 = vpop.f32.mrb[25].mxu1 }
 0x14f   : > { %v2936_v6 = vsel %vm2872_vm7, %v2776_v37, 0.0  ;;  %v5443_v22 = vsel %vm2872_vm7, %v2814_v21, 0.0  ;;  %v2940_v12 = vsel %vm2872_vm7, %v2778_v26, 0.0  ;;  %2005 = vst.msk [vmem:[%s5042_s21 + $0x80] sm:$0xf] %vm1972_vm4, %v3982_v28  ;;  %v3168_v38 = vmul.f32 %v2776_v37, %v2776_v37  ;;  %6473 = vst [vmem:[#allocation27_spill] sm:$0xff] %v5455_v63 }
 0x150   : > { %2008 = vst.msk [vmem:[%s5042_s21 + $0x8c] sm:$0xf] %vm1972_vm4, %v3985_v35  ;;  %v3171_v39 = vmul.f32 %v2779_v20, %v2779_v20  ;;  %v3983_v58 = vpack.c.bf16 %v1080_v32, %v1080_v32  ;;  %v2937_v55 = vadd.f32 %v2936_v6, %v2935_v36  ;;  %v3326_v13 = vadd.f32 %v3325_v60, %v3324_v59  ;;  %v5462_v37 = vpop.f32.mrb[26].mxu1  ;;  %v6517_v63 = vld [vmem:[#allocation26_spill] sm:$0xff] }
 0x151   : > { %v2777_v3 = vsel %vm2393_vm0, %v1080_v32, 0.0  ;;  %vm2402_vm8 = vcmp.lt.s32.totalorder %v4964_v49, 8192  ;;  %v3206_v46 = vmul.f32 %v2814_v21, %v2814_v21  ;;  %v3331_v26 = vsel %vm2872_vm7, %v3170_v30, 0.0  ;;  %6474 = vst [vmem:[#allocation28_spill] sm:$0xff] %v5462_v37  ;;  %v4198_v21 = vpop.f32.mrb[36].mxu0  ;;  %v6475_v30 = vld [vmem:[#allocation5_spill] sm:$0xff] }
 0x152   : > { %v3327_v2 = vsel %vm2872_vm7, %v3168_v38, 0.0  ;;  %2006 = vst.msk [vmem:[%s5042_s21 + $0x84] sm:$0xf] %vm1972_vm4, %v3983_v58  ;;  %v2938_v45 = vsel %vm2872_vm7, %v2777_v3, 0.0  ;;  %v3169_v28 = vmul.f32 %v2777_v3, %v2777_v3  ;;  %v2942_v40 = vsel %vm2872_vm7, %v2779_v20, 0.0  ;;  %v5468_v59 = vpop.f32.mrb[27].mxu1 }
 0x153   : > { %v3328_v60 = vadd.f32 %v3327_v2, %v3326_v13  ;;  %v3333_v35 = vsel %vm2872_vm7, %v3171_v39, 0.0  ;;  %v2939_v32 = vadd.f32 %v2938_v45, %v2937_v55  ;;  %vm2400_vm9 = vcmp.lt.s32.totalorder %v4967_v50, 8192  ;;  %6476 = vst [vmem:[#allocation5_spill] sm:$0xff] %v5468_v59  ;;  %v1093_v58 = vpop.f32.mrb[37].mxu0  ;;  %v6509_v37 = vld [vmem:[#allocation22_spill] sm:$0xff] }
 0x154   : > { %vm2403_vm10 = vcmp.lt.s32.totalorder %v6475_v30, 8192  ;;  %v3329_v36 = vsel %vm2872_vm7, %v3169_v28, 0.0  ;;  %v3988_v6 = vpack.c.bf16 %v4198_v21, %v4198_v21  ;;  %v2782_v38 = vsel %vm2398_vm1, %v4198_v21, 0.0  ;;  %v4199_v3 = vpop.f32.mrb[38].mxu0 }
 0x155   : > { %v2812_v20 = vsel %vm2428_vm2, %v5219_v15, 0.0  ;;  %vm2431_vm11 = vcmp.lt.s32.totalorder %v5152_v62, 8192  ;;  %v2941_v39 = vadd.f32 %v2940_v12, %v2939_v32  ;;  %v3330_v55 = vadd.f32 %v3329_v36, %v3328_v60  ;;  %v1096_v15 = vpop.f32.mrb[39].mxu0  ;;  %v6477_v12 = vld [vmem:[#allocation6_spill] sm:$0xff] }
 0x156   : > { %v3174_v13 = vmul.f32 %v2782_v38, %v2782_v38  ;;  %v5478_v2 = vsel %vm2872_vm7, %v3206_v46, 0.0  ;;  %2011 = vst.msk [vmem:[%s5042_s21 + $0x98] sm:$0xf] %vm1972_vm4, %v3988_v6  ;;  %v3986_v41 = vpack.c.bf16 %v1093_v58, %v1093_v58  ;;  %v2780_v45 = vsel %vm2396_vm3, %v1093_v58, 0.0  ;;  %v5496_v58 = vpop.f32.mrb[28].mxu1 }
 0x157   : > { %v3989_v28 = vpack.c.bf16 %v4199_v3, %v4199_v3  ;;  %v2783_v61 = vsel %vm2399_vm5, %v4199_v3, 0.0  ;;  %vm2401_vm12 = vcmp.lt.s32.totalorder %v6477_v12, 8192  ;;  %v3332_v60 = vadd.f32 %v3331_v26, %v3330_v55  ;;  %6478 = vst [vmem:[#allocation6_spill] sm:$0xff] %v5496_v58  ;;  %v5501_v59 = vpop.f32.mrb[29].mxu1  ;;  %v6490_v12 = vld [vmem:[#allocation12_spill] sm:$0xff] }
 0x158   : > { %v2943_v32 = vadd.f32 %v2942_v40, %v2941_v39  ;;  %v2944_v21 = vsel %vm2872_vm7, %v2780_v45, 0.0  ;;  %v5489_v46 = vsel %vm2872_vm7, %v2812_v20, 0.0  ;;  %v2948_v36 = vsel %vm2872_vm7, %v2782_v38, 0.0  ;;  %2009 = vst.msk [vmem:[%s5042_s21 + $0x90] sm:$0xf] %vm1972_vm4, %v3986_v41  ;;  %v6479_v39 = vld [vmem:[#allocation7_spill] sm:$0xff] }
 0x159   : > { %v3172_v42 = vmul.f32 %v2780_v45, %v2780_v45  ;;  %2012 = vst.msk [vmem:[%s5042_s21 + $0x9c] sm:$0xf] %vm1972_vm4, %v3989_v28  ;;  %v3175_v47 = vmul.f32 %v2783_v61, %v2783_v61  ;;  %v3987_v6 = vpack.c.bf16 %v1096_v15, %v1096_v15  ;;  %v3334_v26 = vadd.f32 %v3333_v35, %v3332_v60  ;;  %v5508_v58 = vpop.f32.mrb[30].mxu1  ;;  %v4202_v60 = vpop.f32.mrb[40].mxu0 }
 0x15a   : > { %v2945_v3 = vadd.f32 %v2944_v21, %v2943_v32  ;;  %v2781_v40 = vsel %vm2397_vm6, %v1096_v15, 0.0  ;;  %vm2406_vm13 = vcmp.lt.s32.totalorder %v6479_v39, 8192  ;;  %v3204_v55 = vmul.f32 %v2812_v20, %v2812_v20  ;;  %6480 = vst [vmem:[#allocation7_spill] sm:$0xff] %v5501_v59  ;;  %6481 = vst [vmem:[#allocation29_spill] sm:$0xff] %v5508_v58  ;;  %v6482_v20 = vld [vmem:[#allocation8_spill] sm:$0xff]  ;;  %v6483_v32 = vld [vmem:[#allocation9_spill] sm:$0xff] }
 0x15b   : > { %v3339_v38 = vsel %vm2872_vm7, %v3174_v13, 0.0  ;;  %v3335_v41 = vsel %vm2872_vm7, %v3172_v42, 0.0  ;;  %2010 = vst.msk [vmem:[%s5042_s21 + $0x94] sm:$0xf] %vm1972_vm4, %v3987_v6  ;;  %v2946_v45 = vsel %vm2872_vm7, %v2781_v40, 0.0  ;;  %v3173_v28 = vmul.f32 %v2781_v40, %v2781_v40  ;;  %v5515_v21 = vpop.f32.mrb[31].mxu1 }
 0x15c   : > { %v3336_v35 = vadd.f32 %v3335_v41, %v3334_v26  ;;  %v2950_v48 = vsel %vm2872_vm7, %v2783_v61, 0.0  ;;  %v2947_v15 = vadd.f32 %v2946_v45, %v2945_v3  ;;  %vm2404_vm14 = vcmp.lt.s32.totalorder %v6482_v20, 8192  ;;  %6484 = vst [vmem:[#allocation8_spill] sm:$0xff] %v5515_v21  ;;  %v1109_v3 = vpop.f32.mrb[41].mxu0 }
 0x15d   : > { %vm2407_vm15 = vcmp.lt.s32.totalorder %v6483_v32, 8192  ;;  %v4021_v13 = vpack.c.bf16 %v5226_v43, %v5226_v43  ;;  %v3341_v42 = vsel %vm2872_vm7, %v3175_v47, 0.0  ;;  %v3337_v6 = vsel %vm2872_vm7, %v3173_v28, 0.0  ;;  %v4203_v58 = vpop.f32.mrb[42].mxu0 }
 0x15e   : > { %v3992_v26 = vpack.c.bf16 %v4202_v60, %v4202_v60  ;;  %v2786_v61 = vsel %vm2402_vm8, %v4202_v60, 0.0  ;;  %v2949_v40 = vadd.f32 %v2948_v36, %v2947_v15  ;;  %v3338_v41 = vadd.f32 %v3337_v6, %v3336_v35  ;;  %v1112_v35 = vpop.f32.mrb[43].mxu0  ;;  %v6485_v15 = vld [vmem:[#allocation10_spill] sm:$0xff] }
 0x15f   : > { %v3178_v45 = vmul.f32 %v2786_v61, %v2786_v61  ;;  %v5522_v59 = vsel %vm2872_vm7, %v3204_v55, 0.0  ;;  %2044 = vst.msk [vmem:[%s5042_s21 + $0x11c] sm:$0xf] %vm1972_vm4, %v4021_v13  ;;  %v3990_v47 = vpack.c.bf16 %v1109_v3, %v1109_v3  ;;  %v2784_v28 = vsel %vm2400_vm9, %v1109_v3, 0.0  ;;  %v5542_v3 = vpop.f32.mrb[32].mxu1 }
 0x160   : > { %2015 = vst.msk [vmem:[%s5042_s21 + $0xa8] sm:$0xf] %vm1972_vm4, %v3992_v26  ;;  %v3993_v49 = vpack.c.bf16 %v4203_v58, %v4203_v58  ;;  %v2787_v36 = vsel %vm2403_vm10, %v4203_v58, 0.0  ;;  %vm2405_vm0 = vcmp.lt.s32.totalorder %v6485_v15, 8192  ;;  %v3340_v60 = vadd.f32 %v3339_v38, %v3338_v41  ;;  %6486 = vst [vmem:[#allocation9_spill] sm:$0xff] %v5542_v3  ;;  %v5548_v41 = vpop.f32.mrb[33].mxu1 }
 0x161   : > { %v2951_v6 = vadd.f32 %v2950_v48, %v2949_v40  ;;  %v2952_v55 = vsel %vm2872_vm7, %v2784_v28, 0.0  ;;  %v2815_v13 = vsel %vm2431_vm11, %v5226_v43, 0.0  ;;  %v2956_v26 = vsel %vm2872_vm7, %v2786_v61, 0.0  ;;  %2013 = vst.msk [vmem:[%s5042_s21 + $0xa0] sm:$0xf] %vm1972_vm4, %v3990_v47  ;;  %v6487_v43 = vld [vmem:[#allocation11_spill] sm:$0xff] }
 0x162   : > { %v3176_v50 = vmul.f32 %v2784_v28, %v2784_v28  ;;  %2016 = vst.msk [vmem:[%s5042_s21 + $0xac] sm:$0xf] %vm1972_vm4, %v3993_v49  ;;  %v3179_v30 = vmul.f32 %v2787_v36, %v2787_v36  ;;  %v3991_v58 = vpack.c.bf16 %v1112_v35, %v1112_v35  ;;  %v3347_v38 = vsel %vm2872_vm7, %v3178_v45, 0.0  ;;  %6488 = vst [vmem:[#allocation10_spill] sm:$0xff] %v5548_v41  ;;  %v5555_v3 = vpop.f32.mrb[34].mxu1  ;;  %v6498_v15 = vld [vmem:[#allocation16_spill] sm:$0xff] }
 0x163   : > { %v2953_v48 = vadd.f32 %v2952_v55, %v2951_v6  ;;  %v3342_v40 = vadd.f32 %v3341_v42, %v3340_v60  ;;  %v2785_v62 = vsel %vm2401_vm12, %v1112_v35, 0.0  ;;  %vm2410_vm1 = vcmp.lt.s32.totalorder %v6487_v43, 8192  ;;  %6489 = vst [vmem:[#allocation11_spill] sm:$0xff] %v5555_v3  ;;  %v4206_v60 = vpop.f32.mrb[44].mxu0  ;;  %v6491_v35 = vld [vmem:[#allocation13_spill] sm:$0xff]  ;;  %v5564_v55 = vpop.f32.mrb[35].mxu1 }
 0x164   : > { %v3343_v61 = vsel %vm2872_vm7, %v3176_v50, 0.0  ;;  %v2958_v47 = vsel %vm2872_vm7, %v2787_v36, 0.0  ;;  %2014 = vst.msk [vmem:[%s5042_s21 + $0xa4] sm:$0xf] %vm1972_vm4, %v3991_v58  ;;  %v2954_v28 = vsel %vm2872_vm7, %v2785_v62, 0.0  ;;  %v3177_v49 = vmul.f32 %v2785_v62, %v2785_v62  ;;  %6492 = vst [vmem:[#allocation12_spill] sm:$0xff] %v5564_v55 }
 0x165   : > { %v3344_v45 = vadd.f32 %v3343_v61, %v3342_v40  ;;  %v2955_v42 = vadd.f32 %v2954_v28, %v2953_v48  ;;  %vm2408_vm2 = vcmp.lt.s32.totalorder %v6490_v12, 8192  ;;  %vm2411_vm3 = vcmp.lt.s32.totalorder %v6491_v35, 8192  ;;  %v1125_v62 = vpop.f32.mrb[45].mxu0 }
 0x166   : > { %v5560_v6 = vsel %vm2872_vm7, %v2815_v13, 0.0  ;;  %v4019_v36 = vpack.c.bf16 %v5232_v31, %v5232_v31  ;;  %v3349_v50 = vsel %vm2872_vm7, %v3179_v30, 0.0  ;;  %v3345_v58 = vsel %vm2872_vm7, %v3177_v49, 0.0  ;;  %v4207_v41 = vpop.f32.mrb[46].mxu0 }
 0x167   : > { %v3996_v48 = vpack.c.bf16 %v4206_v60, %v4206_v60  ;;  %v2790_v40 = vsel %vm2406_vm13, %v4206_v60, 0.0  ;;  %v2957_v61 = vadd.f32 %v2956_v26, %v2955_v42  ;;  %v3346_v28 = vadd.f32 %v3345_v58, %v3344_v45  ;;  %v1128_v60 = vpop.f32.mrb[47].mxu0  ;;  %v6493_v26 = vld [vmem:[#allocation14_spill] sm:$0xff] }
 0x168   : > { %v3182_v3 = vmul.f32 %v2790_v40, %v2790_v40  ;;  %v3207_v21 = vmul.f32 %v2815_v13, %v2815_v13  ;;  %2042 = vst.msk [vmem:[%s5042_s21 + $0x114] sm:$0xf] %vm1972_vm4, %v4019_v36  ;;  %v3994_v55 = vpack.c.bf16 %v1125_v62, %v1125_v62  ;;  %v2788_v30 = vsel %vm2404_vm14, %v1125_v62, 0.0 }
 0x169   : > { %2019 = vst.msk [vmem:[%s5042_s21 + $0xb8] sm:$0xf] %vm1972_vm4, %v3996_v48  ;;  %v3997_v49 = vpack.c.bf16 %v4207_v41, %v4207_v41  ;;  %v2791_v39 = vsel %vm2407_vm15, %v4207_v41, 0.0  ;;  %vm2409_vm5 = vcmp.lt.s32.totalorder %v6493_v26, 8192  ;;  %v3348_v45 = vadd.f32 %v3347_v38, %v3346_v28  ;;  %v5588_v41 = vpop.f32.mrb[36].mxu1 }
 0x16a   : > { %v2959_v42 = vadd.f32 %v2958_v47, %v2957_v61  ;;  %v2960_v13 = vsel %vm2872_vm7, %v2788_v30, 0.0  ;;  %v2301_v36 = vadd.s32 %v4796_v14, %v5135_v29  ;;  %v2964_v58 = vsel %vm2872_vm7, %v2790_v40, 0.0  ;;  %2017 = vst.msk [vmem:[%s5042_s21 + $0xb0] sm:$0xf] %vm1972_vm4, %v3994_v55  ;;  %6494 = vst [vmem:[#allocation13_spill] sm:$0xff] %v5588_v41  ;;  %v6495_v29 = vld [vmem:[#allocation15_spill] sm:$0xff] }
 0x16b   : > { %v3355_v20 = vsel %vm2872_vm7, %v3182_v3, 0.0  ;;  %v3180_v48 = vmul.f32 %v2788_v30, %v2788_v30  ;;  %2020 = vst.msk [vmem:[%s5042_s21 + $0xbc] sm:$0xf] %vm1972_vm4, %v3997_v49  ;;  %v3995_v32 = vpack.c.bf16 %v1128_v60, %v1128_v60  ;;  %v3350_v47 = vadd.f32 %v3349_v50, %v3348_v45  ;;  %v5593_v28 = vpop.f32.mrb[37].mxu1 }
 0x16c   : > { %v2961_v38 = vadd.f32 %v2960_v13, %v2959_v42  ;;  %v3183_v62 = vmul.f32 %v2791_v39, %v2791_v39  ;;  %v2789_v61 = vsel %vm2405_vm0, %v1128_v60, 0.0  ;;  %vm2414_vm6 = vcmp.lt.s32.totalorder %v6495_v29, 8192  ;;  %6496 = vst [vmem:[#allocation14_spill] sm:$0xff] %v5593_v28  ;;  %v5600_v49 = vpop.f32.mrb[38].mxu1  ;;  %v4210_v42 = vpop.f32.mrb[48].mxu0  ;;  %v6499_v60 = vld [vmem:[#allocation17_spill] sm:$0xff] }
 0x16d   : > { %v3351_v3 = vsel %vm2872_vm7, %v3180_v48, 0.0  ;;  %v2966_v55 = vsel %vm2872_vm7, %v2791_v39, 0.0  ;;  %2018 = vst.msk [vmem:[%s5042_s21 + $0xb4] sm:$0xf] %vm1972_vm4, %v3995_v32  ;;  %v2962_v40 = vsel %vm2872_vm7, %v2789_v61, 0.0  ;;  %v3181_v30 = vmul.f32 %v2789_v61, %v2789_v61  ;;  %6497 = vst [vmem:[#allocation15_spill] sm:$0xff] %v5600_v49 }
 0x16e   : > { %v3352_v50 = vadd.f32 %v3351_v3, %v3350_v47  ;;  %v2963_v45 = vadd.f32 %v2962_v40, %v2961_v38  ;;  %vm2412_vm8 = vcmp.lt.s32.totalorder %v6498_v15, 8192  ;;  %vm2415_vm9 = vcmp.lt.s32.totalorder %v6499_v60, 8192  ;;  %v5609_v48 = vpop.f32.mrb[39].mxu1  ;;  %v1141_v47 = vpop.f32.mrb[49].mxu0 }
 0x16f   : > { %v5605_v13 = vsel %vm2872_vm7, %v3207_v21, 0.0  ;;  %v4024_v39 = vpack.c.bf16 %v5260_v16, %v5260_v16  ;;  %6500 = vst [vmem:[#allocation16_spill] sm:$0xff] %v5609_v48  ;;  %v3353_v32 = vsel %vm2872_vm7, %v3181_v30, 0.0  ;;  %v4000_v61 = vpack.c.bf16 %v4210_v42, %v4210_v42  ;;  %v4211_v28 = vpop.f32.mrb[50].mxu0 }
 0x170   : > { %v2794_v38 = vsel %vm2410_vm1, %v4210_v42, 0.0  ;;  %vm2429_vm10 = vcmp.lt.s32.totalorder %v2301_v36, 8192  ;;  %v3357_v3 = vsel %vm2872_vm7, %v3183_v62, 0.0  ;;  %v2965_v40 = vadd.f32 %v2964_v58, %v2963_v45  ;;  %v1144_v41 = vpop.f32.mrb[51].mxu0  ;;  %v6501_v62 = vld [vmem:[#allocation18_spill] sm:$0xff] }
 0x171   : > { %v3354_v49 = vadd.f32 %v3353_v32, %v3352_v50  ;;  %v3186_v21 = vmul.f32 %v2794_v38, %v2794_v38  ;;  %2047 = vst.msk [vmem:[%s5042_s21 + $0x128] sm:$0xf] %vm1972_vm4, %v4024_v39  ;;  %2023 = vst.msk [vmem:[%s5042_s21 + $0xc8] sm:$0xf] %vm1972_vm4, %v4000_v61  ;;  %v3998_v48 = vpack.c.bf16 %v1141_v47, %v1141_v47  ;;  %v2792_v30 = vsel %vm2408_vm2, %v1141_v47, 0.0  ;;  %v5632_v61 = vpop.f32.mrb[40].mxu1 }
 0x172   : > { %v4001_v43 = vpack.c.bf16 %v4211_v28, %v4211_v28  ;;  %v2795_v42 = vsel %vm2411_vm3, %v4211_v28, 0.0  ;;  %vm2413_vm11 = vcmp.lt.s32.totalorder %v6501_v62, 8192  ;;  %v2967_v50 = vadd.f32 %v2966_v55, %v2965_v40  ;;  %6502 = vst [vmem:[#allocation17_spill] sm:$0xff] %v5632_v61  ;;  %v5638_v47 = vpop.f32.mrb[41].mxu1 }
 0x173   : > { %v3356_v58 = vadd.f32 %v3355_v20, %v3354_v49  ;;  %v2968_v45 = vsel %vm2872_vm7, %v2792_v30, 0.0  ;;  %v2813_v39 = vsel %vm2429_vm10, %v5232_v31, 0.0  ;;  %v2972_v32 = vsel %vm2872_vm7, %v2794_v38, 0.0  ;;  %2021 = vst.msk [vmem:[%s5042_s21 + $0xc0] sm:$0xf] %vm1972_vm4, %v3998_v48  ;;  %v6503_v31 = vld [vmem:[#allocation19_spill] sm:$0xff] }
 0x174   : > { %v3184_v12 = vmul.f32 %v2792_v30, %v2792_v30  ;;  %2024 = vst.msk [vmem:[%s5042_s21 + $0xcc] sm:$0xf] %vm1972_vm4, %v4001_v43  ;;  %v3187_v35 = vmul.f32 %v2795_v42, %v2795_v42  ;;  %v3999_v28 = vpack.c.bf16 %v1144_v41, %v1144_v41  ;;  %v3363_v20 = vsel %vm2872_vm7, %v3186_v21, 0.0  ;;  %6504 = vst [vmem:[#allocation18_spill] sm:$0xff] %v5638_v47  ;;  %v5645_v43 = vpop.f32.mrb[42].mxu1 }
 0x175   : > { %v2969_v55 = vadd.f32 %v2968_v45, %v2967_v50  ;;  %v3358_v49 = vadd.f32 %v3357_v3, %v3356_v58  ;;  %v2793_v36 = vsel %vm2409_vm5, %v1144_v41, 0.0  ;;  %vm2418_vm12 = vcmp.lt.s32.totalorder %v6503_v31, 8192  ;;  %6505 = vst [vmem:[#allocation19_spill] sm:$0xff] %v5645_v43  ;;  %v4214_v41 = vpop.f32.mrb[52].mxu0  ;;  %v6506_v58 = vld [vmem:[#allocation20_spill] sm:$0xff]  ;;  %v6507_v50 = vld [vmem:[#allocation21_spill] sm:$0xff] }
 0x176   : > { %v3359_v48 = vsel %vm2872_vm7, %v3184_v12, 0.0  ;;  %v2974_v38 = vsel %vm2872_vm7, %v2795_v42, 0.0  ;;  %2022 = vst.msk [vmem:[%s5042_s21 + $0xc4] sm:$0xf] %vm1972_vm4, %v3999_v28  ;;  %v2970_v40 = vsel %vm2872_vm7, %v2793_v36, 0.0  ;;  %v3185_v30 = vmul.f32 %v2793_v36, %v2793_v36  ;;  %v5653_v42 = vpop.f32.mrb[43].mxu1 }
 0x177   : > { %v3360_v21 = vadd.f32 %v3359_v48, %v3358_v49  ;;  %v3365_v3 = vsel %vm2872_vm7, %v3187_v35, 0.0  ;;  %v2971_v26 = vadd.f32 %v2970_v40, %v2969_v55  ;;  %vm2416_vm13 = vcmp.lt.s32.totalorder %v6506_v58, 8192  ;;  %6508 = vst [vmem:[#allocation20_spill] sm:$0xff] %v5653_v42  ;;  %v1157_v35 = vpop.f32.mrb[53].mxu0 }
 0x178   : > { %vm2419_vm14 = vcmp.lt.s32.totalorder %v6507_v50, 8192  ;;  %v5651_v45 = vsel %vm2872_vm7, %v2813_v39, 0.0  ;;  %v3361_v12 = vsel %vm2872_vm7, %v3185_v30, 0.0  ;;  %v4004_v28 = vpack.c.bf16 %v4214_v41, %v4214_v41  ;;  %v4215_v43 = vpop.f32.mrb[54].mxu0 }
 0x179   : > { %v2798_v49 = vsel %vm2414_vm6, %v4214_v41, 0.0  ;;  %v4022_v55 = vpack.c.bf16 %v5265_v51, %v5265_v51  ;;  %v2973_v36 = vadd.f32 %v2972_v32, %v2971_v26  ;;  %v3362_v48 = vadd.f32 %v3361_v12, %v3360_v21  ;;  %v1160_v61 = vpop.f32.mrb[55].mxu0 }
 0x17a   : > { %v3190_v40 = vmul.f32 %v2798_v49, %v2798_v49  ;;  %v3205_v47 = vmul.f32 %v2813_v39, %v2813_v39  ;;  %2027 = vst.msk [vmem:[%s5042_s21 + $0xd8] sm:$0xf] %vm1972_vm4, %v4004_v28  ;;  %v4002_v42 = vpack.c.bf16 %v1157_v35, %v1157_v35  ;;  %v2796_v30 = vsel %vm2412_vm8, %v1157_v35, 0.0  ;;  %v5676_v28 = vpop.f32.mrb[44].mxu1 }
 0x17b   : > { %v4005_v29 = vpack.c.bf16 %v4215_v43, %v4215_v43  ;;  %v2799_v41 = vsel %vm2415_vm9, %v4215_v43, 0.0  ;;  %vm2417_vm15 = vcmp.lt.s32.totalorder %v6509_v37, 8192  ;;  %2045 = vst.msk [vmem:[%s5042_s21 + $0x120] sm:$0xf] %vm1972_vm4, %v4022_v55  ;;  %v3364_v32 = vadd.f32 %v3363_v20, %v3362_v48  ;;  %6510 = vst [vmem:[#allocation21_spill] sm:$0xff] %v5676_v28  ;;  %v5682_v48 = vpop.f32.mrb[45].mxu1 }
 0x17c   : > { %v2975_v21 = vadd.f32 %v2974_v38, %v2973_v36  ;;  %v2976_v39 = vsel %vm2872_vm7, %v2796_v30, 0.0  ;;  %v2176_v26 = vadd.s32 592, %v4790_v10  ;;  %v2980_v12 = vsel %vm2872_vm7, %v2798_v49, 0.0  ;;  %2025 = vst.msk [vmem:[%s5042_s21 + $0xd0] sm:$0xf] %vm1972_vm4, %v4002_v42  ;;  %v6511_v36 = vld [vmem:[#allocation23_spill] sm:$0xff] }
 0x17d   : > { %v3188_v15 = vmul.f32 %v2796_v30, %v2796_v30  ;;  %2028 = vst.msk [vmem:[%s5042_s21 + $0xdc] sm:$0xf] %vm1972_vm4, %v4005_v29  ;;  %v3191_v60 = vmul.f32 %v2799_v41, %v2799_v41  ;;  %v4003_v43 = vpack.c.bf16 %v1160_v61, %v1160_v61  ;;  %v3371_v35 = vsel %vm2872_vm7, %v3190_v40, 0.0  ;;  %6512 = vst [vmem:[#allocation22_spill] sm:$0xff] %v5682_v48  ;;  %v5689_v28 = vpop.f32.mrb[46].mxu1 }
 0x17e   : > { %v2977_v20 = vadd.f32 %v2976_v39, %v2975_v21  ;;  %v3366_v38 = vadd.f32 %v3365_v3, %v3364_v32  ;;  %v2797_v55 = vsel %vm2413_vm11, %v1160_v61, 0.0  ;;  %vm2422_vm0 = vcmp.lt.s32.totalorder %v6511_v36, 8192  ;;  %6513 = vst [vmem:[#allocation23_spill] sm:$0xff] %v5689_v28  ;;  %v4218_v61 = vpop.f32.mrb[56].mxu0  ;;  %v6514_v32 = vld [vmem:[#allocation24_spill] sm:$0xff]  ;;  %v6515_v21 = vld [vmem:[#allocation25_spill] sm:$0xff] }
 0x17f   : > { %v3367_v42 = vsel %vm2872_vm7, %v3188_v15, 0.0  ;;  %v2982_v49 = vsel %vm2872_vm7, %v2799_v41, 0.0  ;;  %2026 = vst.msk [vmem:[%s5042_s21 + $0xd4] sm:$0xf] %vm1972_vm4, %v4003_v43  ;;  %v2978_v30 = vsel %vm2872_vm7, %v2797_v55, 0.0  ;;  %v3189_v29 = vmul.f32 %v2797_v55, %v2797_v55  ;;  %v5697_v41 = vpop.f32.mrb[47].mxu1 }
 0x180   : > { %v3368_v40 = vadd.f32 %v3367_v42, %v3366_v38  ;;  %v3373_v3 = vsel %vm2872_vm7, %v3191_v60, 0.0  ;;  %v2979_v62 = vadd.f32 %v2978_v30, %v2977_v20  ;;  %vm2420_vm1 = vcmp.lt.s32.totalorder %v6514_v32, 8192  ;;  %6516 = vst [vmem:[#allocation24_spill] sm:$0xff] %v5697_v41  ;;  %v1173_v60 = vpop.f32.mrb[57].mxu0 }
 0x181   : > { %vm2423_vm2 = vcmp.lt.s32.totalorder %v6515_v21, 8192  ;;  %v5695_v39 = vsel %vm2872_vm7, %v3205_v47, 0.0  ;;  %v3369_v15 = vsel %vm2872_vm7, %v3189_v29, 0.0  ;;  %v4008_v43 = vpack.c.bf16 %v4218_v61, %v4218_v61  ;;  %v4219_v28 = vpop.f32.mrb[58].mxu0 }
 0x182   : > { %v2802_v38 = vsel %vm2418_vm12, %v4218_v61, 0.0  ;;  %v4025_v20 = vpack.c.bf16 %v5272_v17, %v5272_v17  ;;  %v2981_v55 = vadd.f32 %v2980_v12, %v2979_v62  ;;  %v3370_v42 = vadd.f32 %v3369_v15, %v3368_v40  ;;  %v1176_v48 = vpop.f32.mrb[59].mxu0 }
 0x183   : > { %v3194_v30 = vmul.f32 %v2802_v38, %v2802_v38  ;;  %v2306_v47 = vadd.s32 %v4796_v14, %v2176_v26  ;;  %2031 = vst.msk [vmem:[%s5042_s21 + $0xe8] sm:$0xf] %vm1972_vm4, %v4008_v43  ;;  %v4006_v29 = vpack.c.bf16 %v1173_v60, %v1173_v60  ;;  %v2800_v31 = vsel %vm2416_vm13, %v1173_v60, 0.0  ;;  %v5721_v43 = vpop.f32.mrb[48].mxu1 }
 0x184   : > { %v4009_v41 = vpack.c.bf16 %v4219_v28, %v4219_v28  ;;  %v2803_v61 = vsel %vm2419_vm14, %v4219_v28, 0.0  ;;  %vm2421_vm3 = vcmp.lt.s32.totalorder %v6517_v63, 8192  ;;  %2048 = vst.msk [vmem:[%s5042_s21 + $0x12c] sm:$0xf] %vm1972_vm4, %v4025_v20  ;;  %v3372_v12 = vadd.f32 %v3371_v35, %v3370_v42 }
 0x185   : > { %v2983_v40 = vadd.f32 %v2982_v49, %v2981_v55  ;;  %v2984_v26 = vsel %vm2872_vm7, %v2800_v31, 0.0  ;;  %v2174_v62 = vadd.s32 576, %v4790_v10  ;;  %v2988_v15 = vsel %vm2872_vm7, %v2802_v38, 0.0  ;;  %2029 = vst.msk [vmem:[%s5042_s21 + $0xe0] sm:$0xf] %vm1972_vm4, %v4006_v29  ;;  %v5725_v49 = vpop.f32.mrb[49].mxu1 }
 0x186   : > { %v3192_v58 = vmul.f32 %v2800_v31, %v2800_v31  ;;  %2032 = vst.msk [vmem:[%s5042_s21 + $0xec] sm:$0xf] %vm1972_vm4, %v4009_v41  ;;  %v3195_v50 = vmul.f32 %v2803_v61, %v2803_v61  ;;  %v4007_v28 = vpack.c.bf16 %v1176_v48, %v1176_v48  ;;  %v3374_v20 = vadd.f32 %v3373_v3, %v3372_v12  ;;  %v5732_v29 = vpop.f32.mrb[50].mxu1  ;;  %v4222_v12 = vpop.f32.mrb[60].mxu0 }
 0x187   : > { %v2985_v60 = vadd.f32 %v2984_v26, %v2983_v40  ;;  %v2801_v35 = vsel %vm2417_vm15, %v1176_v48, 0.0  ;;  %vm2434_vm5 = vcmp.lt.s32.totalorder %v2306_v47, 8192  ;;  %v3379_v55 = vsel %vm2872_vm7, %v3194_v30, 0.0  ;;  %v5736_v40 = vpop.f32.mrb[51].mxu1 }
 0x188   : > { %v3375_v38 = vsel %vm2872_vm7, %v3192_v58, 0.0  ;;  %2030 = vst.msk [vmem:[%s5042_s21 + $0xe4] sm:$0xf] %vm1972_vm4, %v4007_v28  ;;  %v2986_v41 = vsel %vm2872_vm7, %v2801_v35, 0.0  ;;  %v3193_v42 = vmul.f32 %v2801_v35, %v2801_v35  ;;  %v2990_v3 = vsel %vm2872_vm7, %v2803_v61, 0.0  ;;  %v1189_v28 = vpop.f32.mrb[61].mxu0 }
 0x189   : > { %v3376_v31 = vadd.f32 %v3375_v38, %v3374_v20  ;;  %v3381_v37 = vsel %vm2872_vm7, %v3195_v50, 0.0  ;;  %v2987_v48 = vadd.f32 %v2986_v41, %v2985_v60  ;;  %v4012_v26 = vpack.c.bf16 %v4222_v12, %v4222_v12  ;;  %v4223_v50 = vpop.f32.mrb[62].mxu0  ;;  %v5759_v21 = vpop.f32.mrb[52].mxu1 }
 0x18a   : > { %v3377_v30 = vsel %vm2872_vm7, %v3193_v42, 0.0  ;;  %v2806_v58 = vsel %vm2422_vm0, %v4222_v12, 0.0  ;;  %v2818_v35 = vsel %vm2434_vm5, %v5260_v16, 0.0  ;;  %v2304_v60 = vadd.s32 %v4796_v14, %v2174_v62  ;;  %v1192_v47 = vpop.f32.mrb[63].mxu0 }
 0x18b   : > { %v2989_v20 = vadd.f32 %v2988_v15, %v2987_v48  ;;  %v3378_v38 = vadd.f32 %v3377_v30, %v3376_v31  ;;  %v3198_v61 = vmul.f32 %v2806_v58, %v2806_v58  ;;  %2035 = vst.msk [vmem:[%s5042_s21 + $0xf8] sm:$0xf] %vm1972_vm4, %v4012_v26  ;;  %v4010_v41 = vpack.c.bf16 %v1189_v28, %v1189_v28 }
 0x18c   : > { %v2804_v42 = vsel %vm2420_vm1, %v1189_v28, 0.0  ;;  %v4013_v36 = vpack.c.bf16 %v4223_v50, %v4223_v50  ;;  %v2807_v12 = vsel %vm2423_vm2, %v4223_v50, 0.0  ;;  %v5752_v48 = vsel %vm2872_vm7, %v2818_v35, 0.0 }
 0x18d   : > { %v3380_v16 = vadd.f32 %v3379_v55, %v3378_v38  ;;  %v2991_v15 = vadd.f32 %v2990_v3, %v2989_v20  ;;  %v2992_v31 = vsel %vm2872_vm7, %v2804_v42, 0.0  ;;  %v2996_v62 = vsel %vm2872_vm7, %v2806_v58, 0.0  ;;  %2033 = vst.msk [vmem:[%s5042_s21 + $0xf0] sm:$0xf] %vm1972_vm4, %v4010_v41  ;;  %v5763_v38 = vpop.f32.mrb[53].mxu1 }
 0x18e   : > { %v3196_v30 = vmul.f32 %v2804_v42, %v2804_v42  ;;  %2036 = vst.msk [vmem:[%s5042_s21 + $0xfc] sm:$0xf] %vm1972_vm4, %v4013_v36  ;;  %v3199_v32 = vmul.f32 %v2807_v12, %v2807_v12  ;;  %v4011_v26 = vpack.c.bf16 %v1192_v47, %v1192_v47  ;;  %v2805_v3 = vsel %vm2421_vm3, %v1192_v47, 0.0  ;;  %v5770_v36 = vpop.f32.mrb[54].mxu1 }
 0x18f   : > { %v2993_v28 = vadd.f32 %v2992_v31, %v2991_v15  ;;  %v3382_v55 = vadd.f32 %v3381_v37, %v3380_v16  ;;  %v3210_v20 = vmul.f32 %v2818_v35, %v2818_v35  ;;  %v3387_v50 = vsel %vm2872_vm7, %v3198_v61, 0.0  ;;  %v5773_v35 = vpop.f32.mrb[55].mxu1 }
 0x190   : > { %v3383_v58 = vsel %vm2872_vm7, %v3196_v30, 0.0  ;;  %2034 = vst.msk [vmem:[%s5042_s21 + $0xf4] sm:$0xf] %vm1972_vm4, %v4011_v26  ;;  %v2994_v41 = vsel %vm2872_vm7, %v2805_v3, 0.0  ;;  %v3197_v42 = vmul.f32 %v2805_v3, %v2805_v3  ;;  %v2998_v37 = vsel %vm2872_vm7, %v2807_v12, 0.0 }
 0x191   : > { %v3384_v15 = vadd.f32 %v3383_v58, %v3382_v55  ;;  %v2995_v63 = vadd.f32 %v2994_v41, %v2993_v28  ;;  %vm2432_vm6 = vcmp.lt.s32.totalorder %v2304_v60, 8192  ;;  %v2177_v16 = vadd.s32 600, %v4790_v10 }
 0x192   : > { %v3385_v47 = vsel %vm2872_vm7, %v3197_v42, 0.0  ;;  %v2816_v61 = vsel %vm2432_vm6, %v5265_v51, 0.0  ;;  %v4023_v31 = vpack.c.bf16 %v5279_v53, %v5279_v53  ;;  %v3389_v30 = vsel %vm2872_vm7, %v3199_v32, 0.0 }
 0x193   : > { %v2997_v26 = vadd.f32 %v2996_v62, %v2995_v63  ;;  %v3386_v55 = vadd.f32 %v3385_v47, %v3384_v15  ;;  %v5782_v12 = vsel %vm2872_vm7, %v3210_v20, 0.0  ;;  %v2307_v60 = vadd.s32 %v4796_v14, %v2177_v16  ;;  %v5798_v63 = vpop.f32.mrb[56].mxu1 }
 0x194   : > { %2046 = vst.msk [vmem:[%s5042_s21 + $0x124] sm:$0xf] %vm1972_vm4, %v4023_v31  ;;  %v2175_v28 = vadd.s32 584, %v4790_v10  ;;  %v4028_v51 = vpack.c.bf16 %v5307_v9, %v5307_v9  ;;  %v2180_v3 = vadd.s32 624, %v4790_v10  ;;  %v3208_v32 = vmul.f32 %v2816_v61, %v2816_v61  ;;  %v5806_v31 = vpop.f32.mrb[57].mxu1 }
 0x195   : > { %v2999_v58 = vadd.f32 %v2998_v37, %v2997_v26  ;;  %v3388_v41 = vadd.f32 %v3387_v50, %v3386_v55  ;;  %v4026_v62 = vpack.c.bf16 %v5313_v33, %v5313_v33  ;;  %vm2435_vm8 = vcmp.lt.s32.totalorder %v2307_v60, 8192  ;;  %v5811_v60 = vpop.f32.mrb[58].mxu1 }
 0x196   : > { %v2305_v20 = vadd.s32 %v4796_v14, %v2175_v28  ;;  %2051 = vst.msk [vmem:[%s5042_s21 + $0x138] sm:$0xf] %vm1972_vm4, %v4028_v51  ;;  %v2310_v42 = vadd.s32 %v4796_v14, %v2180_v3  ;;  %v2178_v15 = vadd.s32 608, %v4790_v10  ;;  %v2819_v50 = vsel %vm2435_vm8, %v5272_v17, 0.0  ;;  %v5819_v51 = vpop.f32.mrb[59].mxu1 }
 0x197   : > { %v3390_v47 = vadd.f32 %v3389_v30, %v3388_v41  ;;  %v3001_v37 = vadd.f32 %v5253_v34, %v2999_v58  ;;  %2049 = vst.msk [vmem:[%s5042_s21 + $0x130] sm:$0xf] %vm1972_vm4, %v4026_v62  ;;  %v4029_v16 = vpack.c.bf16 %v5320_v57, %v5320_v57  ;;  %v5809_v26 = vsel %vm2872_vm7, %v2816_v61, 0.0 }
 0x198   : > { %v3211_v55 = vmul.f32 %v2819_v50, %v2819_v50  ;;  %vm2433_vm9 = vcmp.lt.s32.totalorder %v2305_v20, 8192  ;;  %vm2438_vm10 = vcmp.lt.s32.totalorder %v2310_v42, 8192  ;;  %v5822_v61 = vsel %vm2872_vm7, %v3208_v32, 0.0 }
 0x199   : > { %v3392_v30 = vadd.f32 %v5287_v25, %v3390_v47  ;;  %v3003_v34 = vadd.f32 %v5383_v18, %v3001_v37  ;;  %v2817_v17 = vsel %vm2433_vm9, %v5279_v53, 0.0  ;;  %v2822_v28 = vsel %vm2438_vm10, %v5307_v9, 0.0  ;;  %2052 = vst.msk [vmem:[%s5042_s21 + $0x13c] sm:$0xf] %vm1972_vm4, %v4029_v16 }
 0x19a   : > { %v5825_v3 = vsel %vm2872_vm7, %v2819_v50, 0.0  ;;  %v5828_v58 = vsel %vm2872_vm7, %v3211_v55, 0.0  ;;  %v5831_v25 = vsel %vm2872_vm7, %v2817_v17, 0.0  ;;  %v3209_v18 = vmul.f32 %v2817_v17, %v2817_v17  ;;  %v5852_v55 = vpop.f32.mrb[60].mxu1 }
 0x19b   : > { %v3005_v53 = vadd.f32 %v5207_v54, %v3003_v34  ;;  %v3394_v9 = vadd.f32 %v5419_v44, %v3392_v30  ;;  %v2308_v41 = vadd.s32 %v4796_v14, %v2178_v15  ;;  %v5837_v32 = vsel %vm2872_vm7, %v2822_v28, 0.0  ;;  %v5857_v17 = vpop.f32.mrb[61].mxu1 }
 0x19c   : > { %v2181_v62 = vadd.s32 632, %v4790_v10  ;;  %v4027_v20 = vpack.c.bf16 %v5329_v19, %v5329_v19  ;;  %v2179_v42 = vadd.s32 616, %v4790_v10  ;;  %v3214_v54 = vmul.f32 %v2822_v28, %v2822_v28 }
 0x19d   : > { %v3396_v47 = vadd.f32 %v5242_v7, %v3394_v9  ;;  %v3007_v37 = vadd.f32 %v5325_v0, %v3005_v53  ;;  %vm2436_vm11 = vcmp.lt.s32.totalorder %v2308_v41, 8192  ;;  %v4032_v16 = vpack.c.bf16 %v5353_v11, %v5353_v11  ;;  %v5864_v53 = vpop.f32.mrb[62].mxu1 }
 0x19e   : > { %v2820_v44 = vsel %vm2436_vm11, %v5313_v33, 0.0  ;;  %v2311_v15 = vadd.s32 %v4796_v14, %v2181_v62  ;;  %2050 = vst.msk [vmem:[%s5042_s21 + $0x134] sm:$0xf] %vm1972_vm4, %v4027_v20  ;;  %v2309_v50 = vadd.s32 %v4796_v14, %v2179_v42  ;;  %v3409_v30 = vsel %vm2872_vm7, %v3209_v18, 0.0  ;;  %v5872_v41 = vpop.f32.mrb[63].mxu1 }
 0x19f   : > { %v3009_v7 = vadd.f32 %v5489_v46, %v3007_v37  ;;  %v3398_v0 = vadd.f32 %v5373_v52, %v3396_v47  ;;  %v3212_v34 = vmul.f32 %v2820_v44, %v2820_v44  ;;  %2055 = vst.msk [vmem:[%s5042_s21 + $0x148] sm:$0xf] %vm1972_vm4, %v4032_v16  ;;  %v2184_v33 = vadd.s32 656, %v4790_v10 }
 0x1a0   : > { %vm2439_vm12 = vcmp.lt.s32.totalorder %v2311_v15, 8192  ;;  %vm2437_vm13 = vcmp.lt.s32.totalorder %v2309_v50, 8192  ;;  %v4030_v28 = vpack.c.bf16 %v5360_v23, %v5360_v23  ;;  %v5869_v9 = vsel %vm2872_vm7, %v3214_v54, 0.0 }
 0x1a1   : > { %v3400_v46 = vadd.f32 %v5522_v59, %v3398_v0  ;;  %v3011_v52 = vadd.f32 %v5651_v45, %v3009_v7  ;;  %v2823_v18 = vsel %vm2439_vm12, %v5320_v57, 0.0  ;;  %v3024_v62 = vsel %vm2872_vm7, %v2820_v44, 0.0 }
 0x1a2   : > { %v3215_v20 = vmul.f32 %v2823_v18, %v2823_v18  ;;  %v2821_v42 = vsel %vm2437_vm13, %v5329_v19, 0.0  ;;  %v2314_v47 = vadd.s32 %v4796_v14, %v2184_v33  ;;  %2053 = vst.msk [vmem:[%s5042_s21 + $0x140] sm:$0xf] %vm1972_vm4, %v4030_v28  ;;  %v3415_v37 = vsel %vm2872_vm7, %v3212_v34, 0.0 }
 0x1a3   : > { %v3013_v59 = vadd.f32 %v5443_v22, %v3011_v52  ;;  %v3402_v45 = vadd.f32 %v5695_v39, %v3400_v46  ;;  %v3213_v54 = vmul.f32 %v2821_v42, %v2821_v42  ;;  %v5883_v57 = vsel %vm2872_vm7, %v2823_v18, 0.0 }
 0x1a4   : > { %vm2442_vm14 = vcmp.lt.s32.totalorder %v2314_v47, 8192  ;;  %v2182_v44 = vadd.s32 640, %v4790_v10  ;;  %v4033_v19 = vpack.c.bf16 %v5367_v8, %v5367_v8  ;;  %v3026_v22 = vsel %vm2872_vm7, %v2821_v42, 0.0 }
 0x1a5   : > { %v3404_v15 = vadd.f32 %v5478_v2, %v3402_v45  ;;  %v3015_v50 = vadd.f32 %v5560_v6, %v3013_v59  ;;  %v2826_v39 = vsel %vm2442_vm14, %v5353_v11, 0.0  ;;  %v5893_v16 = vsel %vm2872_vm7, %v3215_v20, 0.0 }
 0x1a6   : > { %v3417_v7 = vsel %vm2872_vm7, %v3213_v54, 0.0  ;;  %v2312_v0 = vadd.s32 %v4796_v14, %v2182_v44  ;;  %2056 = vst.msk [vmem:[%s5042_s21 + $0x14c] sm:$0xf] %vm1972_vm4, %v4033_v19  ;;  %v2185_v34 = vadd.s32 664, %v4790_v10  ;;  %v4031_v11 = vpack.c.bf16 %v5375_v1, %v5375_v1 }
 0x1a7   : > { %v3017_v2 = vadd.f32 %v5809_v26, %v3015_v50  ;;  %v3406_v6 = vadd.f32 %v5605_v13, %v3404_v15  ;;  %v2183_v33 = vadd.s32 648, %v4790_v10  ;;  %v3218_v28 = vmul.f32 %v2826_v39, %v2826_v39 }
 0x1a8   : > { %vm2440_vm15 = vcmp.lt.s32.totalorder %v2312_v0, 8192  ;;  %v2315_v46 = vadd.s32 %v4796_v14, %v2185_v34  ;;  %v4036_v52 = vpack.c.bf16 %v5401_v5, %v5401_v5  ;;  %2054 = vst.msk [vmem:[%s5042_s21 + $0x144] sm:$0xf] %vm1972_vm4, %v4031_v11  ;;  %v5915_v42 = vsel %vm2872_vm7, %v2826_v39, 0.0 }
 0x1a9   : > { %v3408_v18 = vadd.f32 %v5822_v61, %v3406_v6  ;;  %v3019_v20 = vadd.f32 %v5831_v25, %v3017_v2  ;;  %v2824_v26 = vsel %vm2440_vm15, %v5360_v23, 0.0  ;;  %v2313_v13 = vadd.s32 %v4796_v14, %v2183_v33 }
 0x1aa   : > { %v3216_v47 = vmul.f32 %v2824_v26, %v2824_v26  ;;  %vm2443_vm0 = vcmp.lt.s32.totalorder %v2315_v46, 8192  ;;  %2059 = vst.msk [vmem:[%s5042_s21 + $0x158] sm:$0xf] %vm1972_vm4, %v4036_v52  ;;  %v2188_v59 = vadd.s32 688, %v4790_v10  ;;  %v5923_v23 = vsel %vm2872_vm7, %v3218_v28, 0.0 }
 0x1ab   : > { %v3021_v45 = vadd.f32 %v5752_v48, %v3019_v20  ;;  %v3410_v61 = vadd.f32 %v3409_v30, %v3408_v18  ;;  %v2827_v25 = vsel %vm2443_vm0, %v5367_v8, 0.0  ;;  %vm2441_vm1 = vcmp.lt.s32.totalorder %v2313_v13, 8192 }
 0x1ac   : > { %v3032_v54 = vsel %vm2872_vm7, %v2824_v26, 0.0  ;;  %v3423_v44 = vsel %vm2872_vm7, %v3216_v47, 0.0  ;;  %v2825_v19 = vsel %vm2441_vm1, %v5375_v1, 0.0  ;;  %v5931_v48 = vsel %vm2872_vm7, %v2827_v25, 0.0 }
 0x1ad   : > { %v3412_v15 = vadd.f32 %v5782_v12, %v3410_v61  ;;  %v3023_v50 = vadd.f32 %v5825_v3, %v3021_v45  ;;  %v3219_v30 = vmul.f32 %v2827_v25, %v2827_v25  ;;  %v3034_v8 = vsel %vm2872_vm7, %v2825_v19, 0.0 }
 0x1ae   : > { %v2318_v39 = vadd.s32 %v4796_v14, %v2188_v59  ;;  %v4034_v0 = vpack.c.bf16 %v5407_v24, %v5407_v24  ;;  %v2186_v34 = vadd.s32 672, %v4790_v10  ;;  %v3217_v12 = vmul.f32 %v2825_v19, %v2825_v19 }
 0x1af   : > { %v3025_v2 = vadd.f32 %v3024_v62, %v3023_v50  ;;  %v3414_v1 = vadd.f32 %v5828_v58, %v3412_v15  ;;  %v4037_v3 = vpack.c.bf16 %v5414_v4, %v5414_v4  ;;  %v2189_v11 = vadd.s32 696, %v4790_v10 }
 0x1b0   : > { %vm2446_vm2 = vcmp.lt.s32.totalorder %v2318_v39, 8192  ;;  %2057 = vst.msk [vmem:[%s5042_s21 + $0x150] sm:$0xf] %vm1972_vm4, %v4034_v0  ;;  %v2316_v6 = vadd.s32 %v4796_v14, %v2186_v34  ;;  %v4035_v33 = vpack.c.bf16 %v5423_v56, %v5423_v56  ;;  %v2187_v58 = vadd.s32 680, %v4790_v10  ;;  %v6518_v0 = vld [vmem:[#allocation27_spill] sm:$0xff] }
 0x1b1   : > { %v3416_v28 = vadd.f32 %v3415_v37, %v3414_v1  ;;  %v3027_v46 = vadd.f32 %v3026_v22, %v3025_v2  ;;  %v2830_v62 = vsel %vm2446_vm2, %v5401_v5, 0.0  ;;  %2060 = vst.msk [vmem:[%s5042_s21 + $0x15c] sm:$0xf] %vm1972_vm4, %v4037_v3  ;;  %v3429_v52 = vsel %vm2872_vm7, %v3219_v30, 0.0 }
 0x1b2   : > { %v3222_v18 = vmul.f32 %v2830_v62, %v2830_v62  ;;  %vm2444_vm3 = vcmp.lt.s32.totalorder %v2316_v6, 8192  ;;  %v2319_v20 = vadd.s32 %v4796_v14, %v2189_v11  ;;  %2058 = vst.msk [vmem:[%s5042_s21 + $0x154] sm:$0xf] %vm1972_vm4, %v4035_v33  ;;  %v2317_v22 = vadd.s32 %v4796_v14, %v2187_v58  ;;  %v6520_v11 = vld [vmem:[#allocation5_spill] sm:$0xff]  ;;  %v6521_v58 = vld [vmem:[#allocation6_spill] sm:$0xff] }
 0x1b3   : > { %v3029_v26 = vadd.f32 %v5837_v32, %v3027_v46  ;;  %v3418_v13 = vadd.f32 %v3417_v7, %v3416_v28  ;;  %v2828_v37 = vsel %vm2444_vm3, %v5407_v24, 0.0  ;;  %v3425_v5 = vsel %vm2872_vm7, %v3217_v12, 0.0  ;;  %v6519_v12 = vld [vmem:[#allocation28_spill] sm:$0xff] }
 0x1b4   : > { %v5960_v47 = vsel %vm2872_vm7, %v2830_v62, 0.0  ;;  %v3220_v59 = vmul.f32 %v2828_v37, %v2828_v37  ;;  %vm2447_vm5 = vcmp.lt.s32.totalorder %v2319_v20, 8192  ;;  %vm2445_vm6 = vcmp.lt.s32.totalorder %v2317_v22, 8192 }
 0x1b5   : > { %v3420_v45 = vadd.f32 %v5869_v9, %v3418_v13  ;;  %v3031_v61 = vadd.f32 %v5883_v57, %v3029_v26  ;;  %v2831_v25 = vsel %vm2447_vm5, %v5414_v4, 0.0  ;;  %v5966_v32 = vsel %vm2872_vm7, %v3222_v18, 0.0 }
 0x1b6   : > { %v3040_v24 = vsel %vm2872_vm7, %v2828_v37, 0.0  ;;  %v3431_v7 = vsel %vm2872_vm7, %v3220_v59, 0.0  ;;  %v2829_v19 = vsel %vm2445_vm6, %v5423_v56, 0.0  ;;  %v3046_v9 = vsel %vm2872_vm7, %v2831_v25, 0.0 }
 0x1b7   : > { %v3033_v15 = vadd.f32 %v3032_v54, %v3031_v61  ;;  %v3422_v50 = vadd.f32 %v5893_v16, %v3420_v45  ;;  %v3223_v57 = vmul.f32 %v2831_v25, %v2831_v25  ;;  %v3042_v4 = vsel %vm2872_vm7, %v2829_v19, 0.0 }
 0x1b8   : > { %v4040_v30 = vpack.c.bf16 %v5450_v27, %v5450_v27  ;;  %v2192_v39 = vadd.s32 720, %v4790_v10  ;;  %v4038_v34 = vpack.c.bf16 %v6518_v0, %v6518_v0  ;;  %v3221_v56 = vmul.f32 %v2829_v19, %v2829_v19 }
 0x1b9   : > { %v3424_v2 = vadd.f32 %v3423_v44, %v3422_v50  ;;  %v3035_v1 = vadd.f32 %v3034_v8, %v3033_v15  ;;  %v2190_v16 = vadd.s32 704, %v4790_v10  ;;  %v4041_v3 = vpack.c.bf16 %v6519_v12, %v6519_v12 }
 0x1ba   : > { %2063 = vst.msk [vmem:[%s5042_s21 + $0x168] sm:$0xf] %vm1972_vm4, %v4040_v30  ;;  %v2322_v54 = vadd.s32 %v4796_v14, %v2192_v39  ;;  %2061 = vst.msk [vmem:[%s5042_s21 + $0x160] sm:$0xf] %vm1972_vm4, %v4038_v34  ;;  %v2193_v6 = vadd.s32 728, %v4790_v10  ;;  %v4039_v33 = vpack.c.bf16 %v6520_v11, %v6520_v11  ;;  %v2191_v46 = vadd.s32 712, %v4790_v10 }
 0x1bb   : > { %v3037_v44 = vadd.f32 %v5915_v42, %v3035_v1  ;;  %v3426_v8 = vadd.f32 %v3425_v5, %v3424_v2  ;;  %v2320_v28 = vadd.s32 %v4796_v14, %v2190_v16  ;;  %2064 = vst.msk [vmem:[%s5042_s21 + $0x16c] sm:$0xf] %vm1972_vm4, %v4041_v3  ;;  %v4044_v18 = vpack.c.bf16 %v6521_v58, %v6521_v58 }
 0x1bc   : > { %vm2450_vm8 = vcmp.lt.s32.totalorder %v2322_v54, 8192  ;;  %v2323_v62 = vadd.s32 %v4796_v14, %v2193_v6  ;;  %2062 = vst.msk [vmem:[%s5042_s21 + $0x164] sm:$0xf] %vm1972_vm4, %v4039_v33  ;;  %v2196_v20 = vadd.s32 752, %v4790_v10  ;;  %v3437_v37 = vsel %vm2872_vm7, %v3223_v57, 0.0 }
 0x1bd   : > { %v3428_v42 = vadd.f32 %v5923_v23, %v3426_v8  ;;  %v3039_v26 = vadd.f32 %v5931_v48, %v3037_v44  ;;  %v2834_v13 = vsel %vm2450_vm8, %v5450_v27, 0.0  ;;  %vm2448_vm9 = vcmp.lt.s32.totalorder %v2320_v28, 8192  ;;  %2067 = vst.msk [vmem:[%s5042_s21 + $0x178] sm:$0xf] %vm1972_vm4, %v4044_v18  ;;  %v6524_v8 = vld [vmem:[#allocation8_spill] sm:$0xff] }
 0x1be   : > { %v3226_v22 = vmul.f32 %v2834_v13, %v2834_v13  ;;  %v2832_v5 = vsel %vm2448_vm9, %v6518_v0, 0.0  ;;  %vm2451_vm10 = vcmp.lt.s32.totalorder %v2323_v62, 8192  ;;  %v3433_v61 = vsel %vm2872_vm7, %v3221_v56, 0.0 }
 0x1bf   : > { %v3041_v59 = vadd.f32 %v3040_v24, %v3039_v26  ;;  %v3430_v45 = vadd.f32 %v3429_v52, %v3428_v42  ;;  %v3052_v25 = vsel %vm2872_vm7, %v2834_v13, 0.0  ;;  %v3224_v23 = vmul.f32 %v2832_v5, %v2832_v5  ;;  %v6522_v52 = vld [vmem:[#allocation7_spill] sm:$0xff] }
 0x1c0   : > { %v2835_v48 = vsel %vm2451_vm10, %v6519_v12, 0.0  ;;  %v2321_v27 = vadd.s32 %v4796_v14, %v2191_v46  ;;  %v2326_v19 = vadd.s32 %v4796_v14, %v2196_v20  ;;  %v3443_v57 = vsel %vm2872_vm7, %v3226_v22, 0.0  ;;  %v6525_v20 = vld [vmem:[#allocation9_spill] sm:$0xff]  ;;  %v6526_v22 = vld [vmem:[#allocation10_spill] sm:$0xff] }
 0x1c1   : > { %v3432_v15 = vadd.f32 %v3431_v7, %v3430_v45  ;;  %v3043_v50 = vadd.f32 %v3042_v4, %v3041_v59  ;;  %v3048_v30 = vsel %vm2872_vm7, %v2832_v5, 0.0  ;;  %v3227_v24 = vmul.f32 %v2835_v48, %v2835_v48 }
 0x1c2   : > { %vm2449_vm11 = vcmp.lt.s32.totalorder %v2321_v27, 8192  ;;  %vm2454_vm12 = vcmp.lt.s32.totalorder %v2326_v19, 8192  ;;  %v4042_v39 = vpack.c.bf16 %v6522_v52, %v6522_v52  ;;  %v3439_v7 = vsel %vm2872_vm7, %v3224_v23, 0.0 }
 0x1c3   : > { %v3045_v0 = vadd.f32 %v5960_v47, %v3043_v50  ;;  %v3434_v34 = vadd.f32 %v3433_v61, %v3432_v15  ;;  %v2833_v2 = vsel %vm2449_vm11, %v6520_v11, 0.0  ;;  %v2838_v1 = vsel %vm2454_vm12, %v6521_v58, 0.0  ;;  %v6523_v11 = vld [vmem:[#allocation29_spill] sm:$0xff] }
 0x1c4   : > { %v3054_v4 = vsel %vm2872_vm7, %v2835_v48, 0.0  ;;  %v3445_v56 = vsel %vm2872_vm7, %v3227_v24, 0.0  ;;  %v3225_v16 = vmul.f32 %v2833_v2, %v2833_v2  ;;  %2065 = vst.msk [vmem:[%s5042_s21 + $0x170] sm:$0xf] %vm1972_vm4, %v4042_v39  ;;  %v3050_v47 = vsel %vm2872_vm7, %v2833_v2, 0.0 }
 0x1c5   : > { %v3436_v54 = vadd.f32 %v5966_v32, %v3434_v34  ;;  %v3047_v12 = vadd.f32 %v3046_v9, %v3045_v0  ;;  %v2194_v3 = vadd.s32 736, %v4790_v10  ;;  %v3230_v6 = vmul.f32 %v2838_v1, %v2838_v1 }
 0x1c6   : > { %v4045_v33 = vpack.c.bf16 %v6523_v11, %v6523_v11  ;;  %v2197_v44 = vadd.s32 760, %v4790_v10  ;;  %v4043_v28 = vpack.c.bf16 %v6524_v8, %v6524_v8  ;;  %v3441_v58 = vsel %vm2872_vm7, %v3225_v16, 0.0 }
 0x1c7   : > { %v3049_v46 = vadd.f32 %v3048_v30, %v3047_v12  ;;  %v3438_v62 = vadd.f32 %v3437_v37, %v3436_v54  ;;  %v2324_v32 = vadd.s32 %v4796_v14, %v2194_v3  ;;  %v2195_v18 = vadd.s32 744, %v4790_v10 }
 0x1c8   : > { %2068 = vst.msk [vmem:[%s5042_s21 + $0x17c] sm:$0xf] %vm1972_vm4, %v4045_v33  ;;  %v2327_v9 = vadd.s32 %v4796_v14, %v2197_v44  ;;  %2066 = vst.msk [vmem:[%s5042_s21 + $0x174] sm:$0xf] %vm1972_vm4, %v4043_v28  ;;  %v4048_v42 = vpack.c.bf16 %v6525_v20, %v6525_v20  ;;  %v2200_v26 = vadd.s32 784, %v4790_v10  ;;  %v4046_v5 = vpack.c.bf16 %v6526_v22, %v6526_v22 }
 0x1c9   : > { %v3440_v13 = vadd.f32 %v3439_v7, %v3438_v62  ;;  %v3051_v37 = vadd.f32 %v3050_v47, %v3049_v46  ;;  %vm2452_vm13 = vcmp.lt.s32.totalorder %v2324_v32, 8192  ;;  %v2325_v45 = vadd.s32 %v4796_v14, %v2195_v18  ;;  %v6528_v32 = vld [vmem:[#allocation12_spill] sm:$0xff] }
 0x1ca   : > { %v2836_v59 = vsel %vm2452_vm13, %v6522_v52, 0.0  ;;  %vm2455_vm14 = vcmp.lt.s32.totalorder %v2327_v9, 8192  ;;  %2071 = vst.msk [vmem:[%s5042_s21 + $0x188] sm:$0xf] %vm1972_vm4, %v4048_v42  ;;  %v2330_v61 = vadd.s32 %v4796_v14, %v2200_v26  ;;  %2069 = vst.msk [vmem:[%s5042_s21 + $0x180] sm:$0xf] %vm1972_vm4, %v4046_v5  ;;  %v4047_v9 = vpack.c.bf16 %v6528_v32, %v6528_v32 }
 0x1cb   : > { %v3053_v23 = vadd.f32 %v3052_v25, %v3051_v37  ;;  %v3442_v48 = vadd.f32 %v3441_v58, %v3440_v13  ;;  %v3056_v27 = vsel %vm2872_vm7, %v2836_v59, 0.0  ;;  %v3228_v19 = vmul.f32 %v2836_v59, %v2836_v59  ;;  %v6529_v42 = vld [vmem:[#allocation13_spill] sm:$0xff]  ;;  %v6530_v59 = vld [vmem:[#allocation14_spill] sm:$0xff] }
 0x1cc   : > { %v2839_v15 = vsel %vm2455_vm14, %v6523_v11, 0.0  ;;  %vm2453_vm15 = vcmp.lt.s32.totalorder %v2325_v45, 8192  ;;  %vm2458_vm0 = vcmp.lt.s32.totalorder %v2330_v61, 8192  ;;  %v2198_v50 = vadd.s32 768, %v4790_v10  ;;  %2070 = vst.msk [vmem:[%s5042_s21 + $0x184] sm:$0xf] %vm1972_vm4, %v4047_v9 }
 0x1cd   : > { %v3444_v30 = vadd.f32 %v3443_v57, %v3442_v48  ;;  %v3060_v24 = vsel %vm2872_vm7, %v2838_v1, 0.0  ;;  %v3055_v52 = vadd.f32 %v3054_v4, %v3053_v23  ;;  %v3447_v39 = vsel %vm2872_vm7, %v3228_v19, 0.0 }
 0x1ce   : > { %v3231_v0 = vmul.f32 %v2839_v15, %v2839_v15  ;;  %v2837_v25 = vsel %vm2453_vm15, %v6524_v8, 0.0  ;;  %v2842_v34 = vsel %vm2458_vm0, %v6525_v20, 0.0  ;;  %v2328_v2 = vadd.s32 %v4796_v14, %v2198_v50  ;;  %v6527_v8 = vld [vmem:[#allocation11_spill] sm:$0xff] }
 0x1cf   : > { %v3451_v7 = vsel %vm2872_vm7, %v3230_v6, 0.0  ;;  %v3057_v16 = vadd.f32 %v3056_v27, %v3055_v52  ;;  %v3446_v54 = vadd.f32 %v3445_v56, %v3444_v30  ;;  %v3229_v12 = vmul.f32 %v2837_v25, %v2837_v25  ;;  %v6531_v27 = vld [vmem:[#allocation15_spill] sm:$0xff] }
 0x1d0   : > { %v3062_v47 = vsel %vm2872_vm7, %v2839_v15, 0.0  ;;  %v3453_v57 = vsel %vm2872_vm7, %v3231_v0, 0.0  ;;  %v3058_v1 = vsel %vm2872_vm7, %v2837_v25, 0.0  ;;  %vm2456_vm1 = vcmp.lt.s32.totalorder %v2328_v2, 8192 }
 0x1d1   : > { %v3448_v4 = vadd.f32 %v3447_v39, %v3446_v54  ;;  %v3059_v3 = vadd.f32 %v3058_v1, %v3057_v16  ;;  %v3234_v11 = vmul.f32 %v2842_v34, %v2842_v34  ;;  %v2840_v33 = vsel %vm2456_vm1, %v6526_v22, 0.0 }
 0x1d2   : > { %v3449_v44 = vsel %vm2872_vm7, %v3229_v12, 0.0  ;;  %v3064_v6 = vsel %vm2872_vm7, %v2840_v33, 0.0  ;;  %v3232_v56 = vmul.f32 %v2840_v33, %v2840_v33  ;;  %v4049_v28 = vpack.c.bf16 %v6527_v8, %v6527_v8  ;;  %v6532_v33 = vld [vmem:[#allocation16_spill] sm:$0xff] }
 0x1d3   : > { %v3061_v46 = vadd.f32 %v3060_v24, %v3059_v3  ;;  %v3450_v62 = vadd.f32 %v3449_v44, %v3448_v4  ;;  %v2201_v58 = vadd.s32 792, %v4790_v10  ;;  %v2199_v20 = vadd.s32 776, %v4790_v10 }
 0x1d4   : > { %v3455_v18 = vsel %vm2872_vm7, %v3232_v56, 0.0  ;;  %2072 = vst.msk [vmem:[%s5042_s21 + $0x18c] sm:$0xf] %vm1972_vm4, %v4049_v28  ;;  %v4052_v26 = vpack.c.bf16 %v6529_v42, %v6529_v42  ;;  %v2204_v13 = vadd.s32 816, %v4790_v10  ;;  %v4050_v45 = vpack.c.bf16 %v6530_v59, %v6530_v59 }
 0x1d5   : > { %v3452_v37 = vadd.f32 %v3451_v7, %v3450_v62  ;;  %v3063_v22 = vadd.f32 %v3062_v47, %v3061_v46  ;;  %v2331_v5 = vadd.s32 %v4796_v14, %v2201_v58  ;;  %v2329_v61 = vadd.s32 %v4796_v14, %v2199_v20  ;;  %v6533_v62 = vld [vmem:[#allocation17_spill] sm:$0xff] }
 0x1d6   : > { %2075 = vst.msk [vmem:[%s5042_s21 + $0x198] sm:$0xf] %vm1972_vm4, %v4052_v26  ;;  %v2334_v23 = vadd.s32 %v4796_v14, %v2204_v13  ;;  %v2202_v48 = vadd.s32 800, %v4790_v10  ;;  %v4053_v19 = vpack.c.bf16 %v6531_v27, %v6531_v27  ;;  %2073 = vst.msk [vmem:[%s5042_s21 + $0x190] sm:$0xf] %vm1972_vm4, %v4050_v45  ;;  %v2205_v30 = vadd.s32 824, %v4790_v10 }
 0x1d7   : > { %v3065_v15 = vadd.f32 %v3064_v6, %v3063_v22  ;;  %v3454_v50 = vadd.f32 %v3453_v57, %v3452_v37  ;;  %vm2459_vm2 = vcmp.lt.s32.totalorder %v2331_v5, 8192  ;;  %vm2457_vm3 = vcmp.lt.s32.totalorder %v2329_v61, 8192  ;;  %v6534_v45 = vld [vmem:[#allocation18_spill] sm:$0xff] }
 0x1d8   : > { %v2843_v24 = vsel %vm2459_vm2, %v6527_v8, 0.0  ;;  %vm2462_vm5 = vcmp.lt.s32.totalorder %v2334_v23, 8192  ;;  %v2332_v52 = vadd.s32 %v4796_v14, %v2202_v48  ;;  %2076 = vst.msk [vmem:[%s5042_s21 + $0x19c] sm:$0xf] %vm1972_vm4, %v4053_v19  ;;  %v3068_v39 = vsel %vm2872_vm7, %v2842_v34, 0.0 }
 0x1d9   : > { %v3456_v0 = vadd.f32 %v3455_v18, %v3454_v50  ;;  %v3235_v25 = vmul.f32 %v2843_v24, %v2843_v24  ;;  %v2841_v2 = vsel %vm2457_vm3, %v6528_v32, 0.0  ;;  %v2846_v54 = vsel %vm2462_vm5, %v6529_v42, 0.0 }
 0x1da   : > { %v3066_v7 = vsel %vm2872_vm7, %v2841_v2, 0.0  ;;  %v3233_v16 = vmul.f32 %v2841_v2, %v2841_v2  ;;  %vm2460_vm6 = vcmp.lt.s32.totalorder %v2332_v52, 8192  ;;  %v3459_v12 = vsel %vm2872_vm7, %v3234_v11, 0.0 }
 0x1db   : > { %v3070_v47 = vsel %vm2872_vm7, %v2843_v24, 0.0  ;;  %v3067_v57 = vadd.f32 %v3066_v7, %v3065_v15  ;;  %v3238_v1 = vmul.f32 %v2846_v54, %v2846_v54  ;;  %v2844_v34 = vsel %vm2460_vm6, %v6530_v59, 0.0 }
 0x1dc   : > { %v3457_v4 = vsel %vm2872_vm7, %v3233_v16, 0.0  ;;  %v2335_v3 = vadd.s32 %v4796_v14, %v2205_v30  ;;  %v4051_v44 = vpack.c.bf16 %v6532_v33, %v6532_v33  ;;  %v3461_v6 = vsel %vm2872_vm7, %v3235_v25, 0.0 }
 0x1dd   : > { %v3069_v56 = vadd.f32 %v3068_v39, %v3067_v57  ;;  %v3458_v8 = vadd.f32 %v3457_v4, %v3456_v0  ;;  %v3072_v11 = vsel %vm2872_vm7, %v2844_v34, 0.0  ;;  %v3236_v28 = vmul.f32 %v2844_v34, %v2844_v34 }
 0x1de   : > { %vm2463_vm8 = vcmp.lt.s32.totalorder %v2335_v3, 8192  ;;  %2074 = vst.msk [vmem:[%s5042_s21 + $0x194] sm:$0xf] %vm1972_vm4, %v4051_v44  ;;  %v2203_v46 = vadd.s32 808, %v4790_v10  ;;  %v4056_v58 = vpack.c.bf16 %v6533_v62, %v6533_v62  ;;  %v2208_v20 = vadd.s32 848, %v4790_v10 }
 0x1df   : > { %v3460_v32 = vadd.f32 %v3459_v12, %v3458_v8  ;;  %v3071_v9 = vadd.f32 %v3070_v47, %v3069_v56  ;;  %v2847_v18 = vsel %vm2463_vm8, %v6531_v27, 0.0  ;;  %v3076_v42 = vsel %vm2872_vm7, %v2846_v54, 0.0  ;;  %v6535_v27 = vld [vmem:[#allocation19_spill] sm:$0xff]  ;;  %v6536_v12 = vld [vmem:[#allocation20_spill] sm:$0xff] }
 0x1e0   : > { %v3467_v26 = vsel %vm2872_vm7, %v3238_v1, 0.0  ;;  %v3463_v13 = vsel %vm2872_vm7, %v3236_v28, 0.0  ;;  %v2333_v37 = vadd.s32 %v4796_v14, %v2203_v46  ;;  %2079 = vst.msk [vmem:[%s5042_s21 + $0x1a8] sm:$0xf] %vm1972_vm4, %v4056_v58  ;;  %v2338_v59 = vadd.s32 %v4796_v14, %v2208_v20  ;;  %v6537_v28 = vld [vmem:[#allocation21_spill] sm:$0xff] }
 0x1e1   : > { %v3073_v22 = vadd.f32 %v3072_v11, %v3071_v9  ;;  %v3462_v5 = vadd.f32 %v3461_v6, %v3460_v32  ;;  %v4054_v61 = vpack.c.bf16 %v6534_v45, %v6534_v45  ;;  %v3239_v23 = vmul.f32 %v2847_v18, %v2847_v18 }
 0x1e2   : > { %vm2461_vm9 = vcmp.lt.s32.totalorder %v2333_v37, 8192  ;;  %v2206_v48 = vadd.s32 832, %v4790_v10  ;;  %v4057_v19 = vpack.c.bf16 %v6535_v27, %v6535_v27  ;;  %vm2466_vm10 = vcmp.lt.s32.totalorder %v2338_v59, 8192 }
 0x1e3   : > { %v3464_v15 = vadd.f32 %v3463_v13, %v3462_v5  ;;  %v2845_v50 = vsel %vm2461_vm9, %v6532_v33, 0.0  ;;  %2077 = vst.msk [vmem:[%s5042_s21 + $0x1a0] sm:$0xf] %vm1972_vm4, %v4054_v61  ;;  %v2209_v30 = vadd.s32 856, %v4790_v10  ;;  %v2850_v39 = vsel %vm2466_vm10, %v6533_v62, 0.0 }
 0x1e4   : > { %v3074_v24 = vsel %vm2872_vm7, %v2845_v50, 0.0  ;;  %v3237_v52 = vmul.f32 %v2845_v50, %v2845_v50  ;;  %v2336_v0 = vadd.s32 %v4796_v14, %v2206_v48  ;;  %2080 = vst.msk [vmem:[%s5042_s21 + $0x1ac] sm:$0xf] %vm1972_vm4, %v4057_v19  ;;  %v3078_v25 = vsel %vm2872_vm7, %v2847_v18, 0.0  ;;  %v6540_v50 = vld [vmem:[#allocation24_spill] sm:$0xff] }
 0x1e5   : > { %v3075_v2 = vadd.f32 %v3074_v24, %v3073_v22  ;;  %v3242_v7 = vmul.f32 %v2850_v39, %v2850_v39  ;;  %v2339_v16 = vadd.s32 %v4796_v14, %v2209_v30  ;;  %v4055_v47 = vpack.c.bf16 %v6536_v12, %v6536_v12  ;;  %v6538_v22 = vld [vmem:[#allocation22_spill] sm:$0xff] }
 0x1e6   : > { %v3465_v54 = vsel %vm2872_vm7, %v3237_v52, 0.0  ;;  %vm2464_vm11 = vcmp.lt.s32.totalorder %v2336_v0, 8192  ;;  %v2207_v57 = vadd.s32 840, %v4790_v10  ;;  %v3469_v1 = vsel %vm2872_vm7, %v3239_v23, 0.0 }
 0x1e7   : > { %v3077_v4 = vadd.f32 %v3076_v42, %v3075_v2  ;;  %v3466_v34 = vadd.f32 %v3465_v54, %v3464_v15  ;;  %v2848_v3 = vsel %vm2464_vm11, %v6534_v45, 0.0  ;;  %vm2467_vm12 = vcmp.lt.s32.totalorder %v2339_v16, 8192  ;;  %2078 = vst.msk [vmem:[%s5042_s21 + $0x1a4] sm:$0xf] %vm1972_vm4, %v4055_v47 }
 0x1e8   : > { %v3080_v33 = vsel %vm2872_vm7, %v2848_v3, 0.0  ;;  %v3240_v44 = vmul.f32 %v2848_v3, %v2848_v3  ;;  %v2337_v6 = vadd.s32 %v4796_v14, %v2207_v57  ;;  %v2851_v11 = vsel %vm2467_vm12, %v6535_v27, 0.0  ;;  %v6539_v27 = vld [vmem:[#allocation23_spill] sm:$0xff] }
 0x1e9   : > { %v3468_v56 = vadd.f32 %v3467_v26, %v3466_v34  ;;  %v3079_v8 = vadd.f32 %v3078_v25, %v3077_v4  ;;  %v4060_v46 = vpack.c.bf16 %v6537_v28, %v6537_v28  ;;  %v3084_v62 = vsel %vm2872_vm7, %v2850_v39, 0.0 }
 0x1ea   : > { %v3475_v58 = vsel %vm2872_vm7, %v3242_v7, 0.0  ;;  %v3471_v32 = vsel %vm2872_vm7, %v3240_v44, 0.0  ;;  %vm2465_vm13 = vcmp.lt.s32.totalorder %v2337_v6, 8192  ;;  %v2212_v42 = vadd.s32 880, %v4790_v10 }
 0x1eb   : > { %v3081_v9 = vadd.f32 %v3080_v33, %v3079_v8  ;;  %v3470_v18 = vadd.f32 %v3469_v1, %v3468_v56  ;;  %v2849_v20 = vsel %vm2465_vm13, %v6536_v12, 0.0  ;;  %2083 = vst.msk [vmem:[%s5042_s21 + $0x1b8] sm:$0xf] %vm1972_vm4, %v4060_v46  ;;  %v3243_v26 = vmul.f32 %v2851_v11, %v2851_v11 }
 0x1ec   : > { %v3082_v13 = vsel %vm2872_vm7, %v2849_v20, 0.0  ;;  %v3241_v37 = vmul.f32 %v2849_v20, %v2849_v20  ;;  %v4058_v5 = vpack.c.bf16 %v6538_v22, %v6538_v22  ;;  %v2342_v61 = vadd.s32 %v4796_v14, %v2212_v42 }
 0x1ed   : > { %v3472_v59 = vadd.f32 %v3471_v32, %v3470_v18  ;;  %v3083_v45 = vadd.f32 %v3082_v13, %v3081_v9  ;;  %v2210_v23 = vadd.s32 864, %v4790_v10  ;;  %v4061_v19 = vpack.c.bf16 %v6539_v27, %v6539_v27 }
 0x1ee   : > { %v3473_v48 = vsel %vm2872_vm7, %v3241_v37, 0.0  ;;  %2081 = vst.msk [vmem:[%s5042_s21 + $0x1b0] sm:$0xf] %vm1972_vm4, %v4058_v5  ;;  %v2213_v15 = vadd.s32 888, %v4790_v10  ;;  %v4059_v30 = vpack.c.bf16 %v6540_v50, %v6540_v50  ;;  %vm2470_vm14 = vcmp.lt.s32.totalorder %v2342_v61, 8192 }
 0x1ef   : > { %v3085_v24 = vadd.f32 %v3084_v62, %v3083_v45  ;;  %v3474_v52 = vadd.f32 %v3473_v48, %v3472_v59  ;;  %v2340_v39 = vadd.s32 %v4796_v14, %v2210_v23  ;;  %v3086_v0 = vsel %vm2872_vm7, %v2851_v11, 0.0  ;;  %2084 = vst.msk [vmem:[%s5042_s21 + $0x1bc] sm:$0xf] %vm1972_vm4, %v4061_v19 }
 0x1f0   : > { %v2343_v25 = vadd.s32 %v4796_v14, %v2213_v15  ;;  %2082 = vst.msk [vmem:[%s5042_s21 + $0x1b4] sm:$0xf] %vm1972_vm4, %v4059_v30  ;;  %v2211_v2 = vadd.s32 872, %v4790_v10  ;;  %v4064_v7 = vpack.c.bf16 %v5721_v43, %v5721_v43  ;;  %v3477_v16 = vsel %vm2872_vm7, %v3243_v26, 0.0 }
 0x1f1   : > { %v3476_v54 = vadd.f32 %v3475_v58, %v3474_v52  ;;  %v2854_v12 = vsel %vm2470_vm14, %v6537_v28, 0.0  ;;  %vm2468_vm15 = vcmp.lt.s32.totalorder %v2340_v39, 8192  ;;  %v3087_v57 = vadd.f32 %v3086_v0, %v3085_v24 }
 0x1f2   : > { %v2852_v47 = vsel %vm2468_vm15, %v6538_v22, 0.0  ;;  %vm2471_vm0 = vcmp.lt.s32.totalorder %v2343_v25, 8192  ;;  %v2341_v1 = vadd.s32 %v4796_v14, %v2211_v2  ;;  %2087 = vst.msk [vmem:[%s5042_s21 + $0x1c8] sm:$0xf] %vm1972_vm4, %v4064_v7  ;;  %v2216_v6 = vadd.s32 912, %v4790_v10 }
 0x1f3   : > { %v3088_v4 = vsel %vm2872_vm7, %v2852_v47, 0.0  ;;  %v3244_v34 = vmul.f32 %v2852_v47, %v2852_v47  ;;  %v3478_v3 = vadd.f32 %v3477_v16, %v3476_v54  ;;  %v2855_v44 = vsel %vm2471_vm0, %v6539_v27, 0.0 }
 0x1f4   : > { %v3089_v33 = vadd.f32 %v3088_v4, %v3087_v57  ;;  %vm2469_vm1 = vcmp.lt.s32.totalorder %v2341_v1, 8192  ;;  %v3092_v56 = vsel %vm2872_vm7, %v2854_v12, 0.0  ;;  %v3246_v8 = vmul.f32 %v2854_v12, %v2854_v12 }
 0x1f5   : > { %v3479_v11 = vsel %vm2872_vm7, %v3244_v34, 0.0  ;;  %v2853_v28 = vsel %vm2469_vm1, %v6540_v50, 0.0  ;;  %v2346_v32 = vadd.s32 %v4796_v14, %v2216_v6  ;;  %v3247_v9 = vmul.f32 %v2855_v44, %v2855_v44 }
 0x1f6   : > { %v3480_v46 = vadd.f32 %v3479_v11, %v3478_v3  ;;  %v3090_v62 = vsel %vm2872_vm7, %v2853_v28, 0.0  ;;  %v3245_v58 = vmul.f32 %v2853_v28, %v2853_v28  ;;  %v4062_v20 = vpack.c.bf16 %v5725_v49, %v5725_v49 }
 0x1f7   : > { %v3091_v18 = vadd.f32 %v3090_v62, %v3089_v33  ;;  %v2214_v42 = vadd.s32 896, %v4790_v10  ;;  %vm2474_vm2 = vcmp.lt.s32.totalorder %v2346_v32, 8192  ;;  %v4065_v13 = vpack.c.bf16 %v5732_v29, %v5732_v29 }
 0x1f8   : > { %v3481_v26 = vsel %vm2872_vm7, %v3245_v58, 0.0  ;;  %v2217_v37 = vadd.s32 920, %v4790_v10  ;;  %v3483_v22 = vsel %vm2872_vm7, %v3246_v8, 0.0  ;;  %2085 = vst.msk [vmem:[%s5042_s21 + $0x1c0] sm:$0xf] %vm1972_vm4, %v4062_v20  ;;  %v3094_v61 = vsel %vm2872_vm7, %v2855_v44, 0.0 }
 0x1f9   : > { %v3093_v5 = vadd.f32 %v3092_v56, %v3091_v18  ;;  %v3482_v59 = vadd.f32 %v3481_v26, %v3480_v46  ;;  %v2344_v45 = vadd.s32 %v4796_v14, %v2214_v42  ;;  %v2858_v23 = vsel %vm2474_vm2, %v5721_v43, 0.0  ;;  %2088 = vst.msk [vmem:[%s5042_s21 + $0x1cc] sm:$0xf] %vm1972_vm4, %v4065_v13 }
 0x1fa   : > { %v2347_v48 = vadd.s32 %v4796_v14, %v2217_v37  ;;  %v4063_v27 = vpack.c.bf16 %v5736_v40, %v5736_v40  ;;  %v2215_v50 = vadd.s32 904, %v4790_v10  ;;  %v3485_v30 = vsel %vm2872_vm7, %v3247_v9, 0.0 }
 0x1fb   : > { %v3484_v19 = vadd.f32 %v3483_v22, %v3482_v59  ;;  %vm2472_vm3 = vcmp.lt.s32.totalorder %v2344_v45, 8192  ;;  %v3095_v15 = vadd.f32 %v3094_v61, %v3093_v5  ;;  %v4068_v43 = vpack.c.bf16 %v5759_v21, %v5759_v21 }
 0x1fc   : > { %v2856_v24 = vsel %vm2472_vm3, %v5725_v49, 0.0  ;;  %vm2475_vm5 = vcmp.lt.s32.totalorder %v2347_v48, 8192  ;;  %2086 = vst.msk [vmem:[%s5042_s21 + $0x1c4] sm:$0xf] %vm1972_vm4, %v4063_v27  ;;  %v3100_v2 = vsel %vm2872_vm7, %v2858_v23, 0.0  ;;  %v3250_v7 = vmul.f32 %v2858_v23, %v2858_v23 }
 0x1fd   : > { %v3096_v52 = vsel %vm2872_vm7, %v2856_v24, 0.0  ;;  %v3248_v39 = vmul.f32 %v2856_v24, %v2856_v24  ;;  %v3486_v0 = vadd.f32 %v3485_v30, %v3484_v19  ;;  %v2859_v25 = vsel %vm2475_vm5, %v5732_v29, 0.0  ;;  %2091 = vst.msk [vmem:[%s5042_s21 + $0x1d8] sm:$0xf] %vm1972_vm4, %v4068_v43 }
 0x1fe   : > { %v3097_v16 = vadd.f32 %v3096_v52, %v3095_v15  ;;  %v2345_v54 = vadd.s32 %v4796_v14, %v2215_v50  ;;  %v2220_v12 = vadd.s32 944, %v4790_v10  ;;  %v4066_v47 = vpack.c.bf16 %v5763_v38, %v5763_v38 }
 0x1ff   : > { %v3487_v49 = vsel %vm2872_vm7, %v3248_v39, 0.0  ;;  %v2218_v57 = vadd.s32 928, %v4790_v10  ;;  %v3251_v1 = vmul.f32 %v2859_v25, %v2859_v25  ;;  %v4069_v4 = vpack.c.bf16 %v5770_v36, %v5770_v36 }
 0x200   : > { %v3488_v29 = vadd.f32 %v3487_v49, %v3486_v0  ;;  %vm2473_vm6 = vcmp.lt.s32.totalorder %v2345_v54, 8192  ;;  %v2350_v3 = vadd.s32 %v4796_v14, %v2220_v12  ;;  %2089 = vst.msk [vmem:[%s5042_s21 + $0x1d0] sm:$0xf] %vm1972_vm4, %v4066_v47  ;;  %v2221_v44 = vadd.s32 952, %v4790_v10 }
 0x201   : > { %v2857_v34 = vsel %vm2473_vm6, %v5736_v40, 0.0  ;;  %v2348_v33 = vadd.s32 %v4796_v14, %v2218_v57  ;;  %2092 = vst.msk [vmem:[%s5042_s21 + $0x1dc] sm:$0xf] %vm1972_vm4, %v4069_v4  ;;  %v4067_v8 = vpack.c.bf16 %v5773_v35, %v5773_v35  ;;  %v2219_v11 = vadd.s32 936, %v4790_v10 }
 0x202   : > { %v3098_v6 = vsel %vm2872_vm7, %v2857_v34, 0.0  ;;  %v3249_v56 = vmul.f32 %v2857_v34, %v2857_v34  ;;  %vm2478_vm8 = vcmp.lt.s32.totalorder %v2350_v3, 8192  ;;  %v2351_v28 = vadd.s32 %v4796_v14, %v2221_v44 }
 0x203   : > { %v3099_v40 = vadd.f32 %v3098_v6, %v3097_v16  ;;  %vm2476_vm9 = vcmp.lt.s32.totalorder %v2348_v33, 8192  ;;  %v3491_v46 = vsel %vm2872_vm7, %v3250_v7, 0.0  ;;  %2090 = vst.msk [vmem:[%s5042_s21 + $0x1d4] sm:$0xf] %vm1972_vm4, %v4067_v8  ;;  %v2349_v32 = vadd.s32 %v4796_v14, %v2219_v11 }
 0x204   : > { %v3489_v62 = vsel %vm2872_vm7, %v3249_v56, 0.0  ;;  %v2860_v58 = vsel %vm2476_vm9, %v5763_v38, 0.0  ;;  %v3102_v9 = vsel %vm2872_vm7, %v2859_v25, 0.0  ;;  %v2862_v42 = vsel %vm2478_vm8, %v5759_v21, 0.0 }
 0x205   : > { %v3101_v18 = vadd.f32 %v3100_v2, %v3099_v40  ;;  %v3490_v20 = vadd.f32 %v3489_v62, %v3488_v29  ;;  %v3104_v26 = vsel %vm2872_vm7, %v2860_v58, 0.0  ;;  %v3252_v13 = vmul.f32 %v2860_v58, %v2860_v58 }
 0x206   : > { %vm2479_vm10 = vcmp.lt.s32.totalorder %v2351_v28, 8192  ;;  %vm2477_vm11 = vcmp.lt.s32.totalorder %v2349_v32, 8192  ;;  %v3493_v37 = vsel %vm2872_vm7, %v3251_v1, 0.0  ;;  %v3108_v59 = vsel %vm2872_vm7, %v2862_v42, 0.0 }
 0x207   : > { %v3492_v22 = vadd.f32 %v3491_v46, %v3490_v20  ;;  %v3103_v5 = vadd.f32 %v3102_v9, %v3101_v18  ;;  %v2863_v38 = vsel %vm2479_vm10, %v5770_v36, 0.0  ;;  %v3254_v45 = vmul.f32 %v2862_v42, %v2862_v42 }
 0x208   : > { %v3495_v61 = vsel %vm2872_vm7, %v3252_v13, 0.0  ;;  %v2861_v21 = vsel %vm2477_vm11, %v5773_v35, 0.0  ;;  %v3255_v27 = vmul.f32 %v2863_v38, %v2863_v38  ;;  %v4072_v50 = vpack.c.bf16 %v5798_v63, %v5798_v63 }
 0x209   : > { %v3105_v23 = vadd.f32 %v3104_v26, %v3103_v5  ;;  %v3494_v48 = vadd.f32 %v3493_v37, %v3492_v22  ;;  %v3253_v19 = vmul.f32 %v2861_v21, %v2861_v21  ;;  %v3106_v15 = vsel %vm2872_vm7, %v2861_v21, 0.0 }
 0x20a   : > { %v2224_v36 = vadd.s32 976, %v4790_v10  ;;  %v4070_v30 = vpack.c.bf16 %v5806_v31, %v5806_v31  ;;  %v2222_v52 = vadd.s32 960, %v4790_v10  ;;  %2095 = vst.msk [vmem:[%s5042_s21 + $0x1e8] sm:$0xf] %vm1972_vm4, %v4072_v50  ;;  %v4073_v0 = vpack.c.bf16 %v5811_v60, %v5811_v60 }
 0x20b   : > { %v3496_v24 = vadd.f32 %v3495_v61, %v3494_v48  ;;  %v3107_v43 = vadd.f32 %v3106_v15, %v3105_v23  ;;  %v3497_v35 = vsel %vm2872_vm7, %v3253_v19, 0.0  ;;  %v2225_v25 = vadd.s32 984, %v4790_v10 }
 0x20c   : > { %v2354_v39 = vadd.s32 %v4796_v14, %v2224_v36  ;;  %2093 = vst.msk [vmem:[%s5042_s21 + $0x1e0] sm:$0xf] %vm1972_vm4, %v4070_v30  ;;  %v4071_v2 = vpack.c.bf16 %v5819_v51, %v5819_v51  ;;  %v3499_v7 = vsel %vm2872_vm7, %v3254_v45, 0.0  ;;  %v2352_v49 = vadd.s32 %v4796_v14, %v2222_v52  ;;  %2096 = vst.msk [vmem:[%s5042_s21 + $0x1ec] sm:$0xf] %vm1972_vm4, %v4073_v0 }
 0x20d   : > { %v3109_v16 = vadd.f32 %v3108_v59, %v3107_v43  ;;  %v3498_v54 = vadd.f32 %v3497_v35, %v3496_v24  ;;  %v3110_v12 = vsel %vm2872_vm7, %v2863_v38, 0.0  ;;  %v2223_v47 = vadd.s32 968, %v4790_v10 }
 0x20e   : > { %vm2482_vm12 = vcmp.lt.s32.totalorder %v2354_v39, 8192  ;;  %2094 = vst.msk [vmem:[%s5042_s21 + $0x1e4] sm:$0xf] %vm1972_vm4, %v4071_v2  ;;  %v4076_v57 = vpack.c.bf16 %v5852_v55, %v5852_v55  ;;  %vm2480_vm13 = vcmp.lt.s32.totalorder %v2352_v49, 8192  ;;  %v2355_v4 = vadd.s32 %v4796_v14, %v2225_v25 }
 0x20f   : > { %v3500_v29 = vadd.f32 %v3499_v7, %v3498_v54  ;;  %v3111_v1 = vadd.f32 %v3110_v12, %v3109_v16  ;;  %v3501_v34 = vsel %vm2872_vm7, %v3255_v27, 0.0  ;;  %v2864_v3 = vsel %vm2480_vm13, %v5806_v31, 0.0 }
 0x210   : > { %2099 = vst.msk [vmem:[%s5042_s21 + $0x1f8] sm:$0xf] %vm1972_vm4, %v4076_v57  ;;  %v2228_v33 = vadd.s32 1008, %v4790_v10  ;;  %v2866_v44 = vsel %vm2482_vm12, %v5798_v63, 0.0  ;;  %v3112_v6 = vsel %vm2872_vm7, %v2864_v3, 0.0  ;;  %v3256_v56 = vmul.f32 %v2864_v3, %v2864_v3 }
 0x211   : > { %v3502_v8 = vadd.f32 %v3501_v34, %v3500_v29  ;;  %v3113_v11 = vadd.f32 %v3112_v6, %v3111_v1  ;;  %vm2483_vm14 = vcmp.lt.s32.totalorder %v2355_v4, 8192  ;;  %v2353_v28 = vadd.s32 %v4796_v14, %v2223_v47 }
 0x212   : > { %v3503_v40 = vsel %vm2872_vm7, %v3256_v56, 0.0  ;;  %v4074_v31 = vpack.c.bf16 %v5857_v17, %v5857_v17  ;;  %v3258_v46 = vmul.f32 %v2866_v44, %v2866_v44  ;;  %v2226_v58 = vadd.s32 992, %v4790_v10 }
 0x213   : > { %v3504_v62 = vadd.f32 %v3503_v40, %v3502_v8  ;;  %v4077_v63 = vpack.c.bf16 %v5864_v53, %v5864_v53  ;;  %vm2481_vm15 = vcmp.lt.s32.totalorder %v2353_v28, 8192  ;;  %v2358_v32 = vadd.s32 %v4796_v14, %v2228_v33 }
 0x214   : > { %2097 = vst.msk [vmem:[%s5042_s21 + $0x1f0] sm:$0xf] %vm1972_vm4, %v4074_v31  ;;  %v2229_v9 = vadd.s32 1016, %v4790_v10  ;;  %v4075_v18 = vpack.c.bf16 %v5872_v41, %v5872_v41  ;;  %v2867_v20 = vsel %vm2483_vm14, %v5811_v60, 0.0  ;;  %v2865_v42 = vsel %vm2481_vm15, %v5819_v51, 0.0 }
 0x215   : > { %v2356_v26 = vadd.s32 %v4796_v14, %v2226_v58  ;;  %2100 = vst.msk [vmem:[%s5042_s21 + $0x1fc] sm:$0xf] %vm1972_vm4, %v4077_v63  ;;  %v2227_v13 = vadd.s32 1000, %v4790_v10  ;;  %v3116_v37 = vsel %vm2872_vm7, %v2866_v44, 0.0  ;;  %v3114_v22 = vsel %vm2872_vm7, %v2865_v42, 0.0 }
 0x216   : > { %v3257_v5 = vmul.f32 %v2865_v42, %v2865_v42  ;;  %2098 = vst.msk [vmem:[%s5042_s21 + $0x1f4] sm:$0xf] %vm1972_vm4, %v4075_v18  ;;  %v3115_v38 = vadd.f32 %v3114_v22, %v3113_v11  ;;  %v2359_v59 = vadd.s32 %v4796_v14, %v2229_v9  ;;  %v3259_v51 = vmul.f32 %v2867_v20, %v2867_v20 }
 0x217   : > { %vm2484_vm0 = vcmp.lt.s32.totalorder %v2356_v26, 8192  ;;  %v2357_v60 = vadd.s32 %v4796_v14, %v2227_v13  ;;  %vm2486_vm1 = vcmp.lt.s32.totalorder %v2358_v32, 8192  ;;  %v3507_v10 = vsel %vm2872_vm7, %v3258_v46, 0.0 }
 0x218   : > { %v3505_v45 = vsel %vm2872_vm7, %v3257_v5, 0.0  ;;  %v2868_v61 = vsel %vm2484_vm0, %v5857_v17, 0.0  ;;  %v3117_v21 = vadd.f32 %v3116_v37, %v3115_v38  ;;  %v3118_v27 = vsel %vm2872_vm7, %v2867_v20, 0.0 }
 0x219   : > { %v3506_v23 = vadd.f32 %v3505_v45, %v3504_v62  ;;  %v3260_v48 = vmul.f32 %v2868_v61, %v2868_v61  ;;  %v3120_v19 = vsel %vm2872_vm7, %v2868_v61, 0.0  ;;  %vm2487_vm4 = vcmp.lt.s32.totalorder %v2359_v59, 8192 }
 0x21a   : > { %vm2485_vm2 = vcmp.lt.s32.totalorder %v2357_v60, 8192  ;;  %v2870_v14 = vsel %vm2486_vm1, %v5852_v55, 0.0  ;;  %v3119_v50 = vadd.f32 %v3118_v27, %v3117_v21  ;;  %v3509_v36 = vsel %vm2872_vm7, %v3259_v51, 0.0 }
 0x21b   : > { %v3508_v15 = vadd.f32 %v3507_v10, %v3506_v23  ;;  %v3511_v30 = vsel %vm2872_vm7, %v3260_v48, 0.0  ;;  %v2869_v17 = vsel %vm2485_vm2, %v5872_v41, 0.0  ;;  %v2871_v35 = vsel %vm2487_vm4, %v5864_v53, 0.0 }
 0x21c   : > { %v3121_v24 = vadd.f32 %v3120_v19, %v3119_v50  ;;  %v3261_v52 = vmul.f32 %v2869_v17, %v2869_v17  ;;  %v3262_v39 = vmul.f32 %v2870_v14, %v2870_v14  ;;  %v3122_v0 = vsel %vm2872_vm7, %v2869_v17, 0.0 }
 0x21d   : > { %v3510_v43 = vadd.f32 %v3509_v36, %v3508_v15  ;;  %v3124_v55 = vsel %vm2872_vm7, %v2870_v14, 0.0  ;;  %v3263_v7 = vmul.f32 %v2871_v35, %v2871_v35  ;;  %v3126_v53 = vsel %vm2872_vm7, %v2871_v35, 0.0 }
 0x21e   : > { %v3123_v2 = vadd.f32 %v3122_v0, %v3121_v24  ;;  %v3513_v16 = vsel %vm2872_vm7, %v3261_v52, 0.0  ;;  %v3515_v41 = vsel %vm2872_vm7, %v3262_v39, 0.0  ;;  %vm3134_vm3 = vcmask 516096  }
 0x21f   : > { %v3512_v25 = vadd.f32 %v3511_v30, %v3510_v43  ;;  %v3517_v57 = vsel %vm2872_vm7, %v3263_v7, 0.0 }
 0x220   : > { %v3125_v54 = vadd.f32 %v3124_v55, %v3123_v2 }
 0x221   : > { %v3514_v49 = vadd.f32 %v3513_v16, %v3512_v25 }
 0x222   : > { %v3127_v12 = vadd.f32 %v3126_v53, %v3125_v54 }
 0x223   : > { %v3516_v47 = vadd.f32 %v3515_v41, %v3514_v49 }
 0x224   : > { %v3128_v29 = vrot.slane %v3127_v12, 4 }
 0x225   : > { %v3518_v1 = vadd.f32 %v3517_v57, %v3516_v47 }
 0x226   : > { %v3129_v4 = vadd.f32 %v3128_v29, %v3127_v12 }
 0x227   : > { %v3519_v34 = vrot.slane %v3518_v1, 4 }
 0x228   : > { %v3130_v3 = vrot.slane %v3129_v4, 2 }
 0x229   : > { %v3520_v33 = vadd.f32 %v3519_v34, %v3518_v1 }
 0x22a   : > { %v3131_v44 = vadd.f32 %v3130_v3, %v3129_v4 }
 0x22b   : > { %v3521_v6 = vrot.slane %v3520_v33, 2 }
 0x22c   : > { %v3132_v56 = vrot.slane %v3131_v44, 1 }
 0x22d   : > { %v3522_v8 = vadd.f32 %v3521_v6, %v3520_v33 }
 0x22e   : > { %v3133_v11 = vadd.f32 %v3132_v56, %v3131_v44 }
 0x22f   : > { %v3523_v40 = vrot.slane %v3522_v8, 1 }
 0x230   : > { %3135 = vst.msk [vmem:[%s202_s5] sm:$0x1] %vm3134_vm3, %v3133_v11 }
 0x231   : > { %v3524_v28 = vadd.f32 %v3523_v40, %v3522_v8 }
 0x233   : > { %3525 = vst.msk [vmem:[%s202_s5 + $0x1] sm:$0x1] %vm3134_vm3, %v3524_v28 }
 0x234   : > { %4455 = shalt.err (!%p4452_p7)
}
 0x235   : > { %s4456_s21 = scalar_lea.hbm %s6347_s16, 32  ;;  %s4460_s28 = scalar_lea.hbm %s6403_s3, 512 }
 0x236   : > { %p4457_p9 = scmp.ne.s32.totalorder %s6347_s16, %s4456_s21  ;;  %p4461_p12 = scmp.lt.u32.totalorder %s6347_s16, %s6403_s3 }
 0x237   : > { %p4462_p13 = scmp.lt.u32.totalorder %s4460_s28, %s4456_s21  ;;  %p4464_p1 = scmp.lt.u32.totalorder %s4456_s21, %s6347_s16 }
 0x238   : > { %p4458_p10 = pnand %p4457_p9, %p4611_p3 }
 0x239   : > { %p4463_p0 = por %p4462_p13, %p4461_p12 }
 0x23a   : > { %p4459_p11 = pneg %p4458_p10 }
 0x23b   : > { %p4465_p2 = por %p4464_p1, %p4463_p0 }
 0x23d   : > { %p4466_p4 = pnand %p4465_p2, %p4459_p11 }
 0x23f   : > { %4469 = shalt.err (!%p4466_p4)
}
 0x240   : > { %4300 = dma.vmem_to_hbm [thread:$0]  (%p4611_p3), %s6349_s6, 32, %s6347_s16, %s3536_s15  }
 0x241 PF: > { %p4306_p5 = scmp.ge.s32.totalorder %s4536_s19, 2  ;;  %s3579_s5 = sand.u32 1, %s4508_s12  }
 0x242   : > { %s3580_s7 = scalar_lea.sflag [#allocation3], %s3579_s5 }
 0x243   : > { %p4303_p6 = pnand %p4306_p5, %p4620_p8 }
 0x245   : > { %4503 = dma.done.wait (!%p4303_p6), %s3580_s7, 32  }
 0x246   : > { %4505 = vsyncadd (!%p4303_p6), %s3580_s7, 4294967264  ;;  %s17_s19 = sadd.s32 1, %s4536_s19   ;;  %s6541_s12 = smov %s4512_s13 }
 0x247   : > { %p14_p7 = scmp.ge.s32.totalorder %s17_s19, 18   ;;  %s6542_s13 = smov %s4516_s14 }
 0x248   : > { %s6543_s14 = smov %s4629_s30  ;;  %s6544_s15 = smov %s4528_s17 }
 0x249   : > { %s6545_s16 = smov %s4532_s18  ;;  %s6546_s17 = smov %s6549_s22 }
 0x24a   : > { %s6547_s18 = smov %s6553_s23  ;;  %16 = sbr.rel (!%p14_p7) target bundleno = 5 (0x5), region = 75 }
 0x251   :  { %3585 = vsyncpa [#allocation3], 1 }
 0x252   :  { %3587 = vsyncpa [#allocation3 + $0x1], 1 }

</bundles_post_ra>
